<compile_context>
chip_gen: v7x
topology: tpu7x:2x2x1
jax: 0.10.0
libtpu: 0.0.40
codegen_flags: <defaults>
</compile_context>

<pallas_src>
import functools

import jax
import jax.numpy as jnp
from jax import lax
from jax.experimental import pallas as pl
from jax.experimental.pallas import tpu as pltpu

D = 32          # node feature width (Linear(32, 32))
HIDDEN = 256    # hidden_size of node_mlp / edge_mlp


def _round_up(x, m):
    return ((x + m - 1) // m) * m


def _choose_batch_block(batch, max_block=8):
    """Number of batch elements packed per grid step.

    Keeps >= 2 grid steps when B >= 2 (so v7x's two TensorCores both get work
    under dimension_semantics=("parallel",)) while packing up to `max_block`
    elements per step to amortize per-step overhead and raise matmul M.
    """
    if batch <= 1:
        return 1
    return int(min(max_block, -(-batch // 2)))


# ----------------------------------------------------------------------------
# fused kernel factory: one grid step == Bt batch elements == entire mGNNBlock
# ----------------------------------------------------------------------------
def _make_kernel(Bt, Nr, Nf, Nrh, Nfh, Ntot_pad):
    OFF_R, OFF_F = 0, Nr
    OFF_RH, OFF_FH = Nr + Nf, Nr + Nf + Nrh
    streams = ((OFF_R, Nr), (OFF_F, Nf), (OFF_RH, Nrh), (OFF_FH, Nfh))
    H = HIDDEN
    f32 = jnp.float32

    def kernel(node_ref, rpast_ref, fpast_ref, rfront_ref,
               wqkv_ref, winter_ref, nw1x_ref, nw1a_ref, nw2_ref,
               bqkv_ref, binter_ref, b256_ref, nb2_ref,
               node_out_ref, edge_out_ref,
               qkv_s, proj_s, att_s, xb_s):
        wqkv = wqkv_ref[...]
        winter = winter_ref[...]
        nw1x = nw1x_ref[...]
        nw1a = nw1a_ref[...]
        nw2 = nw2_ref[...]
        bqkv = bqkv_ref[...]
        binter = binter_ref[...]
        nb1 = b256_ref[0:1, :]
        ew1d = b256_ref[1:2, :]
        ew2 = b256_ref[2:3, :]
        nb2 = nb2_ref[...]

        def mdot(a, w):
            # weights may be bf16 on v6e/v7x; always accumulate in f32.
            return jnp.dot(a.astype(w.dtype), w, preferred_element_type=f32)

        def softmax_last(s):
            m = jnp.max(s, axis=-1, keepdims=True)
            e = jnp.exp(s - m)
            return e / jnp.sum(e, axis=-1, keepdims=True)

        def node_mlp_residual(x, att):
            # node_mlp(cat(x, att)) with W1 column-split over [x | att]
            # (two dots instead of a lane-concat + single k=64 dot).
            h = jnp.maximum(mdot(x, nw1x) + mdot(att, nw1a) + nb1, 0.0)
            return x + mdot(h, nw2) + nb2

        def edge_block(hr, hf, yv, dis):
            # edge_mlp layer 1 on cat(x_q_i, y_k_j, dis_ij); Q/K projections
            # precomposed into W_inter, layer-1 bias folded into hr.  dis
            # arrives as (Nx, Ny, 1) so Ny already sits on sublanes.
            hh = jnp.maximum(hr[:, None, :] + hf[None, :, :] + dis * ew1d, 0.0)
            # edge_mlp layer 2 (Linear(256,1)); its bias is softmax-shift
            # invariant and dropped host-side.
            # TODO(synk): at large Nx*Ny, tile over Ny and do this 256-wide
            # reduction as an MXU matmul ((Nx*Ny,256)@(256,1)).
            sc = jnp.sum(hh * ew2, axis=-1)                       # (Nx, Ny)
            e = softmax_last(sc)
            att = jnp.dot(e, yv, preferred_element_type=f32)      # (Nx, 32)
            return e, att

        # rows Ntot..Ntot_pad of each batch element are padding; keep them
        # finite so the row-wise packed MLPs stay clean.
        att_s[...] = jnp.zeros_like(att_s)

        # ---- stage 0: intra-graph self-attention, all 4 streams x Bt -------
        x0 = node_ref[...]                                        # (R, 32)
        qkv_s[...] = mdot(x0, wqkv) + bqkv                        # (R, 96)
        for b in range(Bt):
            base = b * Ntot_pad
            for off, n in streams:
                r0 = base + off
                q = qkv_s[r0:r0 + n, 0:D]
                k = qkv_s[r0:r0 + n, D:2 * D]
                v = qkv_s[r0:r0 + n, 2 * D:3 * D]
                sc = lax.dot_general(q, k, (((1,), (1,)), ((), ())),
                                     preferred_element_type=f32)  # q @ k^T
                att_s[r0:r0 + n, :] = jnp.dot(softmax_last(sc), v,
                                              preferred_element_type=f32)
        x1 = node_mlp_residual(x0, att_s[...])                    # (R, 32)
        # frontier / robot_history / frontier_history rows are final already.
        node_out_ref[...] = x1

        # ---- stage A: inter robot<-robot_history, frontier<-frontier_history
        proj_s[...] = mdot(x1, winter) + binter                   # (R, 544)
        for b in range(Bt):
            base = b * Ntot_pad
            # robot <- robot_history (dis = robot_past)
            _, att = edge_block(
                proj_s[base + OFF_R:base + OFF_R + Nr, 0:H],
                proj_s[base + OFF_RH:base + OFF_RH + Nrh, H:2 * H],
                proj_s[base + OFF_RH:base + OFF_RH + Nrh, 2 * H:2 * H + D],
                rpast_ref[b])
            att_s[base + OFF_R:base + OFF_R + Nr, :] = att
            # frontier <- frontier_history (dis = frontier_past)
            _, att = edge_block(
                proj_s[base + OFF_F:base + OFF_F + Nf, 0:H],
                proj_s[base + OFF_FH:base + OFF_FH + Nfh, H:2 * H],
                proj_s[base + OFF_FH:base + OFF_FH + Nfh, 2 * H:2 * H + D],
                fpast_ref[b])
            att_s[base + OFF_F:base + OFF_F + Nf, :] = att
        # one full-row node MLP; only robot (-> robot') and frontier
        # (-> temp_frontier) rows are meaningful and consumed downstream.
        x2 = node_mlp_residual(x1, att_s[...])

        # ---- stage B: inter robot' <- temp_frontier (dis = robot_frontier) -
        proj_s[...] = mdot(x2, winter) + binter
        for b in range(Bt):
            base = b * Ntot_pad
            e, att = edge_block(
                proj_s[base + OFF_R:base + OFF_R + Nr, 0:H],
                proj_s[base + OFF_F:base + OFF_F + Nf, H:2 * H],
                proj_s[base + OFF_F:base + OFF_F + Nf, 2 * H:2 * H + D],
                rfront_ref[b])
            edge_out_ref[b] = e
            att_s[base + OFF_R:base + OFF_R + Nr, :] = att
        xb_s[...] = node_mlp_residual(x2, att_s[...])
        for b in range(Bt):
            base = b * Ntot_pad
            node_out_ref[base:base + Nr, :] = xb_s[base:base + Nr, :]

    return kernel


# ----------------------------------------------------------------------------
# pallas_call wrapper
# ----------------------------------------------------------------------------
def _const_spec(shape):
    nd = len(shape)
    return pl.BlockSpec(shape, lambda i, _nd=nd: (0,) * _nd)


def _mgnn_block_call(params, node_flat, rpast, fpast, rfront,
                     Bt, Nr, Nf, Nrh, Nfh, Ntot_pad, matmul_dtype):
    Bp = rpast.shape[0]
    assert Bp % Bt == 0
    grid_b = Bp // Bt
    R = Bt * Ntot_pad

    md = matmul_dtype
    weights = (
        params["wqkv_t"].astype(md), params["w_inter_t"].astype(md),
        params["nw1x_t"].astype(md), params["nw1a_t"].astype(md),
        params["nw2_t"].astype(md),
        params["bqkv"], params["b_inter"], params["b256"], params["nb2"],
    )

    in_specs = [
        pl.BlockSpec((R, D), lambda i: (i, 0)),
        pl.BlockSpec((Bt, Nr, Nrh, 1), lambda i: (i, 0, 0, 0)),
        pl.BlockSpec((Bt, Nf, Nfh, 1), lambda i: (i, 0, 0, 0)),
        pl.BlockSpec((Bt, Nr, Nf, 1), lambda i: (i, 0, 0, 0)),
    ] + [_const_spec(w.shape) for w in weights]
    out_specs = (pl.BlockSpec((R, D), lambda i: (i, 0)),
                 pl.BlockSpec((Bt, Nr, Nf), lambda i: (i, 0, 0)))
    out_shape = (jax.ShapeDtypeStruct((Bp * Ntot_pad, D), jnp.float32),
                 jax.ShapeDtypeStruct((Bp, Nr, Nf), jnp.float32))
    scratch_shapes = [
        pltpu.VMEM((R, 3 * D), jnp.float32),            # qkv (intra stage)
        pltpu.VMEM((R, 2 * HIDDEN + D), jnp.float32),   # inter projections
        pltpu.VMEM((R, D), jnp.float32),                # packed attention out
        pltpu.VMEM((R, D), jnp.float32),                # stage-B node-MLP out
    ]

    return pl.pallas_call(
        _make_kernel(Bt, Nr, Nf, Nrh, Nfh, Ntot_pad),
        out_shape=out_shape,
        grid=(grid_b,),
        in_specs=in_specs,
        out_specs=out_specs,
        scratch_shapes=scratch_shapes,
        compiler_params=pltpu.CompilerParams(
            dimension_semantics=("parallel",)),
    )(node_flat, rpast, fpast, rfront, *weights)


# ----------------------------------------------------------------------------
# full mGNNBlock.forward (same semantics as the PyTorch module); one jit,
# one pallas_call; the per-batch Python loops of the reference collapse into
# the batch-blocked grid.
# ----------------------------------------------------------------------------
@functools.partial(jax.jit, static_argnames=("matmul_dtype",))
def mgnn_block_forward(params, robot, frontier, robot_history, frontier_history,
                       robot_frontier, robot_past, frontier_past,
                       matmul_dtype=jnp.float32):
    batch = len(frontier)
    robot = jnp.asarray(robot, jnp.float32)
    rhist = jnp.asarray(robot_history, jnp.float32)
    fhist = jnp.asarray(frontier_history, jnp.float32)
    rpast = jnp.asarray(robot_past, jnp.float32)
    frontier_b = jnp.concatenate([jnp.asarray(f, jnp.float32) for f in frontier], axis=0)
    rfront_b = jnp.stack([jnp.asarray(m, jnp.float32) for m in robot_frontier], axis=0)
    fpast_b = jnp.stack([jnp.asarray(m, jnp.float32) for m in frontier_past], axis=0)

    B, Nr, _ = robot.shape
    Nf, Nrh, Nfh = frontier_b.shape[1], rhist.shape[1], fhist.shape[1]
    Ntot = Nr + Nf + Nrh + Nfh
    Ntot_pad = _round_up(Ntot, 8)          # keep packed rows sublane-aligned
    Bt = _choose_batch_block(B)
    Bp = _round_up(B, Bt)

    # pack the four node streams (plus row / batch padding) into one
    # lane-dense (Bp*Ntot_pad, 32) matrix; distances carry a trailing
    # singleton dim so the DMA delivers the layout the kernel consumes.
    node = jnp.concatenate([robot, frontier_b, rhist, fhist], axis=1)
    node = jnp.pad(node, ((0, Bp - B), (0, Ntot_pad - Ntot), (0, 0)))
    rpast4 = jnp.pad(rpast[..., None], ((0, Bp - B), (0, 0), (0, 0), (0, 0)))
    fpast4 = jnp.pad(fpast_b[..., None], ((0, Bp - B), (0, 0), (0, 0), (0, 0)))
    rfront4 = jnp.pad(rfront_b[..., None], ((0, Bp - B), (0, 0), (0, 0), (0, 0)))
    node_flat = node.reshape(Bp * Ntot_pad, D)

    node_out_flat, edge_out = _mgnn_block_call(
        params, node_flat, rpast4, fpast4, rfront4,
        Bt, Nr, Nf, Nrh, Nfh, Ntot_pad, matmul_dtype)

    node_out = node_out_flat.reshape(Bp, Ntot_pad, D)[:B]
    robot_out = node_out[:, 0:Nr]
    front_out = node_out[:, Nr:Nr + Nf]                  # split_frontier
    rhist_out = node_out[:, Nr + Nf:Nr + Nf + Nrh]
    fhist_out = node_out[:, Nr + Nf + Nrh:Ntot]
    edge_out = edge_out[:B]

    frontier_list = [front_out[e][None] for e in range(batch)]
    output_edge = [jnp.squeeze(edge_out[e]) for e in range(batch)]
    return robot_out, frontier_list, rhist_out, fhist_out, output_edge


# ----------------------------------------------------------------------------
# deterministic parameter init (orthogonal, relu gain, zero bias) followed by
# a host-side repack: transpose to (in, out), fuse QKV into one matrix, fuse
# the edge-MLP first layer with the Q/K projections, fold biases, drop the
# (softmax-shift-invariant) edge-MLP layer-2 bias.
# ----------------------------------------------------------------------------
def init_params(key):
    gain = float(jnp.sqrt(2.0))                       # nn.init.calculate_gain('relu')
    ortho = jax.nn.initializers.orthogonal(scale=gain)
    ks = jax.random.split(key, 7)
    Wq = ortho(ks[0], (D, D), jnp.float32)            # Linear(32, 32): (out, in)
    Wk = ortho(ks[1], (D, D), jnp.float32)
    Wv = ortho(ks[2], (D, D), jnp.float32)
    Wn1 = ortho(ks[3], (HIDDEN, 2 * D), jnp.float32)  # node_mlp Linear(64, 256)
    Wn2 = ortho(ks[4], (D, HIDDEN), jnp.float32)      # node_mlp Linear(256, 32)
    We1 = ortho(ks[5], (HIDDEN, 2 * D + 1), jnp.float32)  # edge_mlp Linear(65, 256)
    We2 = ortho(ks[6], (1, HIDDEN), jnp.float32)          # edge_mlp Linear(256, 1)

    z = lambda s: jnp.zeros(s, jnp.float32)
    bq, bk, bv = z((1, D)), z((1, D)), z((1, D))
    nb1, nb2 = z((1, HIDDEN)), z((1, D))
    eb1 = z((1, HIDDEN))
    # eb2 (Linear(256,1) bias) is omitted: a constant edge-score shift is a
    # no-op under the subsequent softmax.

    wq_t, wk_t, wv_t = Wq.T, Wk.T, Wv.T               # (in, out)
    e_w1r_t = We1[:, :D].T                            # acts on x_q  (32, 256)
    e_w1f_t = We1[:, D:2 * D].T                       # acts on y_k  (32, 256)
    e_w1d = We1[:, 2 * D].reshape(1, HIDDEN)          # acts on dis  (1, 256)
    e_w2 = We2.reshape(1, HIDDEN)                     # (1, 256)

    e_wqr_t = wq_t @ e_w1r_t                          # Q precomposed (32, 256)
    e_wkf_t = wk_t @ e_w1f_t                          # K precomposed (32, 256)
    e_bqr = bq @ e_w1r_t + eb1                        # (1, 256)
    e_bkf = bk @ e_w1f_t                              # (1, 256)

    return {
        "wqkv_t": jnp.concatenate([wq_t, wk_t, wv_t], axis=1),          # (32, 96)
        "bqkv": jnp.concatenate([bq, bk, bv], axis=1),                  # (1, 96)
        "w_inter_t": jnp.concatenate([e_wqr_t, e_wkf_t, wv_t], axis=1), # (32, 544)
        "b_inter": jnp.concatenate([e_bqr, e_bkf, bv], axis=1),         # (1, 544)
        "nw1x_t": Wn1[:, :D].T, "nw1a_t": Wn1[:, D:].T, "nw2_t": Wn2.T,
        "b256": jnp.concatenate([nb1, e_w1d, e_w2], axis=0),            # (3, 256)
        "nb2": nb2,                                                     # (1, 32)
    }


# ----------------------------------------------------------------------------
if __name__ == "__main__":
    key = jax.random.PRNGKey(0)
    kp, kd = jax.random.split(key)
    params = init_params(kp)

    batch = 2
    Nr, Nrh, Nf, Nfh = 4, 4, 6, 5
    ks = jax.random.split(kd, 10)

    robot = jax.random.normal(ks[0], (batch, Nr, D), jnp.float32)
    robot_history = jax.random.normal(ks[1], (batch, Nrh, D), jnp.float32)
    frontier = [jax.random.normal(ks[2 + e], (1, Nf, D), jnp.float32) for e in range(batch)]
    frontier_history = jax.random.normal(ks[4], (batch, Nfh, D), jnp.float32)
    robot_frontier = [jax.random.normal(ks[5 + e], (Nr, Nf), jnp.float32) for e in range(batch)]
    robot_past = jax.random.normal(ks[7], (batch, Nr, Nrh), jnp.float32)
    frontier_past = [jax.random.normal(ks[8 + e], (Nf, Nfh), jnp.float32) for e in range(batch)]

    out = mgnn_block_forward(params, robot, frontier, robot_history,
                             frontier_history, robot_frontier, robot_past,
                             frontier_past)
    jax.block_until_ready(out)
    print("KERNEL_OK")
</pallas_src>

<mosaic_0001>
module attributes {stable_mosaic.version = 11 : i64} {
  func.func @kernel(%arg0: i32, %arg1: memref<24x32xf32, #tpu.memory_space<vmem>>, %arg2: memref<1x4x4x1xf32, #tpu.memory_space<vmem>>, %arg3: memref<1x6x5x1xf32, #tpu.memory_space<vmem>>, %arg4: memref<1x4x6x1xf32, #tpu.memory_space<vmem>>, %arg5: memref<32x96xf32, #tpu.memory_space<vmem>>, %arg6: memref<32x544xf32, #tpu.memory_space<vmem>>, %arg7: memref<32x256xf32, #tpu.memory_space<vmem>>, %arg8: memref<32x256xf32, #tpu.memory_space<vmem>>, %arg9: memref<256x32xf32, #tpu.memory_space<vmem>>, %arg10: memref<1x96xf32, #tpu.memory_space<vmem>>, %arg11: memref<1x544xf32, #tpu.memory_space<vmem>>, %arg12: memref<3x256xf32, #tpu.memory_space<vmem>>, %arg13: memref<1x32xf32, #tpu.memory_space<vmem>>, %arg14: memref<24x32xf32, #tpu.memory_space<vmem>>, %arg15: memref<1x4x6xf32, #tpu.memory_space<vmem>>, %arg16: memref<24x96xf32, #tpu.memory_space<vmem>>, %arg17: memref<24x544xf32, #tpu.memory_space<vmem>>, %arg18: memref<24x32xf32, #tpu.memory_space<vmem>>, %arg19: memref<24x32xf32, #tpu.memory_space<vmem>>) attributes {dimension_semantics = [#tpu.dimension_semantics<parallel>], iteration_bounds = array<i64: 2>, scalar_prefetch = 0 : i64, scratch_operands = 4 : i64, tpu.core_type = #tpu.core_type<tc>, window_params = [{transform_indices = @transform_0, window_bounds = array<i64: 24, 32>}, {transform_indices = @transform_1, window_bounds = array<i64: 1, 4, 4, 1>}, {transform_indices = @transform_2, window_bounds = array<i64: 1, 6, 5, 1>}, {transform_indices = @transform_3, window_bounds = array<i64: 1, 4, 6, 1>}, {pipeline_mode = #tpu.pipeline_mode<synchronous>, transform_indices = @transform_4, window_bounds = array<i64: 32, 96>}, {pipeline_mode = #tpu.pipeline_mode<synchronous>, transform_indices = @transform_5, window_bounds = array<i64: 32, 544>}, {pipeline_mode = #tpu.pipeline_mode<synchronous>, transform_indices = @transform_6, window_bounds = array<i64: 32, 256>}, {pipeline_mode = #tpu.pipeline_mode<synchronous>, transform_indices = @transform_7, window_bounds = array<i64: 32, 256>}, {pipeline_mode = #tpu.pipeline_mode<synchronous>, transform_indices = @transform_8, window_bounds = array<i64: 256, 32>}, {pipeline_mode = #tpu.pipeline_mode<synchronous>, transform_indices = @transform_9, window_bounds = array<i64: 1, 96>}, {pipeline_mode = #tpu.pipeline_mode<synchronous>, transform_indices = @transform_10, window_bounds = array<i64: 1, 544>}, {pipeline_mode = #tpu.pipeline_mode<synchronous>, transform_indices = @transform_11, window_bounds = array<i64: 3, 256>}, {pipeline_mode = #tpu.pipeline_mode<synchronous>, transform_indices = @transform_12, window_bounds = array<i64: 1, 32>}, {transform_indices = @transform_13, window_bounds = array<i64: 24, 32>}, {transform_indices = @transform_14, window_bounds = array<i64: 1, 4, 6>}]} {
    %c0 = arith.constant 0 : index
    %c0_0 = arith.constant 0 : index
    %0 = vector.load %arg5[%c0, %c0_0] : memref<32x96xf32, #tpu.memory_space<vmem>>, vector<32x96xf32>
    %c0_1 = arith.constant 0 : index
    %c0_2 = arith.constant 0 : index
    %1 = vector.load %arg6[%c0_1, %c0_2] : memref<32x544xf32, #tpu.memory_space<vmem>>, vector<32x544xf32>
    %c0_3 = arith.constant 0 : index
    %c0_4 = arith.constant 0 : index
    %2 = vector.load %arg7[%c0_3, %c0_4] : memref<32x256xf32, #tpu.memory_space<vmem>>, vector<32x256xf32>
    %c0_5 = arith.constant 0 : index
    %c0_6 = arith.constant 0 : index
    %3 = vector.load %arg8[%c0_5, %c0_6] : memref<32x256xf32, #tpu.memory_space<vmem>>, vector<32x256xf32>
    %c0_7 = arith.constant 0 : index
    %c0_8 = arith.constant 0 : index
    %4 = vector.load %arg9[%c0_7, %c0_8] : memref<256x32xf32, #tpu.memory_space<vmem>>, vector<256x32xf32>
    %c0_9 = arith.constant 0 : index
    %c0_10 = arith.constant 0 : index
    %5 = vector.load %arg10[%c0_9, %c0_10] : memref<1x96xf32, #tpu.memory_space<vmem>>, vector<1x96xf32>
    %c0_11 = arith.constant 0 : index
    %c0_12 = arith.constant 0 : index
    %6 = vector.load %arg11[%c0_11, %c0_12] : memref<1x544xf32, #tpu.memory_space<vmem>>, vector<1x544xf32>
    %c0_13 = arith.constant 0 : index
    %c0_14 = arith.constant 0 : index
    %7 = vector.load %arg12[%c0_13, %c0_14] : memref<3x256xf32, #tpu.memory_space<vmem>>, vector<1x256xf32>
    %c1 = arith.constant 1 : index
    %c0_15 = arith.constant 0 : index
    %8 = vector.load %arg12[%c1, %c0_15] : memref<3x256xf32, #tpu.memory_space<vmem>>, vector<1x256xf32>
    %c2 = arith.constant 2 : index
    %c0_16 = arith.constant 0 : index
    %9 = vector.load %arg12[%c2, %c0_16] : memref<3x256xf32, #tpu.memory_space<vmem>>, vector<1x256xf32>
    %c0_17 = arith.constant 0 : index
    %c0_18 = arith.constant 0 : index
    %10 = vector.load %arg13[%c0_17, %c0_18] : memref<1x32xf32, #tpu.memory_space<vmem>>, vector<1x32xf32>
    %cst = arith.constant 0.000000e+00 : f32
    %11 = vector.broadcast %cst : f32 to vector<24x32xf32>
    %c0_19 = arith.constant 0 : index
    %c0_20 = arith.constant 0 : index
    %12 = vector.load %arg18[%c0_19, %c0_20] : memref<24x32xf32, #tpu.memory_space<vmem>>, vector<24x32xf32>
    tpu.vector_store %arg18[%c0_19, %c0_20], %11 {strides = array<i32>} : memref<24x32xf32, #tpu.memory_space<vmem>>, vector<24x32xf32>,
    %c0_21 = arith.constant 0 : index
    %c0_22 = arith.constant 0 : index
    %13 = vector.load %arg1[%c0_21, %c0_22] : memref<24x32xf32, #tpu.memory_space<vmem>>, vector<24x32xf32>
    %cst_23 = arith.constant dense<0.000000e+00> : vector<24x96xf32>
    %14 = tpu.matmul %13, %0, %cst_23 {dimension_numbers = #tpu.dot_dimension_numbers<[1], [0], [0], [1], [0, 0, 1, 1], [], []>} : vector<24x32xf32>, vector<32x96xf32>, vector<24x96xf32> -> vector<24x96xf32>
    %15 = vector.broadcast %5 : vector<1x96xf32> to vector<24x96xf32>
    %16 = arith.addf %14, %15 : vector<24x96xf32>
    %c0_24 = arith.constant 0 : index
    %c0_25 = arith.constant 0 : index
    %17 = vector.load %arg16[%c0_24, %c0_25] : memref<24x96xf32, #tpu.memory_space<vmem>>, vector<24x96xf32>
    tpu.vector_store %arg16[%c0_24, %c0_25], %16 {strides = array<i32>} : memref<24x96xf32, #tpu.memory_space<vmem>>, vector<24x96xf32>,
    %c0_26 = arith.constant 0 : index
    %c0_27 = arith.constant 0 : index
    %18 = vector.load %arg16[%c0_26, %c0_27] : memref<24x96xf32, #tpu.memory_space<vmem>>, vector<4x32xf32>
    %c0_28 = arith.constant 0 : index
    %c32 = arith.constant 32 : index
    %19 = vector.load %arg16[%c0_28, %c32] : memref<24x96xf32, #tpu.memory_space<vmem>>, vector<4x32xf32>
    %c0_29 = arith.constant 0 : index
    %c64 = arith.constant 64 : index
    %20 = vector.load %arg16[%c0_29, %c64] : memref<24x96xf32, #tpu.memory_space<vmem>>, vector<4x32xf32>
    %cst_30 = arith.constant dense<0.000000e+00> : vector<4x4xf32>
    %21 = tpu.matmul %18, %19, %cst_30 {dimension_numbers = #tpu.dot_dimension_numbers<[1], [1], [0], [0], [0, 0, 1, 0], [], []>} : vector<4x32xf32>, vector<4x32xf32>, vector<4x4xf32> -> vector<4x4xf32>
    %cst_31 = arith.constant dense<0xFF800000> : vector<4xf32>
    %22 = vector.multi_reduction <maximumf>, %21, %cst_31 [1] : vector<4x4xf32> to vector<4xf32>
    %23 = vector.shape_cast %22 : vector<4xf32> to vector<4x1xf32>
    %24 = vector.broadcast %23 : vector<4x1xf32> to vector<4x4xf32>
    %25 = arith.subf %21, %24 : vector<4x4xf32>
    %26 = math.exp %25 : vector<4x4xf32>
    %cst_32 = arith.constant dense<0.000000e+00> : vector<4xf32>
    %27 = vector.multi_reduction <add>, %26, %cst_32 [1] : vector<4x4xf32> to vector<4xf32>
    %28 = vector.shape_cast %27 : vector<4xf32> to vector<4x1xf32>
    %29 = vector.broadcast %28 : vector<4x1xf32> to vector<4x4xf32>
    %30 = arith.divf %26, %29 : vector<4x4xf32>
    %cst_33 = arith.constant dense<0.000000e+00> : vector<4x32xf32>
    %31 = tpu.matmul %30, %20, %cst_33 {dimension_numbers = #tpu.dot_dimension_numbers<[1], [0], [0], [1], [0, 0, 1, 1], [], []>} : vector<4x4xf32>, vector<4x32xf32>, vector<4x32xf32> -> vector<4x32xf32>
    %c0_34 = arith.constant 0 : index
    %c0_35 = arith.constant 0 : index
    %32 = vector.load %arg18[%c0_34, %c0_35] : memref<24x32xf32, #tpu.memory_space<vmem>>, vector<4x32xf32>
    tpu.vector_store %arg18[%c0_34, %c0_35], %31 {strides = array<i32>} : memref<24x32xf32, #tpu.memory_space<vmem>>, vector<4x32xf32>,
    %c4 = arith.constant 4 : index
    %c0_36 = arith.constant 0 : index
    %33 = vector.load %arg16[%c4, %c0_36] : memref<24x96xf32, #tpu.memory_space<vmem>>, vector<6x32xf32>
    %c4_37 = arith.constant 4 : index
    %c32_38 = arith.constant 32 : index
    %34 = vector.load %arg16[%c4_37, %c32_38] : memref<24x96xf32, #tpu.memory_space<vmem>>, vector<6x32xf32>
    %c4_39 = arith.constant 4 : index
    %c64_40 = arith.constant 64 : index
    %35 = vector.load %arg16[%c4_39, %c64_40] : memref<24x96xf32, #tpu.memory_space<vmem>>, vector<6x32xf32>
    %cst_41 = arith.constant dense<0.000000e+00> : vector<6x6xf32>
    %36 = tpu.matmul %33, %34, %cst_41 {dimension_numbers = #tpu.dot_dimension_numbers<[1], [1], [0], [0], [0, 0, 1, 0], [], []>} : vector<6x32xf32>, vector<6x32xf32>, vector<6x6xf32> -> vector<6x6xf32>
    %cst_42 = arith.constant dense<0xFF800000> : vector<6xf32>
    %37 = vector.multi_reduction <maximumf>, %36, %cst_42 [1] : vector<6x6xf32> to vector<6xf32>
    %38 = vector.shape_cast %37 : vector<6xf32> to vector<6x1xf32>
    %39 = vector.broadcast %38 : vector<6x1xf32> to vector<6x6xf32>
    %40 = arith.subf %36, %39 : vector<6x6xf32>
    %41 = math.exp %40 : vector<6x6xf32>
    %cst_43 = arith.constant dense<0.000000e+00> : vector<6xf32>
    %42 = vector.multi_reduction <add>, %41, %cst_43 [1] : vector<6x6xf32> to vector<6xf32>
    %43 = vector.shape_cast %42 : vector<6xf32> to vector<6x1xf32>
    %44 = vector.broadcast %43 : vector<6x1xf32> to vector<6x6xf32>
    %45 = arith.divf %41, %44 : vector<6x6xf32>
    %cst_44 = arith.constant dense<0.000000e+00> : vector<6x32xf32>
    %46 = tpu.matmul %45, %35, %cst_44 {dimension_numbers = #tpu.dot_dimension_numbers<[1], [0], [0], [1], [0, 0, 1, 1], [], []>} : vector<6x6xf32>, vector<6x32xf32>, vector<6x32xf32> -> vector<6x32xf32>
    %c4_45 = arith.constant 4 : index
    %c0_46 = arith.constant 0 : index
    %47 = vector.load %arg18[%c4_45, %c0_46] : memref<24x32xf32, #tpu.memory_space<vmem>>, vector<6x32xf32>
    tpu.vector_store %arg18[%c4_45, %c0_46], %46 {strides = array<i32>} : memref<24x32xf32, #tpu.memory_space<vmem>>, vector<6x32xf32>,
    %c10 = arith.constant 10 : index
    %c0_47 = arith.constant 0 : index
    %48 = vector.load %arg16[%c10, %c0_47] : memref<24x96xf32, #tpu.memory_space<vmem>>, vector<4x32xf32>
    %c10_48 = arith.constant 10 : index
    %c32_49 = arith.constant 32 : index
    %49 = vector.load %arg16[%c10_48, %c32_49] : memref<24x96xf32, #tpu.memory_space<vmem>>, vector<4x32xf32>
    %c10_50 = arith.constant 10 : index
    %c64_51 = arith.constant 64 : index
    %50 = vector.load %arg16[%c10_50, %c64_51] : memref<24x96xf32, #tpu.memory_space<vmem>>, vector<4x32xf32>
    %cst_52 = arith.constant dense<0.000000e+00> : vector<4x4xf32>
    %51 = tpu.matmul %48, %49, %cst_52 {dimension_numbers = #tpu.dot_dimension_numbers<[1], [1], [0], [0], [0, 0, 1, 0], [], []>} : vector<4x32xf32>, vector<4x32xf32>, vector<4x4xf32> -> vector<4x4xf32>
    %cst_53 = arith.constant dense<0xFF800000> : vector<4xf32>
    %52 = vector.multi_reduction <maximumf>, %51, %cst_53 [1] : vector<4x4xf32> to vector<4xf32>
    %53 = vector.shape_cast %52 : vector<4xf32> to vector<4x1xf32>
    %54 = vector.broadcast %53 : vector<4x1xf32> to vector<4x4xf32>
    %55 = arith.subf %51, %54 : vector<4x4xf32>
    %56 = math.exp %55 : vector<4x4xf32>
    %cst_54 = arith.constant dense<0.000000e+00> : vector<4xf32>
    %57 = vector.multi_reduction <add>, %56, %cst_54 [1] : vector<4x4xf32> to vector<4xf32>
    %58 = vector.shape_cast %57 : vector<4xf32> to vector<4x1xf32>
    %59 = vector.broadcast %58 : vector<4x1xf32> to vector<4x4xf32>
    %60 = arith.divf %56, %59 : vector<4x4xf32>
    %cst_55 = arith.constant dense<0.000000e+00> : vector<4x32xf32>
    %61 = tpu.matmul %60, %50, %cst_55 {dimension_numbers = #tpu.dot_dimension_numbers<[1], [0], [0], [1], [0, 0, 1, 1], [], []>} : vector<4x4xf32>, vector<4x32xf32>, vector<4x32xf32> -> vector<4x32xf32>
    %c10_56 = arith.constant 10 : index
    %c0_57 = arith.constant 0 : index
    %62 = vector.load %arg18[%c10_56, %c0_57] : memref<24x32xf32, #tpu.memory_space<vmem>>, vector<4x32xf32>
    tpu.vector_store %arg18[%c10_56, %c0_57], %61 {strides = array<i32>} : memref<24x32xf32, #tpu.memory_space<vmem>>, vector<4x32xf32>,
    %c14 = arith.constant 14 : index
    %c0_58 = arith.constant 0 : index
    %63 = vector.load %arg16[%c14, %c0_58] : memref<24x96xf32, #tpu.memory_space<vmem>>, vector<5x32xf32>
    %c14_59 = arith.constant 14 : index
    %c32_60 = arith.constant 32 : index
    %64 = vector.load %arg16[%c14_59, %c32_60] : memref<24x96xf32, #tpu.memory_space<vmem>>, vector<5x32xf32>
    %c14_61 = arith.constant 14 : index
    %c64_62 = arith.constant 64 : index
    %65 = vector.load %arg16[%c14_61, %c64_62] : memref<24x96xf32, #tpu.memory_space<vmem>>, vector<5x32xf32>
    %cst_63 = arith.constant dense<0.000000e+00> : vector<5x5xf32>
    %66 = tpu.matmul %63, %64, %cst_63 {dimension_numbers = #tpu.dot_dimension_numbers<[1], [1], [0], [0], [0, 0, 1, 0], [], []>} : vector<5x32xf32>, vector<5x32xf32>, vector<5x5xf32> -> vector<5x5xf32>
    %cst_64 = arith.constant dense<0xFF800000> : vector<5xf32>
    %67 = vector.multi_reduction <maximumf>, %66, %cst_64 [1] : vector<5x5xf32> to vector<5xf32>
    %68 = vector.shape_cast %67 : vector<5xf32> to vector<5x1xf32>
    %69 = vector.broadcast %68 : vector<5x1xf32> to vector<5x5xf32>
    %70 = arith.subf %66, %69 : vector<5x5xf32>
    %71 = math.exp %70 : vector<5x5xf32>
    %cst_65 = arith.constant dense<0.000000e+00> : vector<5xf32>
    %72 = vector.multi_reduction <add>, %71, %cst_65 [1] : vector<5x5xf32> to vector<5xf32>
    %73 = vector.shape_cast %72 : vector<5xf32> to vector<5x1xf32>
    %74 = vector.broadcast %73 : vector<5x1xf32> to vector<5x5xf32>
    %75 = arith.divf %71, %74 : vector<5x5xf32>
    %cst_66 = arith.constant dense<0.000000e+00> : vector<5x32xf32>
    %76 = tpu.matmul %75, %65, %cst_66 {dimension_numbers = #tpu.dot_dimension_numbers<[1], [0], [0], [1], [0, 0, 1, 1], [], []>} : vector<5x5xf32>, vector<5x32xf32>, vector<5x32xf32> -> vector<5x32xf32>
    %c14_67 = arith.constant 14 : index
    %c0_68 = arith.constant 0 : index
    %77 = vector.load %arg18[%c14_67, %c0_68] : memref<24x32xf32, #tpu.memory_space<vmem>>, vector<5x32xf32>
    tpu.vector_store %arg18[%c14_67, %c0_68], %76 {strides = array<i32>} : memref<24x32xf32, #tpu.memory_space<vmem>>, vector<5x32xf32>,
    %c0_69 = arith.constant 0 : index
    %c0_70 = arith.constant 0 : index
    %78 = vector.load %arg18[%c0_69, %c0_70] : memref<24x32xf32, #tpu.memory_space<vmem>>, vector<24x32xf32>
    %cst_71 = arith.constant dense<0.000000e+00> : vector<24x256xf32>
    %79 = tpu.matmul %13, %2, %cst_71 {dimension_numbers = #tpu.dot_dimension_numbers<[1], [0], [0], [1], [0, 0, 1, 1], [], []>} : vector<24x32xf32>, vector<32x256xf32>, vector<24x256xf32> -> vector<24x256xf32>
    %cst_72 = arith.constant dense<0.000000e+00> : vector<24x256xf32>
    %80 = tpu.matmul %78, %3, %cst_72 {dimension_numbers = #tpu.dot_dimension_numbers<[1], [0], [0], [1], [0, 0, 1, 1], [], []>} : vector<24x32xf32>, vector<32x256xf32>, vector<24x256xf32> -> vector<24x256xf32>
    %81 = arith.addf %79, %80 : vector<24x256xf32>
    %82 = vector.broadcast %7 : vector<1x256xf32> to vector<24x256xf32>
    %83 = arith.addf %81, %82 : vector<24x256xf32>
    %cst_73 = arith.constant 0.000000e+00 : f32
    %84 = vector.broadcast %cst_73 : f32 to vector<24x256xf32>
    %85 = arith.maximumf %83, %84 : vector<24x256xf32>
    %cst_74 = arith.constant dense<0.000000e+00> : vector<24x32xf32>
    %86 = tpu.matmul %85, %4, %cst_74 {dimension_numbers = #tpu.dot_dimension_numbers<[1], [0], [0], [1], [0, 0, 1, 1], [], []>} : vector<24x256xf32>, vector<256x32xf32>, vector<24x32xf32> -> vector<24x32xf32>
    %87 = arith.addf %13, %86 : vector<24x32xf32>
    %88 = vector.broadcast %10 : vector<1x32xf32> to vector<24x32xf32>
    %89 = arith.addf %87, %88 : vector<24x32xf32>
    %c0_75 = arith.constant 0 : index
    %c0_76 = arith.constant 0 : index
    %90 = vector.load %arg14[%c0_75, %c0_76] : memref<24x32xf32, #tpu.memory_space<vmem>>, vector<24x32xf32>
    tpu.vector_store %arg14[%c0_75, %c0_76], %89 {strides = array<i32>} : memref<24x32xf32, #tpu.memory_space<vmem>>, vector<24x32xf32>,
    %cst_77 = arith.constant dense<0.000000e+00> : vector<24x544xf32>
    %91 = tpu.matmul %89, %1, %cst_77 {dimension_numbers = #tpu.dot_dimension_numbers<[1], [0], [0], [1], [0, 0, 1, 1], [], []>} : vector<24x32xf32>, vector<32x544xf32>, vector<24x544xf32> -> vector<24x544xf32>
    %92 = vector.broadcast %6 : vector<1x544xf32> to vector<24x544xf32>
    %93 = arith.addf %91, %92 : vector<24x544xf32>
    %c0_78 = arith.constant 0 : index
    %c0_79 = arith.constant 0 : index
    %94 = vector.load %arg17[%c0_78, %c0_79] : memref<24x544xf32, #tpu.memory_space<vmem>>, vector<24x544xf32>
    tpu.vector_store %arg17[%c0_78, %c0_79], %93 {strides = array<i32>} : memref<24x544xf32, #tpu.memory_space<vmem>>, vector<24x544xf32>,
    %c0_80 = arith.constant 0 : index
    %c0_81 = arith.constant 0 : index
    %95 = vector.load %arg17[%c0_80, %c0_81] : memref<24x544xf32, #tpu.memory_space<vmem>>, vector<4x256xf32>
    %c10_82 = arith.constant 10 : index
    %c256 = arith.constant 256 : index
    %96 = vector.load %arg17[%c10_82, %c256] : memref<24x544xf32, #tpu.memory_space<vmem>>, vector<4x256xf32>
    %c10_83 = arith.constant 10 : index
    %c512 = arith.constant 512 : index
    %97 = vector.load %arg17[%c10_83, %c512] : memref<24x544xf32, #tpu.memory_space<vmem>>, vector<4x32xf32>
    %c0_84 = arith.constant 0 : index
    %c0_85 = arith.constant 0 : index
    %c0_86 = arith.constant 0 : index
    %c0_87 = arith.constant 0 : index
    %98 = vector.load %arg2[%c0_84, %c0_85, %c0_86, %c0_87] : memref<1x4x4x1xf32, #tpu.memory_space<vmem>>, vector<1x4x4x1xf32>
    %99 = vector.shape_cast %98 : vector<1x4x4x1xf32> to vector<4x4x1xf32>
    %100 = vector.shape_cast %95 : vector<4x256xf32> to vector<4x1x256xf32>
    %101 = vector.shape_cast %96 : vector<4x256xf32> to vector<1x4x256xf32>
    %102 = vector.broadcast %100 : vector<4x1x256xf32> to vector<4x4x256xf32>
    %103 = vector.broadcast %101 : vector<1x4x256xf32> to vector<4x4x256xf32>
    %104 = arith.addf %102, %103 : vector<4x4x256xf32>
    %105 = vector.shape_cast %8 : vector<1x256xf32> to vector<1x1x256xf32>
    %106 = vector.broadcast %99 : vector<4x4x1xf32> to vector<4x4x256xf32>
    %107 = vector.broadcast %105 : vector<1x1x256xf32> to vector<4x4x256xf32>
    %108 = arith.mulf %106, %107 : vector<4x4x256xf32>
    %109 = arith.addf %104, %108 : vector<4x4x256xf32>
    %cst_88 = arith.constant 0.000000e+00 : f32
    %110 = vector.broadcast %cst_88 : f32 to vector<4x4x256xf32>
    %111 = arith.maximumf %109, %110 : vector<4x4x256xf32>
    %112 = vector.shape_cast %9 : vector<1x256xf32> to vector<1x1x256xf32>
    %113 = vector.broadcast %112 : vector<1x1x256xf32> to vector<4x4x256xf32>
    %114 = arith.mulf %111, %113 : vector<4x4x256xf32>
    %cst_89 = arith.constant dense<0.000000e+00> : vector<4x4xf32>
    %115 = vector.multi_reduction <add>, %114, %cst_89 [2] : vector<4x4x256xf32> to vector<4x4xf32>
    %cst_90 = arith.constant dense<0xFF800000> : vector<4xf32>
    %116 = vector.multi_reduction <maximumf>, %115, %cst_90 [1] : vector<4x4xf32> to vector<4xf32>
    %117 = vector.shape_cast %116 : vector<4xf32> to vector<4x1xf32>
    %118 = vector.broadcast %117 : vector<4x1xf32> to vector<4x4xf32>
    %119 = arith.subf %115, %118 : vector<4x4xf32>
    %120 = math.exp %119 : vector<4x4xf32>
    %cst_91 = arith.constant dense<0.000000e+00> : vector<4xf32>
    %121 = vector.multi_reduction <add>, %120, %cst_91 [1] : vector<4x4xf32> to vector<4xf32>
    %122 = vector.shape_cast %121 : vector<4xf32> to vector<4x1xf32>
    %123 = vector.broadcast %122 : vector<4x1xf32> to vector<4x4xf32>
    %124 = arith.divf %120, %123 : vector<4x4xf32>
    %cst_92 = arith.constant dense<0.000000e+00> : vector<4x32xf32>
    %125 = tpu.matmul %124, %97, %cst_92 {dimension_numbers = #tpu.dot_dimension_numbers<[1], [0], [0], [1], [0, 0, 1, 1], [], []>} : vector<4x4xf32>, vector<4x32xf32>, vector<4x32xf32> -> vector<4x32xf32>
    %c0_93 = arith.constant 0 : index
    %c0_94 = arith.constant 0 : index
    %126 = vector.load %arg18[%c0_93, %c0_94] : memref<24x32xf32, #tpu.memory_space<vmem>>, vector<4x32xf32>
    tpu.vector_store %arg18[%c0_93, %c0_94], %125 {strides = array<i32>} : memref<24x32xf32, #tpu.memory_space<vmem>>, vector<4x32xf32>,
    %c4_95 = arith.constant 4 : index
    %c0_96 = arith.constant 0 : index
    %127 = vector.load %arg17[%c4_95, %c0_96] : memref<24x544xf32, #tpu.memory_space<vmem>>, vector<6x256xf32>
    %c14_97 = arith.constant 14 : index
    %c256_98 = arith.constant 256 : index
    %128 = vector.load %arg17[%c14_97, %c256_98] : memref<24x544xf32, #tpu.memory_space<vmem>>, vector<5x256xf32>
    %c14_99 = arith.constant 14 : index
    %c512_100 = arith.constant 512 : index
    %129 = vector.load %arg17[%c14_99, %c512_100] : memref<24x544xf32, #tpu.memory_space<vmem>>, vector<5x32xf32>
    %c0_101 = arith.constant 0 : index
    %c0_102 = arith.constant 0 : index
    %c0_103 = arith.constant 0 : index
    %c0_104 = arith.constant 0 : index
    %130 = vector.load %arg3[%c0_101, %c0_102, %c0_103, %c0_104] : memref<1x6x5x1xf32, #tpu.memory_space<vmem>>, vector<1x6x5x1xf32>
    %131 = vector.shape_cast %130 : vector<1x6x5x1xf32> to vector<6x5x1xf32>
    %132 = vector.shape_cast %127 : vector<6x256xf32> to vector<6x1x256xf32>
    %133 = vector.shape_cast %128 : vector<5x256xf32> to vector<1x5x256xf32>
    %134 = vector.broadcast %132 : vector<6x1x256xf32> to vector<6x5x256xf32>
    %135 = vector.broadcast %133 : vector<1x5x256xf32> to vector<6x5x256xf32>
    %136 = arith.addf %134, %135 : vector<6x5x256xf32>
    %137 = vector.shape_cast %8 : vector<1x256xf32> to vector<1x1x256xf32>
    %138 = vector.broadcast %131 : vector<6x5x1xf32> to vector<6x5x256xf32>
    %139 = vector.broadcast %137 : vector<1x1x256xf32> to vector<6x5x256xf32>
    %140 = arith.mulf %138, %139 : vector<6x5x256xf32>
    %141 = arith.addf %136, %140 : vector<6x5x256xf32>
    %cst_105 = arith.constant 0.000000e+00 : f32
    %142 = vector.broadcast %cst_105 : f32 to vector<6x5x256xf32>
    %143 = arith.maximumf %141, %142 : vector<6x5x256xf32>
    %144 = vector.shape_cast %9 : vector<1x256xf32> to vector<1x1x256xf32>
    %145 = vector.broadcast %144 : vector<1x1x256xf32> to vector<6x5x256xf32>
    %146 = arith.mulf %143, %145 : vector<6x5x256xf32>
    %cst_106 = arith.constant dense<0.000000e+00> : vector<6x5xf32>
    %147 = vector.multi_reduction <add>, %146, %cst_106 [2] : vector<6x5x256xf32> to vector<6x5xf32>
    %cst_107 = arith.constant dense<0xFF800000> : vector<6xf32>
    %148 = vector.multi_reduction <maximumf>, %147, %cst_107 [1] : vector<6x5xf32> to vector<6xf32>
    %149 = vector.shape_cast %148 : vector<6xf32> to vector<6x1xf32>
    %150 = vector.broadcast %149 : vector<6x1xf32> to vector<6x5xf32>
    %151 = arith.subf %147, %150 : vector<6x5xf32>
    %152 = math.exp %151 : vector<6x5xf32>
    %cst_108 = arith.constant dense<0.000000e+00> : vector<6xf32>
    %153 = vector.multi_reduction <add>, %152, %cst_108 [1] : vector<6x5xf32> to vector<6xf32>
    %154 = vector.shape_cast %153 : vector<6xf32> to vector<6x1xf32>
    %155 = vector.broadcast %154 : vector<6x1xf32> to vector<6x5xf32>
    %156 = arith.divf %152, %155 : vector<6x5xf32>
    %cst_109 = arith.constant dense<0.000000e+00> : vector<6x32xf32>
    %157 = tpu.matmul %156, %129, %cst_109 {dimension_numbers = #tpu.dot_dimension_numbers<[1], [0], [0], [1], [0, 0, 1, 1], [], []>} : vector<6x5xf32>, vector<5x32xf32>, vector<6x32xf32> -> vector<6x32xf32>
    %c4_110 = arith.constant 4 : index
    %c0_111 = arith.constant 0 : index
    %158 = vector.load %arg18[%c4_110, %c0_111] : memref<24x32xf32, #tpu.memory_space<vmem>>, vector<6x32xf32>
    tpu.vector_store %arg18[%c4_110, %c0_111], %157 {strides = array<i32>} : memref<24x32xf32, #tpu.memory_space<vmem>>, vector<6x32xf32>,
    %c0_112 = arith.constant 0 : index
    %c0_113 = arith.constant 0 : index
    %159 = vector.load %arg18[%c0_112, %c0_113] : memref<24x32xf32, #tpu.memory_space<vmem>>, vector<24x32xf32>
    %cst_114 = arith.constant dense<0.000000e+00> : vector<24x256xf32>
    %160 = tpu.matmul %89, %2, %cst_114 {dimension_numbers = #tpu.dot_dimension_numbers<[1], [0], [0], [1], [0, 0, 1, 1], [], []>} : vector<24x32xf32>, vector<32x256xf32>, vector<24x256xf32> -> vector<24x256xf32>
    %cst_115 = arith.constant dense<0.000000e+00> : vector<24x256xf32>
    %161 = tpu.matmul %159, %3, %cst_115 {dimension_numbers = #tpu.dot_dimension_numbers<[1], [0], [0], [1], [0, 0, 1, 1], [], []>} : vector<24x32xf32>, vector<32x256xf32>, vector<24x256xf32> -> vector<24x256xf32>
    %162 = arith.addf %160, %161 : vector<24x256xf32>
    %163 = vector.broadcast %7 : vector<1x256xf32> to vector<24x256xf32>
    %164 = arith.addf %162, %163 : vector<24x256xf32>
    %cst_116 = arith.constant 0.000000e+00 : f32
    %165 = vector.broadcast %cst_116 : f32 to vector<24x256xf32>
    %166 = arith.maximumf %164, %165 : vector<24x256xf32>
    %cst_117 = arith.constant dense<0.000000e+00> : vector<24x32xf32>
    %167 = tpu.matmul %166, %4, %cst_117 {dimension_numbers = #tpu.dot_dimension_numbers<[1], [0], [0], [1], [0, 0, 1, 1], [], []>} : vector<24x256xf32>, vector<256x32xf32>, vector<24x32xf32> -> vector<24x32xf32>
    %168 = arith.addf %89, %167 : vector<24x32xf32>
    %169 = vector.broadcast %10 : vector<1x32xf32> to vector<24x32xf32>
    %170 = arith.addf %168, %169 : vector<24x32xf32>
    %cst_118 = arith.constant dense<0.000000e+00> : vector<24x544xf32>
    %171 = tpu.matmul %170, %1, %cst_118 {dimension_numbers = #tpu.dot_dimension_numbers<[1], [0], [0], [1], [0, 0, 1, 1], [], []>} : vector<24x32xf32>, vector<32x544xf32>, vector<24x544xf32> -> vector<24x544xf32>
    %172 = vector.broadcast %6 : vector<1x544xf32> to vector<24x544xf32>
    %173 = arith.addf %171, %172 : vector<24x544xf32>
    %c0_119 = arith.constant 0 : index
    %c0_120 = arith.constant 0 : index
    %174 = vector.load %arg17[%c0_119, %c0_120] : memref<24x544xf32, #tpu.memory_space<vmem>>, vector<24x544xf32>
    tpu.vector_store %arg17[%c0_119, %c0_120], %173 {strides = array<i32>} : memref<24x544xf32, #tpu.memory_space<vmem>>, vector<24x544xf32>,
    %c0_121 = arith.constant 0 : index
    %c0_122 = arith.constant 0 : index
    %175 = vector.load %arg17[%c0_121, %c0_122] : memref<24x544xf32, #tpu.memory_space<vmem>>, vector<4x256xf32>
    %c4_123 = arith.constant 4 : index
    %c256_124 = arith.constant 256 : index
    %176 = vector.load %arg17[%c4_123, %c256_124] : memref<24x544xf32, #tpu.memory_space<vmem>>, vector<6x256xf32>
    %c4_125 = arith.constant 4 : index
    %c512_126 = arith.constant 512 : index
    %177 = vector.load %arg17[%c4_125, %c512_126] : memref<24x544xf32, #tpu.memory_space<vmem>>, vector<6x32xf32>
    %c0_127 = arith.constant 0 : index
    %c0_128 = arith.constant 0 : index
    %c0_129 = arith.constant 0 : index
    %c0_130 = arith.constant 0 : index
    %178 = vector.load %arg4[%c0_127, %c0_128, %c0_129, %c0_130] : memref<1x4x6x1xf32, #tpu.memory_space<vmem>>, vector<1x4x6x1xf32>
    %179 = vector.shape_cast %178 : vector<1x4x6x1xf32> to vector<4x6x1xf32>
    %180 = vector.shape_cast %175 : vector<4x256xf32> to vector<4x1x256xf32>
    %181 = vector.shape_cast %176 : vector<6x256xf32> to vector<1x6x256xf32>
    %182 = vector.broadcast %180 : vector<4x1x256xf32> to vector<4x6x256xf32>
    %183 = vector.broadcast %181 : vector<1x6x256xf32> to vector<4x6x256xf32>
    %184 = arith.addf %182, %183 : vector<4x6x256xf32>
    %185 = vector.shape_cast %8 : vector<1x256xf32> to vector<1x1x256xf32>
    %186 = vector.broadcast %179 : vector<4x6x1xf32> to vector<4x6x256xf32>
    %187 = vector.broadcast %185 : vector<1x1x256xf32> to vector<4x6x256xf32>
    %188 = arith.mulf %186, %187 : vector<4x6x256xf32>
    %189 = arith.addf %184, %188 : vector<4x6x256xf32>
    %cst_131 = arith.constant 0.000000e+00 : f32
    %190 = vector.broadcast %cst_131 : f32 to vector<4x6x256xf32>
    %191 = arith.maximumf %189, %190 : vector<4x6x256xf32>
    %192 = vector.shape_cast %9 : vector<1x256xf32> to vector<1x1x256xf32>
    %193 = vector.broadcast %192 : vector<1x1x256xf32> to vector<4x6x256xf32>
    %194 = arith.mulf %191, %193 : vector<4x6x256xf32>
    %cst_132 = arith.constant dense<0.000000e+00> : vector<4x6xf32>
    %195 = vector.multi_reduction <add>, %194, %cst_132 [2] : vector<4x6x256xf32> to vector<4x6xf32>
    %cst_133 = arith.constant dense<0xFF800000> : vector<4xf32>
    %196 = vector.multi_reduction <maximumf>, %195, %cst_133 [1] : vector<4x6xf32> to vector<4xf32>
    %197 = vector.shape_cast %196 : vector<4xf32> to vector<4x1xf32>
    %198 = vector.broadcast %197 : vector<4x1xf32> to vector<4x6xf32>
    %199 = arith.subf %195, %198 : vector<4x6xf32>
    %200 = math.exp %199 : vector<4x6xf32>
    %cst_134 = arith.constant dense<0.000000e+00> : vector<4xf32>
    %201 = vector.multi_reduction <add>, %200, %cst_134 [1] : vector<4x6xf32> to vector<4xf32>
    %202 = vector.shape_cast %201 : vector<4xf32> to vector<4x1xf32>
    %203 = vector.broadcast %202 : vector<4x1xf32> to vector<4x6xf32>
    %204 = arith.divf %200, %203 : vector<4x6xf32>
    %cst_135 = arith.constant dense<0.000000e+00> : vector<4x32xf32>
    %205 = tpu.matmul %204, %177, %cst_135 {dimension_numbers = #tpu.dot_dimension_numbers<[1], [0], [0], [1], [0, 0, 1, 1], [], []>} : vector<4x6xf32>, vector<6x32xf32>, vector<4x32xf32> -> vector<4x32xf32>
    %c0_136 = arith.constant 0 : index
    %c0_137 = arith.constant 0 : index
    %c0_138 = arith.constant 0 : index
    %206 = vector.load %arg15[%c0_136, %c0_137, %c0_138] : memref<1x4x6xf32, #tpu.memory_space<vmem>>, vector<1x4x6xf32>
    %207 = vector.shape_cast %206 : vector<1x4x6xf32> to vector<4x6xf32>
    %208 = vector.shape_cast %204 : vector<4x6xf32> to vector<1x4x6xf32>
    tpu.vector_store %arg15[%c0_136, %c0_137, %c0_138], %208 {strides = array<i32>} : memref<1x4x6xf32, #tpu.memory_space<vmem>>, vector<1x4x6xf32>,
    %c0_139 = arith.constant 0 : index
    %c0_140 = arith.constant 0 : index
    %209 = vector.load %arg18[%c0_139, %c0_140] : memref<24x32xf32, #tpu.memory_space<vmem>>, vector<4x32xf32>
    tpu.vector_store %arg18[%c0_139, %c0_140], %205 {strides = array<i32>} : memref<24x32xf32, #tpu.memory_space<vmem>>, vector<4x32xf32>,
    %c0_141 = arith.constant 0 : index
    %c0_142 = arith.constant 0 : index
    %210 = vector.load %arg18[%c0_141, %c0_142] : memref<24x32xf32, #tpu.memory_space<vmem>>, vector<24x32xf32>
    %cst_143 = arith.constant dense<0.000000e+00> : vector<24x256xf32>
    %211 = tpu.matmul %170, %2, %cst_143 {dimension_numbers = #tpu.dot_dimension_numbers<[1], [0], [0], [1], [0, 0, 1, 1], [], []>} : vector<24x32xf32>, vector<32x256xf32>, vector<24x256xf32> -> vector<24x256xf32>
    %cst_144 = arith.constant dense<0.000000e+00> : vector<24x256xf32>
    %212 = tpu.matmul %210, %3, %cst_144 {dimension_numbers = #tpu.dot_dimension_numbers<[1], [0], [0], [1], [0, 0, 1, 1], [], []>} : vector<24x32xf32>, vector<32x256xf32>, vector<24x256xf32> -> vector<24x256xf32>
    %213 = arith.addf %211, %212 : vector<24x256xf32>
    %214 = vector.broadcast %7 : vector<1x256xf32> to vector<24x256xf32>
    %215 = arith.addf %213, %214 : vector<24x256xf32>
    %cst_145 = arith.constant 0.000000e+00 : f32
    %216 = vector.broadcast %cst_145 : f32 to vector<24x256xf32>
    %217 = arith.maximumf %215, %216 : vector<24x256xf32>
    %cst_146 = arith.constant dense<0.000000e+00> : vector<24x32xf32>
    %218 = tpu.matmul %217, %4, %cst_146 {dimension_numbers = #tpu.dot_dimension_numbers<[1], [0], [0], [1], [0, 0, 1, 1], [], []>} : vector<24x256xf32>, vector<256x32xf32>, vector<24x32xf32> -> vector<24x32xf32>
    %219 = arith.addf %170, %218 : vector<24x32xf32>
    %220 = vector.broadcast %10 : vector<1x32xf32> to vector<24x32xf32>
    %221 = arith.addf %219, %220 : vector<24x32xf32>
    %c0_147 = arith.constant 0 : index
    %c0_148 = arith.constant 0 : index
    %222 = vector.load %arg19[%c0_147, %c0_148] : memref<24x32xf32, #tpu.memory_space<vmem>>, vector<24x32xf32>
    tpu.vector_store %arg19[%c0_147, %c0_148], %221 {strides = array<i32>} : memref<24x32xf32, #tpu.memory_space<vmem>>, vector<24x32xf32>,
    %c0_149 = arith.constant 0 : index
    %c0_150 = arith.constant 0 : index
    %223 = vector.load %arg19[%c0_149, %c0_150] : memref<24x32xf32, #tpu.memory_space<vmem>>, vector<4x32xf32>
    %c0_151 = arith.constant 0 : index
    %c0_152 = arith.constant 0 : index
    %224 = vector.load %arg14[%c0_151, %c0_152] : memref<24x32xf32, #tpu.memory_space<vmem>>, vector<4x32xf32>
    tpu.vector_store %arg14[%c0_151, %c0_152], %223 {strides = array<i32>} : memref<24x32xf32, #tpu.memory_space<vmem>>, vector<4x32xf32>,
    return
  }
  func.func @transform_0(%arg0: i32) -> (i32, i32) {
    %c0_i32 = arith.constant 0 : i32
    %c0_i32_0 = arith.constant 0 : i32
    return %arg0, %c0_i32 : i32, i32
  }
  func.func @transform_1(%arg0: i32) -> (i32, i32, i32, i32) {
    %c0_i32 = arith.constant 0 : i32
    %c0_i32_0 = arith.constant 0 : i32
    %c0_i32_1 = arith.constant 0 : i32
    %c0_i32_2 = arith.constant 0 : i32
    return %arg0, %c0_i32, %c0_i32_0, %c0_i32_1 : i32, i32, i32, i32
  }
  func.func @transform_2(%arg0: i32) -> (i32, i32, i32, i32) {
    %c0_i32 = arith.constant 0 : i32
    %c0_i32_0 = arith.constant 0 : i32
    %c0_i32_1 = arith.constant 0 : i32
    %c0_i32_2 = arith.constant 0 : i32
    return %arg0, %c0_i32, %c0_i32_0, %c0_i32_1 : i32, i32, i32, i32
  }
  func.func @transform_3(%arg0: i32) -> (i32, i32, i32, i32) {
    %c0_i32 = arith.constant 0 : i32
    %c0_i32_0 = arith.constant 0 : i32
    %c0_i32_1 = arith.constant 0 : i32
    %c0_i32_2 = arith.constant 0 : i32
    return %arg0, %c0_i32, %c0_i32_0, %c0_i32_1 : i32, i32, i32, i32
  }
  func.func @transform_4(%arg0: i32) -> (i32, i32) {
    %c0_i32 = arith.constant 0 : i32
    %c0_i32_0 = arith.constant 0 : i32
    %c0_i32_1 = arith.constant 0 : i32
    return %c0_i32, %c0_i32_0 : i32, i32
  }
  func.func @transform_5(%arg0: i32) -> (i32, i32) {
    %c0_i32 = arith.constant 0 : i32
    %c0_i32_0 = arith.constant 0 : i32
    %c0_i32_1 = arith.constant 0 : i32
    return %c0_i32, %c0_i32_0 : i32, i32
  }
  func.func @transform_6(%arg0: i32) -> (i32, i32) {
    %c0_i32 = arith.constant 0 : i32
    %c0_i32_0 = arith.constant 0 : i32
    %c0_i32_1 = arith.constant 0 : i32
    return %c0_i32, %c0_i32_0 : i32, i32
  }
  func.func @transform_7(%arg0: i32) -> (i32, i32) {
    %c0_i32 = arith.constant 0 : i32
    %c0_i32_0 = arith.constant 0 : i32
    %c0_i32_1 = arith.constant 0 : i32
    return %c0_i32, %c0_i32_0 : i32, i32
  }
  func.func @transform_8(%arg0: i32) -> (i32, i32) {
    %c0_i32 = arith.constant 0 : i32
    %c0_i32_0 = arith.constant 0 : i32
    %c0_i32_1 = arith.constant 0 : i32
    return %c0_i32, %c0_i32_0 : i32, i32
  }
  func.func @transform_9(%arg0: i32) -> (i32, i32) {
    %c0_i32 = arith.constant 0 : i32
    %c0_i32_0 = arith.constant 0 : i32
    %c0_i32_1 = arith.constant 0 : i32
    return %c0_i32, %c0_i32_0 : i32, i32
  }
  func.func @transform_10(%arg0: i32) -> (i32, i32) {
    %c0_i32 = arith.constant 0 : i32
    %c0_i32_0 = arith.constant 0 : i32
    %c0_i32_1 = arith.constant 0 : i32
    return %c0_i32, %c0_i32_0 : i32, i32
  }
  func.func @transform_11(%arg0: i32) -> (i32, i32) {
    %c0_i32 = arith.constant 0 : i32
    %c0_i32_0 = arith.constant 0 : i32
    %c0_i32_1 = arith.constant 0 : i32
    return %c0_i32, %c0_i32_0 : i32, i32
  }
  func.func @transform_12(%arg0: i32) -> (i32, i32) {
    %c0_i32 = arith.constant 0 : i32
    %c0_i32_0 = arith.constant 0 : i32
    %c0_i32_1 = arith.constant 0 : i32
    return %c0_i32, %c0_i32_0 : i32, i32
  }
  func.func @transform_13(%arg0: i32) -> (i32, i32) {
    %c0_i32 = arith.constant 0 : i32
    %c0_i32_0 = arith.constant 0 : i32
    return %arg0, %c0_i32 : i32, i32
  }
  func.func @transform_14(%arg0: i32) -> (i32, i32, i32) {
    %c0_i32 = arith.constant 0 : i32
    %c0_i32_0 = arith.constant 0 : i32
    %c0_i32_1 = arith.constant 0 : i32
    return %arg0, %c0_i32, %c0_i32_0 : i32, i32, i32
  }
}

</mosaic_0001>

<bundles_post_ra>
// kernel: mgnn_block_forward.1
= control target key start
LH: loop header
LB: loop body
LE: loop exit
PB: predicated region body
PF: predicated region fallthrough
CT: control target
= control target key end

     0   :  { %s5638_s29 = smov 0   ;;  %s7258_s0 = inlined_call_operand.vmem [shape: f32[48,32], index: 0, kind: input, shape index: {}]   ;;  %s7259_s1 = inlined_call_operand.vmem [shape: f32[2,4,4,1], index: 1, kind: input, shape index: {}]   ;;  %s7260_s2 = inlined_call_operand.vmem [shape: f32[2,6,5,1], index: 2, kind: input, shape index: {}]   ;;  %s7261_s3 = inlined_call_operand.vmem [shape: f32[2,4,6,1], index: 3, kind: input, shape index: {}]   ;;  %s7262_s4 = inlined_call_operand.vmem [shape: f32[32,96], index: 4, kind: input, shape index: {}]   ;;  %s7263_s5 = inlined_call_operand.vmem [shape: f32[32,544], index: 5, kind: input, shape index: {}]   ;;  %s7264_s6 = inlined_call_operand.vmem [shape: f32[32,256], index: 6, kind: input, shape index: {}]   ;;  %s7265_s7 = inlined_call_operand.vmem [shape: f32[32,256], index: 7, kind: input, shape index: {}]   ;;  %s7266_s8 = inlined_call_operand.vmem [shape: f32[256,32], index: 8, kind: input, shape index: {}]   ;;  %s7267_s9 = inlined_call_operand.vmem [shape: f32[1,96], index: 9, kind: input, shape index: {}]   ;;  %s7268_s10 = inlined_call_operand.vmem [shape: f32[1,544], index: 10, kind: input, shape index: {}]   ;;  %s7269_s11 = inlined_call_operand.vmem [shape: f32[3,256], index: 11, kind: input, shape index: {}]   ;;  %s7270_s12 = inlined_call_operand.vmem [shape: f32[1,32], index: 12, kind: input, shape index: {}]   ;;  %s7271_s13 = inlined_call_operand.vmem [shape: f32[48,32], index: 13, kind: output, shape index: {0}]   ;;  %s7272_s14 = inlined_call_operand.vmem [shape: f32[2,4,6], index: 14, kind: output, shape index: {1}]  }
   0x1 LB: > { %s5644_s30 = sadd.s32 4294967295, %s5554_s29   ;;  %p4871_p0 = scmp.ge.s32.totalorder %s5554_s29, 1  ;;  %s5554_s29 = sphi %s5638_s29, %s25_s29  }
   0x2   : > { %p446_p1 = scmp.lt.s32.totalorder %s5554_s29, 3 }
   0x4   : > { %p447_p2 = pnand %p4871_p0, %p446_p1 }
   0x6   : > { %450 = sbr.rel (%p447_p2) target bundleno = 5551 (0x15af), region = 72 }
   0xd   : > { %v542_v0 = vld [vmem:[%s7262_s4] sm:$0xff]  ;;  %v543_v1 = vld [vmem:[%s7262_s4 + $0x8] sm:$0xff]  ;;  %v544_v2 = vld [vmem:[%s7262_s4 + $0x10] sm:$0xff]  ;;  %v7273_v3 = vmov 0.0|0.0   ;;  %vm5557_vm0 = vmmov 0   ;;  %v7275_v6 = vmov 0.0  }
   0xe   : > { %5221 = vmatprep.subr.bf16.mxu0 %v7273_v3  ;;  %v5222_v4 = vpack.c.bf16 %v543_v1, %v542_v0  ;;  %v545_v5 = vld [vmem:[%s7262_s4 + $0x18] sm:$0xff]  ;;  %5123 = vmatprep.mubr.msk.f32.mxu0 %vm5557_vm0, %v7275_v6  ;;  %s511_s23 = smul.u32 3, %s5644_s30  ;;  %vm622_vm1 = vcmask 261120   ;;  %v4882_v10 = vld [vmem:[%s7267_s9] ss:$0 sm:$0xff]  ;;  %vm724_vm2 = vcmask 785408  }
   0xf   : > { %623 = vst.msk [vmem:[#allocation4] sm:$0xff] %vm622_vm1, %v7275_v6  ;;  %624 = vst.msk [vmem:[#allocation4 + $0x8] sm:$0xff] %vm622_vm1, %v7275_v6  ;;  %5132 = vmatprep.subr.mxu1 %v7275_v6  ;;  %5134 = vmatprep.mubr.msk.f32.mxu1 %vm5557_vm0, %v7275_v6  ;;  %v5225_v7 = vpack.c.bf16 %v545_v5, %v544_v2  ;;  %s5559_s16 = smov 64   ;;  %s5560_s17 = smov 96   ;;  %vm824_vm3 = vcmask 1043456   ;;  %vm806_vm4 = vcmask 27648  }
  0x10   : > { %625 = vst.msk [vmem:[#allocation4 + $0x10] sm:$0xff] %vm622_vm1, %v7275_v6  ;;  %5223 = vmatpush3.bf16.msra.mxu0 %v5222_v4  ;;  %p512_p3 = scmp.lt.s32.totalorder %s511_s23, 5  ;;  %vm820_vm5 = vcmask 31744   ;;  %vm1315_vm6 = vcmask 36864   ;;  %vm897_vm7 = vcmask 257024   ;;  %vm977_vm8 = vcmask 46080  }
  0x11   : > { %5224 = vmatprep.subr.bf16.mxu0 %v7273_v3  ;;  %vm995_vm9 = vcmask 1045504   ;;  %vm7366_vm10 = vcmask 48128   ;;  %vm1333_vm11 = vcmask 1044480   ;;  %vm1329_vm12 = vcmask 39936   ;;  %p517_p4 = scmp.lt.s32.totalorder %s5644_s30, 1 }
  0x12   : > { %s7564_s23 = smov (!%p512_p3, %s511_s23), 5  ;;  %vm1068_vm13 = vcmask 259072   ;;  %vm1406_vm14 = vcmask 258048   ;;  %vm7367_vm15 = vcmask 1041408  }
  0x13   : > { %s4872_s24 = sshll.u32 %s7564_s23, 3  ;;  %s7566_s30 = smov (!%p517_p4, %s5644_s30), 1 }
  0x14   : > { %5226 = vmatpush3.bf16.msra.mxu0 %v5225_v7  ;;  %s515_s27 = scalar_lea.vmem %s7258_s0, %s4872_s24  ;;  %s5433_s26 = smul.u32 48, %s7566_s30 }
  0x15   : > { %5152 = vmatprep.subr.mxu0 %v7275_v6  ;;  %v5683_v8 = vld [vmem:[%s515_s27] sm:$0xff]  ;;  %v5689_v9 = vld [vmem:[%s515_s27 + $0x8] sm:$0xff]  ;;  %v5698_v14 = vld [vmem:[%s515_s27 + $0x10] sm:$0xff]  ;;  %s6127_s20 = scalar_lea.vmem %s7271_s13, %s4872_s24 }
  0x16   : > { %s526_s15 = scalar_lea.vmem %s7260_s2, %s5433_s26  ;;  %s4879_s26 = sshll.u32 %s7566_s30, 2 }
  0x17   : > { %5124 = vmatmul.mubr.msk.f32.vlgmr.msra.gmra.mrb[0].mxu0 %vm622_vm1, %v5683_v8  ;;  %s541_s27 = scalar_lea.vmem %s7272_s14, %s4879_s26 }
  0x18   : > { %5126 = vmatprep.mubr.msk.f32.mxu0 %vm5557_vm0, %v7275_v6 }
  0x1b   : > { %5127 = vmatmul.mubr.msk.f32.gmra.mrb[2].mxu0 %vm622_vm1, %v5689_v9 }
  0x1c   : > { %5129 = vmatprep.mubr.msk.f32.mxu0 %vm5557_vm0, %v7275_v6 }
  0x1f   : > { %5130 = vmatmul.mubr.msk.f32.gmra.mrb[4].mxu0 %vm622_vm1, %v5698_v14 }
  0x20   : > { %5154 = vmatprep.mubr.msk.f32.mxu0 %vm5557_vm0, %v7275_v6 }
  0xea   : > { %v710_v11 = vpop.f32.mrb[0].mxu0 }
  0xeb   : > { %v711_v12 = vadd.f32 %v4882_v10, %v710_v11  ;;  %v5125_v13 = vpop.f32.mrb[1].mxu0 }
  0xed   : > { %725 = vst.msk [vmem:[#allocation2] sm:$0xff] %vm724_vm2, %v711_v12 }
  0xee   : > { %v715_v15 = vpop.f32.mrb[2].mxu0 }
  0xef   : > { %v716_v16 = vadd.f32 %v4882_v10, %v715_v15  ;;  %v5128_v17 = vpop.f32.mrb[3].mxu0 }
  0xf1   : > { %726 = vst.msk [vmem:[#allocation2 + $0x8] sm:$0xff] %vm724_vm2, %v716_v16 }
  0xf2   : > { %v720_v25 = vpop.f32.mrb[4].mxu0 }
  0xf3   : > { %v721_v26 = vadd.f32 %v4882_v10, %v720_v25  ;;  %v5131_v27 = vpop.f32.mrb[5].mxu0  ;;  %v574_v25 = vld [vmem:[%s7265_s7] sm:$0xff] }
  0xf4   : > { %v728_v18 = vld [vmem:[#allocation2] sm:$0xf] }
  0xf5   : > { %818 = vrot.lane.b32.xlu1 %v728_v18, %s5559_s16  ;;  %730 = vrot.lane.b32.xlu0 %v728_v18, %s5560_s17  ;;  %727 = vst.msk [vmem:[#allocation2 + $0x10] sm:$0xff] %vm724_vm2, %v721_v26  ;;  %v576_v26 = vld [vmem:[%s7265_s7 + $0x10] sm:$0xff]  ;;  %vm2752_vm2 = vcmask 1047558  }
  0xf8   : > { %v5708_v19 = vld [vmem:[#allocation2 + $0x4] sm:$0x3f]  ;;  %v5712_v20 = vld [vmem:[#allocation2 + $0xa] sm:$0xf] }
  0xf9   : > { %901 = vrot.lane.b32.xlu1 %v5708_v19, %s5560_s17 }
  0xfc   : > { %v1237_v39 = vld [vmem:[#allocation2 + $0xe] sm:$0x1f] }
  0xfd   : > { %1072 = vrot.lane.b32.xlu1 %v5712_v20, %s5560_s17 }
 0x167   : > { %v819_v21 = vpop.permute.xlu1 %818  ;;  %v731_v22 = vpop.permute.xlu0 %730 }
 0x168   : > { %5133 = vmatpush3.xpose.msk.msra.mxu1 %vm622_vm1, %v731_v22  ;;  %v567_v22 = vld [vmem:[%s7264_s6 + $0x8] sm:$0xff] }
 0x169   : > { %5137 = vmatprep.subr.mxu1 %v7275_v6 }
 0x16b   : > { %5135 = vmatmul.mubr.msk.f32.vlgmr.msra.gmra.mrb[0].mxu1 %vm622_vm1, %v728_v18  ;;  %v902_v23 = vpop.permute.xlu1 %901 }
 0x16c   : > { %5138 = vmatpush3.msk.msra.mxu1 %vm824_vm3, %v819_v21  ;;  %5139 = vmatprep.mubr.msk.f32.mxu1 %vm5557_vm0, %v7275_v6  ;;  %v577_v21 = vld [vmem:[%s7265_s7 + $0x18] sm:$0xff] }
 0x16d   : > { %5142 = vmatprep.subr.mxu1 %v7275_v6 }
 0x16f   : > { %v1073_v24 = vpop.permute.xlu1 %1072 }
 0x170   : > { %5153 = vmatpush3.xpose.msk.msra.mxu0 %vm622_vm1, %v1073_v24  ;;  %v569_v24 = vld [vmem:[%s7264_s6 + $0x18] sm:$0xff] }
 0x171   : > { %5162 = vmatprep.subr.mxu0 %v7275_v6  ;;  %v5790_v27 = vpack.c.bf16 %v569_v24, %v567_v22  ;;  %v608_v24 = vld [vmem:[%s7266_s8 + $0xd0] sm:$0xff] }
 0x173   : > { %5155 = vmatmul.mubr.msk.f32.vlgmr.msra.gmra.mrb[6].mxu0 %vm622_vm1, %v5712_v20  ;;  %7380 = vst [vmem:[#allocation7_spill] sm:$0xff] %v5790_v27 }
 0x174   : > { %5164 = vmatprep.mubr.msk.f32.mxu0 %vm5557_vm0, %v7275_v6 }
 0x23e   : > { %v802_v28 = vpop.f32.mrb[0].mxu1 }
 0x23f   : > { %v5136_v29 = vpop.f32.mrb[1].mxu1  ;;  %v807_v30 = vsel %vm806_vm4, %v802_v28, -inf }
 0x240   : > { %808 = vmax.xlane.f32.xlu0 %v807_v30  ;;  %v566_v29 = vld [vmem:[%s7264_s6] sm:$0xff]  ;;  %v568_v30 = vld [vmem:[%s7264_s6 + $0x10] sm:$0xff] }
 0x246   : > { %v1144_v31 = vpop.f32.mrb[6].mxu0 }
 0x247   : > { %v1148_v32 = vsel %vm806_vm4, %v1144_v31, -inf  ;;  %v5156_v33 = vpop.f32.mrb[7].mxu0 }
 0x248   : > { %1149 = vmax.xlane.f32.xlu0 %v1148_v32  ;;  %v579_v32 = vld [vmem:[%s7265_s7 + $0x28] sm:$0xff]  ;;  %v581_v33 = vld [vmem:[%s7265_s7 + $0x38] sm:$0xff] }
 0x2cd   : > { %v809_v34 = vpop.xlane.xlu0 %808 }
 0x2ce   : > { %v810_v35 = vsub.f32 %v802_v28, %v809_v34  ;;  %v5792_v28 = vpack.c.bf16 %v576_v26, %v574_v25  ;;  %v571_v34 = vld [vmem:[%s7264_s6 + $0x28] sm:$0xff]  ;;  %v609_v25 = vld [vmem:[%s7266_s8 + $0xd8] sm:$0xff] }
 0x2d0   : > { %v811_v36 = vmul.f32 1.442695, %v810_v35  ;;  %7381 = vst [vmem:[#allocation8_spill] sm:$0xff] %v5792_v28  ;;  %v5815_v35 = vpack.c.bf16 %v581_v33, %v579_v32  ;;  %v593_v32 = vld [vmem:[%s7266_s8 + $0x58] sm:$0xff] }
 0x2d2   : > { %5455 = vpow2.f32 %v811_v36  ;;  %7383 = vst [vmem:[#allocation10_spill] sm:$0xff] %v5815_v35  ;;  %v573_v36 = vld [vmem:[%s7264_s6 + $0x38] sm:$0xff] }
 0x2d5   : > { %v1150_v44 = vpop.xlane.xlu0 %1149 }
 0x2d6   : > { %v1151_v45 = vsub.f32 %v1144_v31, %v1150_v44  ;;  %v5801_v31 = vpack.c.bf16 %v568_v30, %v566_v29  ;;  %v598_v44 = vld [vmem:[%s7266_s8 + $0x80] sm:$0xff]  ;;  %v5953_v29 = vpack.c.bf16 %v609_v25, %v608_v24  ;;  %v592_v30 = vld [vmem:[%s7266_s8 + $0x50] sm:$0xff] }
 0x2d7   : > { %v5962_v33 = vpack.c.bf16 %v593_v32, %v592_v30 }
 0x2d8   : > { %v1152_v46 = vmul.f32 1.442695, %v1151_v45  ;;  %7382 = vst [vmem:[#allocation9_spill] sm:$0xff] %v5801_v31  ;;  %v599_v45 = vld [vmem:[%s7266_s8 + $0x88] sm:$0xff]  ;;  %7397 = vst [vmem:[#allocation24_spill] sm:$0xff] %v5953_v29 }
 0x2d9   : > { %7398 = vst [vmem:[#allocation25_spill] sm:$0xff] %v5962_v33 }
 0x2dc   : > { %v5456_v37 = vpop.eup %5455 }
 0x2dd   : > { %v813_v38 = vsel %vm806_vm4, %v5456_v37, 0.0 }
 0x2de   : > { %814 = vadd.xlane.f32.xlu1 %v813_v38  ;;  %v580_v38 = vld [vmem:[%s7265_s7 + $0x30] sm:$0xff] }
 0x2ef   : > { %1239 = vrot.lane.b32.xlu1 %v1237_v39, %s5560_s17  ;;  %s4948_s17 = sshll.u32 %s7566_s30, 5 }
 0x2f0   : > { %s531_s21 = scalar_lea.vmem %s7261_s3, %s4948_s17 }
 0x36b   : > { %v815_v40 = vpop.xlane.xlu1 %814 }
 0x36c   : > { %5457 = vrcp.f32 %v815_v40 }
 0x36d   : > { %5459 = vpow2.f32 %v1152_v46  ;;  %v5857_v46 = vpack.c.bf16 %v599_v45, %v598_v44 }
 0x36f   : > { %v1240_v41 = vpop.permute.xlu1 %1239  ;;  %7387 = vst [vmem:[#allocation14_spill] sm:$0xff] %v5857_v46 }
 0x370   : > { %5163 = vmatpush3.xpose.msk.msra.mxu0 %vm622_vm1, %v1240_v41  ;;  %v570_v41 = vld [vmem:[%s7264_s6 + $0x20] sm:$0xff] }
 0x371   : > { %5236 = vmatprep.subr.bf16.mxu0 %v5790_v27 }
 0x373   : > { %5165 = vmatmul.mubr.msk.f32.vlgmr.msra.gmra.mrb[8].mxu0 %vm622_vm1, %v1237_v39 }
 0x374   : > { %1567 = vmatprep.mubr.f32.mxu0 %v7275_v6  ;;  %5238 = vmatpush1.bf16.msra.mxu0 %v5801_v31 }
 0x376   : > { %v5458_v42 = vpop.eup %5457 }
 0x377   : > { %v817_v43 = vmul.f32 %v5458_v42, %v5456_v37  ;;  %v5460_v50 = vpop.eup %5459  ;;  %v578_v37 = vld [vmem:[%s7265_s7 + $0x20] sm:$0xff]  ;;  %v572_v42 = vld [vmem:[%s7264_s6 + $0x30] sm:$0xff] }
 0x378   : > { %v1154_v51 = vsel %vm806_vm4, %v5460_v50, 0.0  ;;  %v5828_v40 = vpack.c.bf16 %v580_v38, %v578_v37  ;;  %v594_v38 = vld [vmem:[%s7266_s8 + $0x60] sm:$0xff] }
 0x379   : > { %5140 = vmatmul.mubr.msk.f32.vlgmr.msra.gmra.mrb[2].mxu1 %vm820_vm5, %v817_v43  ;;  %v5837_v43 = vpack.c.bf16 %v572_v42, %v570_v41  ;;  %v595_v41 = vld [vmem:[%s7266_s8 + $0x68] sm:$0xff] }
 0x37a   : > { %5143 = vmatpush3.xpose.msk.msra.mxu1 %vm622_vm1, %v902_v23  ;;  %5144 = vmatprep.mubr.msk.f32.mxu1 %vm5557_vm0, %v7275_v6  ;;  %7385 = vst [vmem:[#allocation12_spill] sm:$0xff] %v5828_v40  ;;  %v5980_v42 = vpack.c.bf16 %v595_v41, %v594_v38 }
 0x37b   : > { %5147 = vmatprep.subr.mxu1 %v7275_v6  ;;  %7386 = vst [vmem:[#allocation13_spill] sm:$0xff] %v5837_v43 }
 0x37c   : > { %7400 = vst [vmem:[#allocation27_spill] sm:$0xff] %v5980_v42 }
 0x37d   : > { %5145 = vmatmul.mubr.msk.f32.vlgmr.msra.gmra.mrb[4].mxu1 %vm622_vm1, %v5708_v19 }
 0x37e   : > { %5149 = vmatprep.mubr.msk.f32.mxu1 %vm5557_vm0, %v7275_v6 }
 0x446   : > { %v1311_v47 = vpop.f32.mrb[8].mxu0 }
 0x447   : > { %v5166_v48 = vpop.f32.mrb[9].mxu0  ;;  %v1316_v49 = vsel %vm1315_vm6, %v1311_v47, -inf }
 0x448   : > { %1317 = vmax.xlane.f32.xlu0 %v1316_v49  ;;  %v582_v49 = vld [vmem:[%s7266_s8] sm:$0xff] }
 0x44c   : > { %v893_v52 = vpop.f32.mrb[2].mxu1  ;;  %1155 = vadd.xlane.f32.xlu0 %v1154_v51 }
 0x44d   : > { %898 = vst.msk [vmem:[#allocation4] sm:$0xf] %vm897_vm7, %v893_v52  ;;  %v5141_v53 = vpop.f32.mrb[3].mxu1  ;;  %v600_v52 = vld [vmem:[%s7266_s8 + $0x90] sm:$0xff] }
 0x44e   : > { %v601_v53 = vld [vmem:[%s7266_s8 + $0x98] sm:$0xff] }
 0x450   : > { %v973_v54 = vpop.f32.mrb[4].mxu1 }
 0x451   : > { %v5146_v55 = vpop.f32.mrb[5].mxu1  ;;  %v978_v56 = vsel %vm977_vm8, %v973_v54, -inf }
 0x452   : > { %979 = vmax.xlane.f32.xlu1 %v978_v56  ;;  %v5876_v56 = vpack.c.bf16 %v601_v53, %v600_v52 }
 0x454   : > { %7389 = vst [vmem:[#allocation16_spill] sm:$0xff] %v5876_v56 }
 0x463   : > { %1159 = vrot.lane.b32.xlu1 %v5712_v20, %s5559_s16  ;;  %v575_v20 = vld [vmem:[%s7265_s7 + $0x8] sm:$0xff] }
 0x464   : > { %v5779_v23 = vpack.c.bf16 %v577_v21, %v575_v20  ;;  %v590_v20 = vld [vmem:[%s7266_s8 + $0x40] sm:$0xff]  ;;  %v591_v21 = vld [vmem:[%s7266_s8 + $0x48] sm:$0xff] }
 0x465   : > { %v5950_v26 = vpack.c.bf16 %v591_v21, %v590_v20 }
 0x466   : > { %7379 = vst [vmem:[#allocation6_spill] sm:$0xff] %v5779_v23 }
 0x467   : > { %7396 = vst [vmem:[#allocation23_spill] sm:$0xff] %v5950_v26 }
 0x4d5   : > { %v1318_v57 = vpop.xlane.xlu0 %1317 }
 0x4d6   : > { %v1319_v58 = vsub.f32 %v1311_v47, %v1318_v57  ;;  %v584_v57 = vld [vmem:[%s7266_s8 + $0x10] sm:$0xff] }
 0x4d8   : > { %v1320_v59 = vmul.f32 1.442695, %v1319_v58  ;;  %v585_v58 = vld [vmem:[%s7266_s8 + $0x18] sm:$0xff] }
 0x4d9   : > { %v1156_v4 = vpop.xlane.xlu0 %1155 }
 0x4da   : > { %5461 = vpow2.f32 %v1320_v59 }
 0x4df   : > { %v980_v60 = vpop.xlane.xlu1 %979 }
 0x4e0   : > { %v981_v61 = vsub.f32 %v973_v54, %v980_v60 }
 0x4e2   : > { %v982_v62 = vmul.f32 1.442695, %v981_v61  ;;  %v602_v61 = vld [vmem:[%s7266_s8 + $0xa0] sm:$0xff] }
 0x4e3   : > { %v1160_v15 = vpop.permute.xlu1 %1159 }
 0x4e4   : > { %v5462_v63 = vpop.eup %5461  ;;  %5463 = vpow2.f32 %v982_v62  ;;  %v603_v62 = vld [vmem:[%s7266_s8 + $0xa8] sm:$0xff] }
 0x4e5   : > { %v1322_v0 = vsel %vm1315_vm6, %v5462_v63, 0.0  ;;  %vm2758_vm6 = vcmask 1042432  }
 0x4e6   : > { %1323 = vadd.xlane.f32.xlu0 %v1322_v0  ;;  %v5893_v0 = vpack.c.bf16 %v585_v58, %v584_v57 }
 0x4e8   : > { %7390 = vst [vmem:[#allocation17_spill] sm:$0xff] %v5893_v0 }
 0x4ee   : > { %v5464_v1 = vpop.eup %5463 }
 0x4ef   : > { %v984_v2 = vsel %vm977_vm8, %v5464_v1, 0.0  ;;  %vm2182_vm8 = vcmask 1045506  }
 0x4f0   : > { %985 = vadd.xlane.f32.xlu0 %v984_v2  ;;  %v586_v2 = vld [vmem:[%s7266_s8 + $0x20] sm:$0xff] }
 0x506   : > { %989 = vrot.lane.b32.xlu0 %v5708_v19, %s5559_s16 }
 0x50a   : > { %1327 = vrot.lane.b32.xlu0 %v1237_v39, %s5559_s16  ;;  %v5826_v39 = vpack.c.bf16 %v573_v36, %v571_v34  ;;  %v610_v34 = vld [vmem:[%s7266_s8 + $0xe0] sm:$0xff]  ;;  %v611_v36 = vld [vmem:[%s7266_s8 + $0xe8] sm:$0xff]  ;;  %s4947_s16 = sshll.u32 %s7566_s30, 4 }
 0x50b   : > { %v5972_v37 = vpack.c.bf16 %v611_v36, %v610_v34  ;;  %s521_s19 = scalar_lea.vmem %s7259_s1, %s4947_s16 }
 0x50c   : > { %7384 = vst [vmem:[#allocation11_spill] sm:$0xff] %v5826_v39  ;;  %5240 = vmatprep.subr.bf16.mxu0 %v5826_v39 }
 0x50d   : > { %5242 = vmatpush1.bf16.msra.mxu0 %v5837_v43  ;;  %7399 = vst [vmem:[#allocation26_spill] sm:$0xff] %v5972_v37 }
 0x510   : > { %4905 = vmatmul.mubr.msk.f32.vlgmr.msra.gmra.mrb[10].mxu0 %vm622_vm1, %v5683_v8 }
 0x511   : > { %1573 = vmatprep.mubr.f32.mxu0 %v7275_v6 }
 0x514   : > { %4906 = vmatmul.mubr.msk.f32.gmra.mrb[12].mxu0 %vm622_vm1, %v5689_v9 }
 0x515   : > { %1579 = vmatprep.mubr.f32.mxu0 %v7275_v6 }
 0x518   : > { %4907 = vmatmul.mubr.msk.f32.gmra.mrb[14].mxu0 %vm622_vm1, %v5698_v14 }
 0x519   : > { %1803 = vmatprep.mubr.f32.mxu0 %v7275_v6 }
 0x573   : > { %v1324_v5 = vpop.xlane.xlu0 %1323 }
 0x57d   : > { %v986_v7 = vpop.xlane.xlu0 %985 }
 0x57e   : > { %5465 = vrcp.f32 %v986_v7  ;;  %v605_v7 = vld [vmem:[%s7266_s8 + $0xb8] sm:$0xff] }
 0x57f   : > { %5467 = vrcp.f32 %v1156_v4  ;;  %v587_v4 = vld [vmem:[%s7266_s8 + $0x28] sm:$0xff] }
 0x580   : > { %5469 = vrcp.f32 %v1324_v5  ;;  %v604_v5 = vld [vmem:[%s7266_s8 + $0xb0] sm:$0xff] }
 0x581   : > { %v990_v10 = vpop.permute.xlu0 %989 }
 0x582   : > { %5148 = vmatpush3.msk.msra.mxu1 %vm995_vm9, %v990_v10  ;;  %v5911_v10 = vpack.c.bf16 %v587_v4, %v586_v2  ;;  %v616_v4 = vld [vmem:[%s7269_s11] ss:$4 sm:$0x3] }
 0x583   : > { %5157 = vmatprep.subr.mxu1 %v7275_v6 }
 0x584   : > { %7392 = vst [vmem:[#allocation19_spill] sm:$0xff] %v5911_v10 }
 0x585   : > { %v1328_v18 = vpop.permute.xlu0 %1327 }
 0x588   : > { %v5466_v11 = vpop.eup %5465 }
 0x589   : > { %v988_v12 = vmul.f32 %v5466_v11, %v5464_v1  ;;  %v5468_v13 = vpop.eup %5467  ;;  %v5896_v1 = vpack.c.bf16 %v603_v62, %v602_v61  ;;  %v5914_v11 = vpack.c.bf16 %v605_v7, %v604_v5  ;;  %v7277_v62 = vlaneseq }
 0x58a   : > { %v1158_v16 = vmul.f32 %v5468_v13, %v5460_v50  ;;  %v5470_v17 = vpop.eup %5469  ;;  %v583_v50 = vld [vmem:[%s7266_s8 + $0x8] sm:$0xff]  ;;  %v589_v13 = vld [vmem:[%s7266_s8 + $0x38] sm:$0xff] }
 0x58b   : > { %5150 = vmatmul.mubr.msk.f32.vlgmr.msra.gmra.mrb[6].mxu1 %vm7366_vm10, %v988_v12  ;;  %v1326_v19 = vmul.f32 %v5470_v17, %v5462_v63  ;;  %v5874_v55 = vpack.c.bf16 %v583_v50, %v582_v49  ;;  %7391 = vst [vmem:[#allocation18_spill] sm:$0xff] %v5896_v1  ;;  %7393 = vst [vmem:[#allocation20_spill] sm:$0xff] %v5914_v11  ;;  %v588_v12 = vld [vmem:[%s7266_s8 + $0x30] sm:$0xff]  ;;  %v607_v17 = vld [vmem:[%s7266_s8 + $0xc8] sm:$0xff]  ;;  %vm2887_vm10 = vcmask 1045509  }
 0x58c   : > { %5158 = vmatpush3.msk.msra.mxu1 %vm824_vm3, %v1160_v15  ;;  %5159 = vmatprep.mubr.msk.f32.mxu1 %vm5557_vm0, %v7275_v6  ;;  %v596_v50 = vld [vmem:[%s7266_s8 + $0x70] sm:$0xff] }
 0x58d   : > { %5167 = vmatprep.subr.mxu1 %v7275_v6  ;;  %7388 = vst [vmem:[#allocation15_spill] sm:$0xff] %v5874_v55 }
 0x58f   : > { %5160 = vmatmul.mubr.msk.f32.vlgmr.msra.gmra.mrb[8].mxu1 %vm820_vm5, %v1158_v16  ;;  %v606_v16 = vld [vmem:[%s7266_s8 + $0xc0] sm:$0xff] }
 0x590   : > { %5168 = vmatpush3.msk.msra.mxu1 %vm1333_vm11, %v1328_v18  ;;  %5169 = vmatprep.mubr.msk.f32.mxu1 %vm5557_vm0, %v7275_v6  ;;  %v5931_v18 = vpack.c.bf16 %v589_v13, %v588_v12 }
 0x591   : > { %5228 = vmatprep.subr.bf16.mxu1 %v5779_v23 }
 0x592   : > { %7394 = vst [vmem:[#allocation21_spill] sm:$0xff] %v5931_v18 }
 0x593   : > { %5170 = vmatmul.mubr.msk.f32.vlgmr.msra.gmra.mrb[10].mxu1 %vm1329_vm12, %v1326_v19  ;;  %v5934_v19 = vpack.c.bf16 %v607_v17, %v606_v16 }
 0x594   : > { %1484 = vmatprep.mubr.f32.mxu1 %v7275_v6  ;;  %5230 = vmatpush1.bf16.msra.mxu1 %v5792_v28 }
 0x595   : > { %5232 = vmatprep.subr.bf16.mxu1 %v5815_v35  ;;  %7395 = vst [vmem:[#allocation22_spill] sm:$0xff] %v5934_v19 }
 0x598   : > { %5234 = vmatpush1.bf16.msra.mxu1 %v5828_v40 }
 0x599   : > { %5244 = vmatprep.subr.bf16.mxu1 %v5857_v46 }
 0x5e3   : > { %v1569_v44 = vpop.f32.mrb[10].mxu0 }
 0x5e4   : > { %v1571_v45 = vpop.f32.mrb[11].mxu0 }
 0x5e7   : > { %v1575_v53 = vpop.f32.mrb[12].mxu0 }
 0x65e   : > { %v1064_v47 = vpop.f32.mrb[6].mxu1 }
 0x65f   : > { %1069 = vst.msk [vmem:[#allocation4 + $0x4] sm:$0x3f] %vm1068_vm13, %v1064_v47  ;;  %v5151_v48 = vpop.f32.mrb[7].mxu1  ;;  %v612_v47 = vld [vmem:[%s7266_s8 + $0xf0] sm:$0xff] }
 0x660   : > { %v613_v48 = vld [vmem:[%s7266_s8 + $0xf8] sm:$0xff] }
 0x661   : > { %v5990_v49 = vpack.c.bf16 %v613_v48, %v612_v47 }
 0x662   : > { %v1232_v51 = vpop.f32.mrb[8].mxu1 }
 0x663   : > { %1236 = vst.msk [vmem:[#allocation4 + $0xa] sm:$0xf] %vm897_vm7, %v1232_v51  ;;  %v5161_v54 = vpop.f32.mrb[9].mxu1  ;;  %7401 = vst [vmem:[#allocation28_spill] sm:$0xff] %v5990_v49  ;;  %v597_v51 = vld [vmem:[%s7266_s8 + $0x78] sm:$0xff] }
 0x664   : > { %v5998_v52 = vpack.c.bf16 %v597_v51, %v596_v50  ;;  %v1577_v54 = vpop.f32.mrb[13].mxu0 }
 0x665   : > { %v1581_v57 = vpop.f32.mrb[14].mxu0 }
 0x666   : > { %v1402_v59 = vpop.f32.mrb[10].mxu1  ;;  %v1408_v60 = vld [vmem:[#allocation4] sm:$0xff]  ;;  %7402 = vst [vmem:[#allocation29_spill] sm:$0xff] %v5998_v52  ;;  %v1583_v58 = vpop.f32.mrb[15].mxu0 }
 0x667   : > { %1407 = vst.msk [vmem:[#allocation4 + $0xe] sm:$0x1f] %vm1406_vm14, %v1402_v59  ;;  %v5171_v63 = vpop.f32.mrb[11].mxu1  ;;  %4902 = vmatmul.mubr.msk.f32.vlgmr.msra.gmra.mrb[12].mxu1 %vm622_vm1, %v1408_v60  ;;  %v547_v59 = vld [vmem:[%s7263_s5 + $0x8] sm:$0xff]  ;;  %v552_v60 = vld [vmem:[%s7263_s5 + $0x30] sm:$0xff]  ;;  %vm2225_vm14 = vcmask 1041409  }
 0x668   : > { %1490 = vmatprep.mubr.f32.mxu1 %v7275_v6  ;;  %5246 = vmatpush3.bf16.msra.mxu1 %v5874_v55  ;;  %v6009_v61 = vpack.c.bf16 %v552_v60, %v547_v59  ;;  %v6013_v63 = vshrl.u32 %v7277_v62, 7 }
 0x669   : > { %5248 = vmatprep.subr.bf16.mxu1 %v5876_v56 }
 0x66a   : > { %7403 = vst [vmem:[#allocation30_spill] sm:$0xff] %v6009_v61  ;;  %5276 = vmatprep.subr.bf16.mxu0 %v6009_v61  ;;  %v6016_v2 = vsub.s32 0, %v6013_v63  ;;  %v6022_v5 = vsub.s32 1, %v6013_v63 }
 0x66c   : > { %5250 = vmatpush3.bf16.msra.mxu1 %v5893_v0  ;;  %v6025_v7 = vrot.slane %v616_v4, %v6016_v2  ;;  %v6028_v13 = vrot.slane %v616_v4, %v6022_v5 }
 0x66d   : > { %5252 = vmatprep.subr.bf16.mxu1 %v5896_v1 }
 0x66e   : > { %v1409_v15 = vld [vmem:[#allocation4 + $0x8] sm:$0xff]  ;;  %v1410_v22 = vld [vmem:[#allocation4 + $0x10] sm:$0xff]  ;;  %7404 = vst [vmem:[#allocation31_spill] sm:$0xff] %v6025_v7  ;;  %7405 = vst [vmem:[#allocation32_spill] sm:$0xff] %v6028_v13 }
 0x66f   : > { %4903 = vmatmul.mubr.msk.f32.gmra.mrb[14].mxu1 %vm622_vm1, %v1409_v15 }
 0x670   : > { %1496 = vmatprep.mubr.f32.mxu1 %v7275_v6  ;;  %5254 = vmatpush3.bf16.msra.mxu1 %v5911_v10 }
 0x671   : > { %5256 = vmatprep.subr.bf16.mxu1 %v5914_v11 }
 0x673   : > { %4904 = vmatmul.mubr.msk.f32.gmra.mrb[16].mxu1 %vm622_vm1, %v1410_v22 }
 0x674   : > { %5258 = vmatpush3.bf16.msra.mxu1 %v5931_v18 }
 0x675   : > { %5260 = vmatprep.subr.bf16.mxu1 %v5934_v19 }
 0x678   : > { %5262 = vmatpush3.bf16.msra.mxu1 %v5950_v26 }
 0x679   : > { %5264 = vmatprep.subr.bf16.mxu1 %v5953_v29 }
 0x67c   : > { %5266 = vmatpush3.bf16.msra.mxu1 %v5962_v33 }
 0x67d   : > { %5268 = vmatprep.subr.bf16.mxu1 %v5972_v37 }
 0x680   : > { %5270 = vmatpush3.bf16.msra.mxu1 %v5980_v42 }
 0x681   : > { %5272 = vmatprep.subr.bf16.mxu1 %v5990_v49 }
 0x684   : > { %5274 = vmatpush3.bf16.msra.mxu1 %v5998_v52 }
 0x685   : > { %5291 = vmatprep.subr.bf16.mxu1 %v7273_v3 }
 0x73a   : > { %v1486_v12 = vpop.f32.mrb[12].mxu1 }
 0x73b   : > { %v1570_v15 = vadd.f32 %v1569_v44, %v1486_v12  ;;  %v1488_v16 = vpop.f32.mrb[13].mxu1  ;;  %v555_v12 = vld [vmem:[%s7263_s5 + $0x48] sm:$0xff] }
 0x73c   : > { %v1572_v17 = vadd.f32 %v1571_v45, %v1488_v16  ;;  %v557_v16 = vld [vmem:[%s7263_s5 + $0x58] sm:$0xff] }
 0x73d   : > { %v1597_v20 = vadd.f32 %v6025_v7, %v1570_v15 }
 0x73e   : > { %v1598_v21 = vadd.f32 %v6028_v13, %v1572_v17  ;;  %v562_v17 = vld [vmem:[%s7263_s5 + $0x80] sm:$0xff] }
 0x73f   : > { %v1603_v24 = vmax.f32 %v1597_v20, 0.0  ;;  %v6062_v20 = vpack.c.bf16 %v562_v17, %v557_v16  ;;  %v548_v16 = vld [vmem:[%s7263_s5 + $0x10] sm:$0xff]  ;;  %v553_v17 = vld [vmem:[%s7263_s5 + $0x38] sm:$0xff] }
 0x740   : > { %v1604_v22 = vmax.f32 %v1598_v21, 0.0  ;;  %v556_v21 = vld [vmem:[%s7263_s5 + $0x50] sm:$0xff] }
 0x741   : > { %7408 = vst [vmem:[#allocation35_spill] sm:$0xff] %v6062_v20 }
 0x742   : > { %v1492_v25 = vpop.f32.mrb[14].mxu1  ;;  %1673 = vmatprep.mubr.f32.mxu1 %v1604_v22  ;;  %v561_v22 = vld [vmem:[%s7263_s5 + $0x78] sm:$0xff] }
 0x743   : > { %v1576_v30 = vadd.f32 %v1575_v53, %v1492_v25  ;;  %v1494_v32 = vpop.f32.mrb[15].mxu1  ;;  %1674 = vmatmul.mubr.f32.vlgmr.msra.gmra.mrb[18].mxu1 %v1603_v24  ;;  %v560_v24 = vld [vmem:[%s7263_s5 + $0x70] sm:$0xff]  ;;  %v6074_v25 = vpack.c.bf16 %v561_v22, %v556_v21  ;;  %v4908_v21 = vld [vmem:[%s7270_s12] ss:$0 sm:$0xff]  ;;  %v559_v22 = vld [vmem:[%s7263_s5 + $0x68] sm:$0xff] }
 0x744   : > { %v1578_v34 = vadd.f32 %v1577_v54, %v1494_v32  ;;  %v546_v54 = vld [vmem:[%s7263_s5] sm:$0xff] }
 0x745   : > { %v1599_v36 = vadd.f32 %v6025_v7, %v1576_v30  ;;  %7409 = vst [vmem:[#allocation36_spill] sm:$0xff] %v6074_v25  ;;  %v565_v30 = vld [vmem:[%s7263_s5 + $0x98] sm:$0xff] }
 0x746   : > { %v1600_v38 = vadd.f32 %v6028_v13, %v1578_v34  ;;  %v1498_v41 = vpop.f32.mrb[16].mxu1  ;;  %v6080_v32 = vpack.c.bf16 %v565_v30, %v560_v24  ;;  %v549_v34 = vld [vmem:[%s7263_s5 + $0x18] sm:$0xff]  ;;  %v564_v24 = vld [vmem:[%s7263_s5 + $0x90] sm:$0xff] }
 0x747   : > { %v1582_v44 = vadd.f32 %v1581_v57, %v1498_v41  ;;  %v1500_v47 = vpop.f32.mrb[17].mxu1  ;;  %v1605_v50 = vmax.f32 %v1599_v36, 0.0  ;;  %v551_v57 = vld [vmem:[%s7263_s5 + $0x28] sm:$0xff]  ;;  %v554_v36 = vld [vmem:[%s7263_s5 + $0x40] sm:$0xff]  ;;  %v5561_v41 = vmov 0  }
 0x748   : > { %v1606_v45 = vmax.f32 %v1600_v38, 0.0  ;;  %v1584_v48 = vadd.f32 %v1583_v58, %v1500_v47  ;;  %v550_v58 = vld [vmem:[%s7263_s5 + $0x20] sm:$0xff]  ;;  %v6047_v4 = vpack.c.bf16 %v551_v57, %v546_v54  ;;  %7410 = vst [vmem:[#allocation37_spill] sm:$0xff] %v6080_v32  ;;  %v6091_v38 = vpack.c.bf16 %v554_v36, %v549_v34  ;;  %5450 = vset.pattern.permute.xlu1 %v5561_v41  ;;  %v2007_v54 = vld [vmem:[%s521_s19 + $0x8] sm:$0xf] }
 0x749   : > { %v1601_v51 = vadd.f32 %v6025_v7, %v1582_v44  ;;  %v6052_v15 = vpack.c.bf16 %v555_v12, %v550_v58  ;;  %5449 = vset.pattern.permute.xlu0 %v5561_v41  ;;  %v2461_v44 = vld [vmem:[%s526_s15 + $0x8] sm:$0x1f]  ;;  %v2460_v47 = vld [vmem:[%s526_s15] sm:$0x1f]  ;;  %v6129_v34 = vpack.c.bf16 %v553_v17, %v548_v16  ;;  %v6133_v41 = vpack.c.bf16 %v564_v24, %v559_v22 }
 0x74a   : > { %v1602_v59 = vadd.f32 %v6028_v13, %v1584_v48  ;;  %1678 = vmatprep.mubr.f32.mxu1 %v1606_v45  ;;  %7406 = vst [vmem:[#allocation33_spill] sm:$0xff] %v6047_v4  ;;  %5278 = vmatpush1.bf16.msra.mxu0 %v6047_v4  ;;  %7411 = vst [vmem:[#allocation38_spill] sm:$0xff] %v6091_v38  ;;  %v2463_v45 = vld [vmem:[%s526_s15 + $0x18] sm:$0x1f]  ;;  %v2462_v48 = vld [vmem:[%s526_s15 + $0x10] sm:$0x1f] }
 0x74b   : > { %1679 = vmatmul.mubr.f32.gmra.mrb[20].mxu1 %v1605_v50  ;;  %v1607_v60 = vmax.f32 %v1601_v51, 0.0  ;;  %7407 = vst [vmem:[#allocation34_spill] sm:$0xff] %v6052_v15  ;;  %5280 = vmatprep.subr.bf16.mxu0 %v6062_v20  ;;  %v2465_v50 = vld [vmem:[%s526_s15 + $0x28] sm:$0x1f]  ;;  %v2464_v51 = vld [vmem:[%s526_s15 + $0x20] sm:$0x1f] }
 0x74c   : > { %v1608_v53 = vmax.f32 %v1602_v59, 0.0  ;;  %5293 = vmatpush3.bf16.msra.mxu1 %v6052_v15  ;;  %2609 = vperm.xlu1 %5450, %v2461_v44   ;;  %v2006_v59 = vld [vmem:[%s521_s19 + $0x4] sm:$0xf]  ;;  %7412 = vst [vmem:[#allocation39_spill] sm:$0xff] %v6129_v34  ;;  %7414 = vst [vmem:[#allocation41_spill] sm:$0xff] %v6133_v41  ;;  %v6248_v7 = vsub.s32 3, %v6013_v63 }
 0x74d   : > { %5294 = vmatprep.subr.bf16.mxu1 %v7273_v3  ;;  %2604 = vperm.xlu0 %5449, %v2460_v47   ;;  %v558_v44 = vld [vmem:[%s7263_s5 + $0x60] sm:$0xff] }
 0x74e   : > { %1683 = vmatprep.mubr.f32.mxu1 %v1608_v53  ;;  %5282 = vmatpush1.bf16.msra.mxu0 %v6074_v25  ;;  %v2005_v53 = vld [vmem:[%s521_s19] sm:$0xf]  ;;  %7426 = vst [vmem:[#allocation53_spill] sm:$0xff] %v6248_v7 }
 0x74f   : > { %1684 = vmatmul.mubr.f32.gmra.mrb[22].mxu1 %v1607_v60  ;;  %5284 = vmatprep.subr.bf16.mxu0 %v6091_v38  ;;  %v2008_v60 = vld [vmem:[%s521_s19 + $0xc] sm:$0xf] }
 0x750   : > { %5180 = vmatprep.mubr.msk.f32.mxu1 %vm5557_vm0, %v7275_v6  ;;  %5296 = vmatpush3.bf16.msra.mxu1 %v6080_v32 }
 0x751   : > { %5194 = vmatprep.subr.mxu1 %v7275_v6  ;;  %2619 = vperm.xlu1 %5450, %v2463_v45  }
 0x752   : > { %2614 = vperm.xlu0 %5449, %v2462_v48  }
 0x755   : > { %2629 = vperm.xlu1 %5450, %v2465_v50  }
 0x756   : > { %2624 = vperm.xlu0 %5449, %v2464_v51  }
 0x759   : > { %2091 = vperm.xlu1 %5450, %v2006_v59  }
 0x75a   : > { %2086 = vperm.xlu0 %5449, %v2005_v53  }
 0x75d   : > { %2101 = vperm.xlu1 %5450, %v2008_v60  }
 0x75e   : > { %2096 = vperm.xlu0 %5449, %v2007_v54  }
 0x816   : > { %v5004_v57 = vpop.f32.mrb[18].mxu1 }
 0x817   : > { %v5005_v58 = vpop.f32.mrb[19].mxu1 }
 0x818   : > { %v5006_v12 = vadd.f32 %v5005_v58, %v5004_v57  ;;  %v2605_v58 = vpop.permute.xlu0 %2604 }
 0x81a   : > { %v1689_v30 = vadd.f32 %v5006_v12, %v5683_v8  ;;  %v563_v8 = vld [vmem:[%s7263_s5 + $0x88] sm:$0xff]  ;;  %v6194_v12 = vsub.s32 4, %v6013_v63 }
 0x81b   : > { %v6150_v48 = vpack.c.bf16 %v563_v8, %v558_v44  ;;  %v4880_v44 = vld [vmem:[%s7269_s11 + $0x1] ss:$4 sm:$0x3] }
 0x81c   : > { %v6131_v36 = vadd.f32 %v4908_v21, %v1689_v30  ;;  %7418 = vst [vmem:[#allocation45_spill] sm:$0xff] %v6194_v12  ;;  %v2615_v17 = vpop.permute.xlu0 %2614 }
 0x81d   : > { %7415 = vst [vmem:[#allocation42_spill] sm:$0xff] %v6150_v48 }
 0x81e   : > { %7413 = vst [vmem:[#allocation40_spill] sm:$0xff] %v6131_v36  ;;  %1701 = vst.msk [vmem:[%s6127_s20] sm:$0xff] %vm622_vm1, %v6131_v36  ;;  %v5007_v47 = vpop.f32.mrb[20].mxu1  ;;  %4909 = vmatmul.mubr.msk.f32.vlgmr.msra.gmra.mrb[16].mxu0 %vm622_vm1, %v6131_v36  ;;  %5181 = vmatmul.mubr.msk.f32.vlgmr.msra.gmra.mrb[24].mxu1 %vm622_vm1, %v6131_v36 }
 0x81f   : > { %v5008_v45 = vpop.f32.mrb[21].mxu1  ;;  %5286 = vmatpush1.bf16.msra.mxu0 %v6129_v34  ;;  %1809 = vmatprep.mubr.f32.mxu0 %v7275_v6 }
 0x820   : > { %v5009_v50 = vadd.f32 %v5008_v45, %v5007_v47  ;;  %5183 = vmatprep.mubr.msk.f32.mxu1 %vm5557_vm0, %v7275_v6  ;;  %5288 = vmatprep.subr.bf16.mxu0 %v6133_v41  ;;  %v2625_v47 = vpop.permute.xlu0 %2624 }
 0x822   : > { %v1690_v51 = vadd.f32 %v5009_v50, %v5689_v9  ;;  %v5010_v59 = vpop.f32.mrb[22].mxu1 }
 0x823   : > { %v5011_v53 = vpop.f32.mrb[23].mxu1  ;;  %5290 = vmatpush1.bf16.msra.mxu0 %v6150_v48  ;;  %v6223_v48 = vrot.slane %v4880_v44, %v6022_v5 }
 0x824   : > { %v6157_v60 = vadd.f32 %v4908_v21, %v1690_v51  ;;  %v5012_v54 = vadd.f32 %v5011_v53, %v5010_v59  ;;  %5189 = vmatprep.subr.mxu0 %v7275_v6  ;;  %v5562_v51 = vmov 1966171168   ;;  %v2087_v34 = vpop.permute.xlu0 %2086 }
 0x825   : > { %v2013_v59 = vunpack.c.l.s4 %v5562_v51  ;;  %7423 = vst [vmem:[#allocation50_spill] sm:$0xff] %v6223_v48  ;;  %v6278_v25 = vmul.f32 %v2625_v47, %v6223_v48 }
 0x826   : > { %7416 = vst [vmem:[#allocation43_spill] sm:$0xff] %v6157_v60  ;;  %1702 = vst.msk [vmem:[%s6127_s20 + $0x8] sm:$0xff] %vm622_vm1, %v6157_v60  ;;  %v1691_v57 = vadd.f32 %v5012_v54, %v5698_v14  ;;  %4910 = vmatmul.mubr.msk.f32.gmra.mrb[18].mxu0 %vm622_vm1, %v6157_v60  ;;  %5184 = vmatmul.mubr.msk.f32.gmra.mrb[26].mxu1 %vm622_vm1, %v6157_v60  ;;  %v2610_v14 = vpop.permute.xlu1 %2609 }
 0x827   : > { %1815 = vmatprep.mubr.f32.mxu0 %v7275_v6  ;;  %5186 = vmatprep.mubr.msk.f32.mxu1 %vm5557_vm0, %v7275_v6  ;;  %v2014_v41 = vunpack.c.0.s8 %v2013_v59 }
 0x828   : > { %v6171_v9 = vadd.f32 %v4908_v21, %v1691_v57  ;;  %v6199_v21 = vld [vmem:[%s7268_s10] sm:$0x1f]  ;;  %v2097_v4 = vpop.permute.xlu0 %2096 }
 0x829   : > { %v6203_v22 = vrot.slane %v6199_v21, %v6016_v2  ;;  %v6207_v24 = vrot.slane %v6199_v21, %v6194_v12  ;;  %v6211_v30 = vrot.slane %v6199_v21, %v6022_v5  ;;  %v6288_v20 = vrot.slane %v6199_v21, %v6248_v7 }
 0x82a   : > { %7417 = vst [vmem:[#allocation44_spill] sm:$0xff] %v6171_v9  ;;  %1703 = vst.msk [vmem:[%s6127_s20 + $0x10] sm:$0xff] %vm622_vm1, %v6171_v9  ;;  %4911 = vmatmul.mubr.msk.f32.gmra.mrb[20].mxu0 %vm622_vm1, %v6171_v9  ;;  %5187 = vmatmul.mubr.msk.f32.gmra.mrb[28].mxu1 %vm622_vm1, %v6171_v9  ;;  %v2620_v16 = vpop.permute.xlu1 %2619 }
 0x82b   : > { %1886 = vmatprep.mubr.f32.mxu0 %v7275_v6  ;;  %5196 = vmatprep.mubr.msk.f32.mxu1 %vm5557_vm0, %v7275_v6  ;;  %7419 = vst [vmem:[#allocation46_spill] sm:$0xff] %v6203_v22  ;;  %7420 = vst [vmem:[#allocation47_spill] sm:$0xff] %v6207_v24 }
 0x82c   : > { %7421 = vst [vmem:[#allocation48_spill] sm:$0xff] %v6211_v30  ;;  %7428 = vst [vmem:[#allocation55_spill] sm:$0xff] %v6288_v20 }
 0x82e   : > { %4912 = vmatmul.mubr.msk.f32.vlgmr.msra.gmra.mrb[22].mxu0 %vm622_vm1, %v6131_v36  ;;  %v2630_v8 = vpop.permute.xlu1 %2629 }
 0x82f   : > { %1892 = vmatprep.mubr.f32.mxu0 %v7275_v6 }
 0x832   : > { %4913 = vmatmul.mubr.msk.f32.gmra.mrb[24].mxu0 %vm622_vm1, %v6157_v60 }
 0x833   : > { %1898 = vmatprep.mubr.f32.mxu0 %v7275_v6 }
 0x836   : > { %4914 = vmatmul.mubr.msk.f32.gmra.mrb[26].mxu0 %vm622_vm1, %v6171_v9  ;;  %v6264_v9 = vmul.f32 %v2615_v17, %v6223_v48 }
 0x837   : > { %5191 = vmatprep.mubr.msk.f32.mxu0 %vm5557_vm0, %v7275_v6  ;;  %v6219_v6 = vrot.slane %v4880_v44, %v6016_v2  ;;  %v6236_v44 = vmul.f32 %v2605_v58, %v6223_v48 }
 0x839   : > { %7422 = vst [vmem:[#allocation49_spill] sm:$0xff] %v6219_v6  ;;  %v6227_v51 = vmul.f32 %v2610_v14, %v6219_v6  ;;  %v6267_v38 = vmul.f32 %v2630_v8, %v6219_v6  ;;  %v6309_v43 = vmul.f32 %v6219_v6, %v2097_v4 }
 0x8f1   : > { %v1805_v45 = vpop.f32.mrb[16].mxu0  ;;  %v1971_v50 = vpop.f32.mrb[24].mxu1 }
 0x8f2   : > { %v1806_v53 = vadd.f32 %v1805_v45, %v6203_v22  ;;  %v1972_v54 = vadd.f32 %v1971_v50, %v6207_v24  ;;  %v1807_v57 = vpop.f32.mrb[17].mxu0  ;;  %v5182_v3 = vpop.f32.mrb[25].mxu1  ;;  %v6230_v45 = vmul.f32 %v2610_v14, %v6223_v48 }
 0x8f3   : > { %v1808_v62 = vadd.f32 %v1807_v57, %v6211_v30  ;;  %v6233_v3 = vmul.f32 %v2605_v58, %v6219_v6  ;;  %v2092_v50 = vpop.permute.xlu1 %2091 }
 0x8f4   : > { %1985 = vst [vmem:[#allocation3] sm:$0xff] %v1806_v53  ;;  %1989 = vst.msk [vmem:[#allocation3 + $0x20] sm:$0xff] %vm622_vm1, %v1972_v54  ;;  %v6239_v53 = vsub.s32 2, %v6013_v63  ;;  %v6312_v60 = vmul.f32 %v6223_v48, %v2092_v50 }
 0x8f5   : > { %1986 = vst [vmem:[#allocation3 + $0x8] sm:$0xff] %v1808_v62  ;;  %v6242_v62 = vsub.s32 %v2014_v41, %v6013_v63  ;;  %v6254_v41 = vmul.f32 %v2620_v16, %v6219_v6 }
 0x8f6   : > { %7424 = vst [vmem:[#allocation51_spill] sm:$0xff] %v6239_v53 }
 0x8f7   : > { %7425 = vst [vmem:[#allocation52_spill] sm:$0xff] %v6242_v62 }
 0x8f9   : > { %v1811_v57 = vpop.f32.mrb[18].mxu0  ;;  %v1976_v32 = vpop.f32.mrb[26].mxu1 }
 0x8fa   : > { %v1812_v59 = vadd.f32 %v1811_v57, %v6203_v22  ;;  %v1977_v14 = vadd.f32 %v1976_v32, %v6207_v24  ;;  %v1813_v54 = vpop.f32.mrb[19].mxu0  ;;  %v5185_v15 = vpop.f32.mrb[27].mxu1  ;;  %v6258_v32 = vmul.f32 %v2620_v16, %v6223_v48 }
 0x8fb   : > { %v1814_v58 = vadd.f32 %v1813_v54, %v6211_v30  ;;  %v6261_v15 = vmul.f32 %v2615_v17, %v6219_v6  ;;  %v2102_v30 = vpop.permute.xlu1 %2101 }
 0x8fc   : > { %1990 = vst [vmem:[#allocation3 + $0x28] sm:$0xff] %v1812_v59  ;;  %1994 = vst.msk [vmem:[#allocation3 + $0x48] sm:$0xff] %vm622_vm1, %v1977_v14  ;;  %v5451_v57 = vld [vmem:[#allocation3] ss:$8 sps:$4 sm:$0xff]   ;;  %v6270_v59 = vmul.f32 %v2630_v8, %v6223_v48  ;;  %v6273_v14 = vmul.f32 %v2625_v47, %v6219_v6  ;;  %v5452_v16 = vld [vmem:[#allocation3 + $0x4] ss:$8 sps:$4 sm:$0xff]   ;;  %v6284_v8 = vrot.slane %v6199_v21, %v6239_v53 }
 0x8fd   : > { %1991 = vst [vmem:[#allocation3 + $0x30] sm:$0xff] %v1814_v58  ;;  %v1817_v13 = vpop.f32.mrb[20].mxu0  ;;  %v1981_v54 = vpop.f32.mrb[28].mxu1  ;;  %v2018_v17 = vrot.slane %v5451_v57, %v6242_v62  ;;  %v6306_v57 = vmul.f32 %v6219_v6, %v2102_v30 }
 0x8fe   : > { %v1982_v22 = vadd.f32 %v1981_v54, %v6207_v24  ;;  %v1819_v58 = vpop.f32.mrb[21].mxu0  ;;  %v5188_v13 = vpop.f32.mrb[29].mxu1  ;;  %7427 = vst [vmem:[#allocation54_spill] sm:$0xff] %v6284_v8  ;;  %v2477_v54 = vrot.slane %v5452_v16, %v6242_v62  ;;  %v6320_v16 = vmul.f32 %v6223_v48, %v2102_v30 }
 0x8ff   : > { %v6295_v58 = vmul.f32 %v6219_v6, %v2092_v50  ;;  %v6298_v13 = vmul.f32 %v6219_v6, %v2087_v34  ;;  %v2019_v61 = vcombine.high %v2018_v17, %v2018_v17  ;;  %v6323_v6 = vrot.slane %v2018_v17, %v6242_v62  ;;  %v4881_v17 = vld [vmem:[%s7269_s11 + $0x2] ss:$4 sm:$0x3] }
 0x900   : > { %1999 = vst.msk [vmem:[#allocation3 + $0x70] sm:$0xff] %vm622_vm1, %v1982_v22  ;;  %v2478_v36 = vcombine.high %v2477_v54, %v2477_v54  ;;  %v6326_v50 = vmul.f32 %v6223_v48, %v2097_v4 }
 0x901   : > { %v1888_v21 = vpop.f32.mrb[22].mxu0  ;;  %v2033_v47 = vrot.slane %v2019_v61, %v6242_v62  ;;  %v7429_v56 = vrot.slane %v6295_v58, 6  ;;  %v7431_v58 = vrot.slane %v6312_v60, 6  ;;  %v7439_v60 = vrot.slane %v6230_v45, 2 }
 0x902   : > { %v1890_v22 = vpop.f32.mrb[23].mxu0  ;;  %v6315_v21 = vmul.f32 %v6223_v48, %v2087_v34  ;;  %v2485_v34 = vrot.slane %v2477_v54, %v6242_v62  ;;  %v2492_v37 = vrot.slane %v2478_v36, %v6242_v62  ;;  %v2136_v54 = vrot.slane %v6326_v50, 6 }
 0x903   : > { %v2004_v39 = vld [vmem:[#allocation3 + $0x48] sm:$0x3c]  ;;  %v2458_v52 = vld [vmem:[#allocation3 + $0x48] sm:$0xc0]  ;;  %v2135_v22 = vrot.slane %v6309_v43, 6  ;;  %v2138_v43 = vrot.slane %v6320_v16, 6  ;;  %v6348_v48 = vrot.slane %v4881_v17, %v6016_v2  ;;  %v6353_v16 = vrot.slane %v4881_v17, %v6022_v5 }
 0x904   : > { %v2374_v24 = vrot.slane %v2004_v39, 2  ;;  %v5453_v49 = vld [vmem:[#allocation3 + $0x28] ss:$8 sps:$4 sm:$0x33]   ;;  %v3235_v61 = vrot.slane %v2458_v52, 6  ;;  %v2493_v36 = vcombine.high %v2485_v34, %v2485_v34  ;;  %v2494_v50 = vcombine.high %v2492_v37, %v2492_v37 }
 0x905   : > { %v1894_v31 = vpop.f32.mrb[24].mxu0  ;;  %v2502_v30 = vrot.slane %v5453_v49, %v6242_v62  ;;  %v2039_v49 = vrot.slane %v6323_v6, %v6016_v2  ;;  %v2047_v26 = vrot.slane %v2033_v47, %v6016_v2  ;;  %v6366_v17 = vrot.slane %v2485_v34, %v6022_v5 }
 0x906   : > { %v1895_v39 = vadd.f32 %v1894_v31, %v6284_v8  ;;  %v1896_v42 = vpop.f32.mrb[25].mxu0  ;;  %5190 = vmatpush3.msk.msra.mxu0 %vm824_vm3, %v2374_v24 }
 0x907   : > { %v1897_v4 = vadd.f32 %v1896_v42, %v6288_v20  ;;  %v2459_v31 = vld [vmem:[#allocation3 + $0x70] sm:$0x7]  ;;  %5298 = vmatprep.subr.bf16.mxu0 %v5779_v23  ;;  %v2034_v42 = vcombine.high %v6323_v6, %v6323_v6  ;;  %v2503_v29 = vcombine.high %v2502_v30, %v2502_v30 }
 0x908   : > { %1992 = vst [vmem:[#allocation3 + $0x38] sm:$0xff] %v1895_v39  ;;  %v3236_v24 = vrot.slane %v2459_v31, 6  ;;  %v2035_v31 = vcombine.high %v2033_v47, %v2033_v47 }
 0x909   : > { %1993 = vst [vmem:[#allocation3 + $0x40] sm:$0xff] %v1897_v4  ;;  %v1900_v33 = vpop.f32.mrb[26].mxu0  ;;  %v2517_v19 = vrot.slane %v2503_v29, %v6242_v62  ;;  %v6402_v29 = vrot.slane %v2494_v50, %v6022_v5 }
 0x90a   : > { %v1901_v23 = vadd.f32 %v1900_v33, %v6284_v8  ;;  %v1902_v39 = vpop.f32.mrb[27].mxu0  ;;  %v3237_v52 = vsel %vm7367_vm15, %v3235_v61, %v3236_v24  ;;  %v2043_v33 = vrot.slane %v6323_v6, %v6022_v5  ;;  %v6363_v61 = vrot.slane %v2485_v34, %v6016_v2 }
 0x90b   : > { %v1903_v4 = vadd.f32 %v1902_v39, %v6288_v20  ;;  %5195 = vmatpush3.msk.msra.mxu1 %vm1333_vm11, %v3237_v52  ;;  %v2051_v24 = vrot.slane %v2033_v47, %v6022_v5  ;;  %v2055_v39 = vrot.slane %v2034_v42, %v6016_v2  ;;  %v2059_v52 = vrot.slane %v2034_v42, %v6022_v5 }
 0x90c   : > { %1997 = vst [vmem:[#allocation3 + $0x60] sm:$0xff] %v1901_v23  ;;  %5314 = vmatprep.subr.bf16.mxu1 %v5857_v46  ;;  %v6373_v20 = vrot.slane %v2493_v36, %v6016_v2  ;;  %v2063_v6 = vrot.slane %v2035_v31, %v6016_v2  ;;  %v6377_v23 = vrot.slane %v2493_v36, %v6022_v5  ;;  %vm7368_vm11 = vcmask 130112  }
 0x90d   : > { %1998 = vst [vmem:[#allocation3 + $0x68] sm:$0xff] %v1903_v4  ;;  %v6380_v34 = vrot.slane %v2492_v37, %v6016_v2  ;;  %v6383_v46 = vrot.slane %v2492_v37, %v6022_v5  ;;  %v2067_v4 = vrot.slane %v2035_v31, %v6022_v5  ;;  %v6387_v8 = vrot.slane %v2494_v50, %v6016_v2 }
 0x90e   : > { %v2510_v42 = vrot.slane %v2502_v30, %v6242_v62  ;;  %v7430_v31 = vrot.slane %v6298_v13, 6  ;;  %v7440_v62 = vrot.slane %v6254_v41, 2  ;;  %vm2890_vm15 = vcmask 87088  }
 0x90f   : > { %v2002_v47 = vld [vmem:[#allocation3 + $0x38] sm:$0x3c] }
 0x910   : > { %v2003_v18 = vld [vmem:[#allocation3 + $0x40] sm:$0x3c]  ;;  %v2078_v11 = vadd.f32 %v2047_v26, %v2002_v47  ;;  %v2076_v36 = vadd.f32 %v2039_v49, %v2002_v47  ;;  %v2082_v10 = vadd.f32 %v2063_v6, %v2002_v47  ;;  %v2080_v1 = vadd.f32 %v2055_v39, %v2002_v47  ;;  %v6404_v26 = vld [vmem:[#allocation3 + $0x38] sm:$0xc0]  ;;  %v6406_v49 = vld [vmem:[#allocation3 + $0x40] sm:$0xc0] }
 0x911   : > { %v2079_v0 = vadd.f32 %v2051_v24, %v2003_v18  ;;  %v2077_v27 = vadd.f32 %v2043_v33, %v2003_v18  ;;  %v2083_v40 = vadd.f32 %v2067_v4, %v2003_v18  ;;  %v2081_v37 = vadd.f32 %v2059_v52, %v2003_v18 }
 0x912   : > { %v6393_v55 = vadd.f32 %v7429_v56, %v2078_v11  ;;  %v6397_v35 = vadd.f32 %v7430_v31, %v2076_v36  ;;  %v6399_v30 = vadd.f32 %v2135_v22, %v2080_v1  ;;  %v6409_v18 = vrot.slane %v2510_v42, %v6016_v2 }
 0x913   : > { %v6412_v56 = vrot.slane %v2510_v42, %v6022_v5  ;;  %v6415_v11 = vrot.slane %v2517_v19, %v6016_v2  ;;  %v6418_v1 = vrot.slane %v2517_v19, %v6022_v5  ;;  %v6422_v13 = vadd.f32 %v7431_v58, %v2079_v0 }
 0x914   : > { %v7432_v22 = vrot.slane %v6315_v21, 6  ;;  %v7433_v33 = vrot.slane %v6306_v57, 6  ;;  %v6432_v39 = vadd.f32 %v2138_v43, %v2083_v40  ;;  %v6436_v19 = vadd.f32 %v2136_v54, %v2081_v37 }
 0x915   : > { %v2578_v0 = vadd.f32 %v6363_v61, %v6404_v26  ;;  %v2587_v40 = vadd.f32 %v6377_v23, %v6406_v49  ;;  %v2582_v57 = vadd.f32 %v6380_v34, %v6404_v26  ;;  %v2583_v21 = vadd.f32 %v6383_v46, %v6406_v49 }
 0x916   : > { %v6426_v50 = vadd.f32 %v7432_v22, %v2077_v27  ;;  %v6430_v24 = vadd.f32 %v7433_v33, %v2082_v10  ;;  %v2579_v27 = vadd.f32 %v6366_v17, %v6406_v49  ;;  %v2586_v10 = vadd.f32 %v6373_v20, %v6404_v26 }
 0x917   : > { %v2590_v54 = vadd.f32 %v6387_v8, %v6404_v26  ;;  %v2591_v43 = vadd.f32 %v6402_v29, %v6406_v49  ;;  %v7434_v47 = vrot.slane %v6233_v3, 2  ;;  %v7435_v42 = vrot.slane %v6236_v44, 2 }
 0x918   : > { %v7436_v37 = vrot.slane %v6261_v15, 2  ;;  %v7437_v58 = vrot.slane %v6264_v9, 2  ;;  %v7438_v33 = vrot.slane %v6227_v51, 2  ;;  %v2685_v6 = vadd.f32 %v7439_v60, %v2583_v21 }
 0x919   : > { %v2680_v4 = vadd.f32 %v7434_v47, %v2578_v0  ;;  %v2681_v36 = vadd.f32 %v7435_v42, %v2579_v27  ;;  %v2692_v28 = vadd.f32 %v7440_v62, %v2590_v54  ;;  %v7441_v0 = vrot.slane %v6258_v32, 2 }
 0x91a   : > { %v2688_v31 = vadd.f32 %v7436_v37, %v2586_v10  ;;  %v2689_v22 = vadd.f32 %v7437_v58, %v2587_v40  ;;  %v2684_v52 = vadd.f32 %v7438_v33, %v2582_v57  ;;  %v2709_v37 = vmax.f32 %v2685_v6, 0.0 }
 0x91b   : > { %v2693_v47 = vadd.f32 %v7441_v0, %v2591_v43  ;;  %v2704_v12 = vmax.f32 %v2680_v4, 0.0  ;;  %v2705_v27 = vmax.f32 %v2681_v36, 0.0  ;;  %v2716_v53 = vmax.f32 %v2692_v28, 0.0 }
 0x91c   : > { %v2712_v42 = vmax.f32 %v2688_v31, 0.0  ;;  %v2713_v7 = vmax.f32 %v2689_v22, 0.0  ;;  %v2708_v10 = vmax.f32 %v2684_v52, 0.0  ;;  %v2733_v54 = vmul.f32 %v2709_v37, %v6353_v16  ;;  %v6479_v52 = vld [vmem:[#allocation3 + $0x60] sm:$0x7] }
 0x91d   : > { %v2717_v40 = vmax.f32 %v2693_v47, 0.0  ;;  %v2728_v58 = vmul.f32 %v2704_v12, %v6348_v48  ;;  %v2729_v57 = vmul.f32 %v2705_v27, %v6353_v16  ;;  %v2740_v43 = vmul.f32 %v2716_v53, %v6348_v48 }
 0x91e   : > { %v2736_v60 = vmul.f32 %v2712_v42, %v6348_v48  ;;  %v2737_v21 = vmul.f32 %v2713_v7, %v6353_v16  ;;  %v2732_v62 = vmul.f32 %v2708_v10, %v6348_v48  ;;  %v6485_v7 = vld [vmem:[#allocation3 + $0x68] sm:$0x7]  ;;  %v2765_v53 = vsel %vm2752_vm2, %v2733_v54, 0.0 }
 0x91f   : > { %v2741_v4 = vmul.f32 %v2717_v40, %v6353_v16  ;;  %v2753_v28 = vsel %vm2752_vm2, %v2728_v58, 0.0  ;;  %v2754_v12 = vsel %vm2752_vm2, %v2729_v57, 0.0  ;;  %v2784_v47 = vsel %vm2752_vm2, %v2740_v43, 0.0 }
 0x920   : > { %v2774_v6 = vsel %vm2752_vm2, %v2736_v60, 0.0  ;;  %v2775_v36 = vsel %vm2752_vm2, %v2737_v21, 0.0  ;;  %v2755_v31 = vadd.f32 %v2754_v12, %v2753_v28  ;;  %v2764_v33 = vsel %vm2752_vm2, %v2732_v62, 0.0 }
 0x921   : > { %v2776_v22 = vadd.f32 %v2775_v36, %v2774_v6  ;;  %v2766_v0 = vadd.f32 %v2765_v53, %v2764_v33  ;;  %v2785_v27 = vsel %vm2752_vm2, %v2741_v4, 0.0  ;;  %v2584_v42 = vadd.f32 %v6380_v34, %v6479_v52 }
 0x922   : > { %v2158_v10 = vmax.f32 %v6422_v13, 0.0  ;;  %2756 = vadd.xlane.f32.xlu0 %v2755_v31  ;;  %v2786_v37 = vadd.f32 %v2785_v27, %v2784_v47  ;;  %v2585_v40 = vadd.f32 %v6383_v46, %v6485_v7  ;;  %v2594_v58 = vadd.f32 %v6409_v18, %v6404_v26 }
 0x923   : > { %2777 = vadd.xlane.f32.xlu1 %v2776_v22  ;;  %v7442_v57 = vrot.slane %v6227_v51, 2  ;;  %v2595_v21 = vadd.f32 %v6412_v56, %v6406_v49  ;;  %v2588_v34 = vadd.f32 %v6373_v20, %v6479_v52  ;;  %v2589_v62 = vadd.f32 %v6377_v23, %v6485_v7 }
 0x924   : > { %v7443_v54 = vrot.slane %v6230_v45, 2  ;;  %v7444_v46 = vrot.slane %v6273_v14, 2  ;;  %v2580_v28 = vadd.f32 %v6363_v61, %v6479_v52  ;;  %v2581_v51 = vadd.f32 %v6366_v17, %v6485_v7 }
 0x925   : > { %v2686_v60 = vadd.f32 %v7442_v57, %v2584_v42  ;;  %v7445_v6 = vrot.slane %v6278_v25, 2  ;;  %v7446_v20 = vrot.slane %v6261_v15, 2  ;;  %v7447_v23 = vrot.slane %v6264_v9, 2 }
 0x926   : > { %v2687_v43 = vadd.f32 %v7443_v54, %v2585_v40  ;;  %v2696_v4 = vadd.f32 %v7444_v46, %v2594_v58  ;;  %2767 = vadd.xlane.f32.xlu0 %v2766_v0  ;;  %v7448_v53 = vrot.slane %v6233_v3, 2  ;;  %v7449_v47 = vrot.slane %v6236_v44, 2 }
 0x927   : > { %v2710_v12 = vmax.f32 %v2686_v60, 0.0  ;;  %v2697_v36 = vadd.f32 %v7445_v6, %v2595_v21  ;;  %v2690_v31 = vadd.f32 %v7446_v20, %v2588_v34  ;;  %v2691_v45 = vadd.f32 %v7447_v23, %v2589_v62  ;;  %2787 = vadd.xlane.f32.xlu1 %v2786_v37 }
 0x928   : > { %v2711_v22 = vmax.f32 %v2687_v43, 0.0  ;;  %v2720_v33 = vmax.f32 %v2696_v4, 0.0  ;;  %v2682_v61 = vadd.f32 %v7448_v53, %v2580_v28  ;;  %v2683_v17 = vadd.f32 %v7449_v47, %v2581_v51 }
 0x929   : > { %v2734_v27 = vmul.f32 %v2710_v12, %v6348_v48  ;;  %v2721_v42 = vmax.f32 %v2697_v36, 0.0  ;;  %v2714_v40 = vmax.f32 %v2690_v31, 0.0  ;;  %v2715_v58 = vmax.f32 %v2691_v45, 0.0 }
 0x92a   : > { %v2735_v15 = vmul.f32 %v2711_v22, %v6353_v16  ;;  %v2744_v9 = vmul.f32 %v2720_v33, %v6348_v48  ;;  %v2706_v0 = vmax.f32 %v2682_v61, 0.0  ;;  %v2707_v37 = vmax.f32 %v2683_v17, 0.0 }
 0x92b   : > { %v2769_v57 = vsel %vm2758_vm6, %v2734_v27, 0.0  ;;  %v2745_v3 = vmul.f32 %v2721_v42, %v6353_v16  ;;  %v2738_v60 = vmul.f32 %v2714_v40, %v6348_v48  ;;  %v2739_v44 = vmul.f32 %v2715_v58, %v6353_v16 }
 0x92c   : > { %v2770_v21 = vsel %vm2758_vm6, %v2735_v15, 0.0  ;;  %v2794_v34 = vsel %vm2752_vm2, %v2744_v9, 0.0  ;;  %v2730_v62 = vmul.f32 %v2706_v0, %v6348_v48  ;;  %v2731_v54 = vmul.f32 %v2707_v37, %v6353_v16 }
 0x92d   : > { %v2156_v43 = vmax.f32 %v6426_v50, 0.0  ;;  %v2160_v46 = vmax.f32 %v6436_v19, 0.0  ;;  %v2771_v4 = vadd.f32 %v2770_v21, %v2769_v57  ;;  %v2795_v28 = vsel %vm2752_vm2, %v2745_v3, 0.0 }
 0x92e   : > { %v2796_v51 = vadd.f32 %v2795_v28, %v2794_v34  ;;  %v2779_v12 = vsel %vm2758_vm6, %v2738_v60, 0.0  ;;  %v2780_v6 = vsel %vm2758_vm6, %v2739_v44, 0.0  ;;  %v2759_v36 = vsel %vm2758_vm6, %v2730_v62, 0.0 }
 0x92f   : > { %2772 = vadd.xlane.f32.xlu0 %v2771_v4  ;;  %v2760_v20 = vsel %vm2758_vm6, %v2731_v54, 0.0  ;;  %v2592_v31 = vadd.f32 %v6387_v8, %v6479_v52  ;;  %v2593_v50 = vadd.f32 %v6402_v29, %v6485_v7  ;;  %v2598_v19 = vadd.f32 %v6415_v11, %v6404_v26 }
 0x930   : > { %2797 = vadd.xlane.f32.xlu1 %v2796_v51  ;;  %v2599_v23 = vadd.f32 %v6418_v1, %v6406_v49  ;;  %v2596_v45 = vadd.f32 %v6409_v18, %v6479_v52  ;;  %v2597_v22 = vadd.f32 %v6412_v56, %v6485_v7  ;;  %v7450_v33 = vmax.f32 %v6397_v35, 0.0 }
 0x931   : > { %v2781_v53 = vadd.f32 %v2780_v6, %v2779_v12  ;;  %v7451_v29 = vrot.slane %v6254_v41, 2  ;;  %v7452_v26 = vrot.slane %v6258_v32, 2  ;;  %v7453_v17 = vrot.slane %v6267_v38, 2 }
 0x932   : > { %v2174_v8 = vmul.f32 %v6348_v48, %v7450_v33  ;;  %v2761_v27 = vadd.f32 %v2760_v20, %v2759_v36  ;;  %v7454_v18 = vrot.slane %v6270_v59, 2  ;;  %v7455_v56 = vrot.slane %v6273_v14, 2 }
 0x933   : > { %v2694_v61 = vadd.f32 %v7451_v29, %v2592_v31  ;;  %v2695_v47 = vadd.f32 %v7452_v26, %v2593_v50  ;;  %v2700_v49 = vadd.f32 %v7453_v17, %v2598_v19  ;;  %v7456_v35 = vrot.slane %v6278_v25, 2  ;;  %2782 = vadd.xlane.f32.xlu0 %v2781_v53 }
 0x934   : > { %v2701_v42 = vadd.f32 %v7454_v18, %v2599_v23  ;;  %v2698_v40 = vadd.f32 %v7455_v56, %v2596_v45  ;;  %v2175_v32 = vmul.f32 %v6353_v16, %v2156_v43  ;;  %2762 = vadd.xlane.f32.xlu1 %v2761_v27  ;;  %v2183_v3 = vsel %vm2182_vm8, %v2174_v8, 0.0 }
 0x935   : > { %v2699_v58 = vadd.f32 %v7456_v35, %v2597_v22  ;;  %v2718_v15 = vmax.f32 %v2694_v61, 0.0  ;;  %v2719_v41 = vmax.f32 %v2695_v47, 0.0  ;;  %v2724_v9 = vmax.f32 %v2700_v49, 0.0 }
 0x936   : > { %v2725_v0 = vmax.f32 %v2701_v42, 0.0  ;;  %v2722_v37 = vmax.f32 %v2698_v40, 0.0  ;;  %v2600_v25 = vadd.f32 %v6415_v11, %v6479_v52  ;;  %v2601_v54 = vadd.f32 %v6418_v1, %v6485_v7 }
 0x937   : > { %v2723_v57 = vmax.f32 %v2699_v58, 0.0  ;;  %v2742_v60 = vmul.f32 %v2718_v15, %v6348_v48  ;;  %v2743_v14 = vmul.f32 %v2719_v41, %v6353_v16  ;;  %v2748_v44 = vmul.f32 %v2724_v9, %v6348_v48 }
 0x938   : > { %v2749_v21 = vmul.f32 %v2725_v0, %v6353_v16  ;;  %v2746_v34 = vmul.f32 %v2722_v37, %v6348_v48  ;;  %v7457_v51 = vmov %v7453_v17  ;;  %v2184_v36 = vsel %vm2182_vm8, %v2175_v32, 0.0 }
 0x939   : > { %v2747_v62 = vmul.f32 %v2723_v57, %v6353_v16  ;;  %v2789_v43 = vsel %vm2758_vm6, %v2742_v60, 0.0  ;;  %v2790_v4 = vsel %vm2758_vm6, %v2743_v14, 0.0  ;;  %v2804_v28 = vsel %vm2752_vm2, %v2748_v44, 0.0 }
 0x93a   : > { %v2702_v12 = vadd.f32 %v7457_v51, %v2600_v25  ;;  %v2791_v6 = vadd.f32 %v2790_v4, %v2789_v43  ;;  %v2805_v11 = vsel %vm2752_vm2, %v2749_v21, 0.0  ;;  %v2799_v52 = vsel %vm2758_vm6, %v2746_v34, 0.0 }
 0x93b   : > { %v2806_v20 = vadd.f32 %v2805_v11, %v2804_v28  ;;  %v2800_v31 = vsel %vm2758_vm6, %v2747_v62, 0.0  ;;  %v7458_v1 = vmov %v7454_v18  ;;  %v7459_v19 = vmax.f32 %v6399_v30, 0.0 }
 0x93c   : > { %v2703_v7 = vadd.f32 %v7458_v1, %v2601_v54  ;;  %v2726_v50 = vmax.f32 %v2702_v12, 0.0  ;;  %2792 = vadd.xlane.f32.xlu0 %v2791_v6  ;;  %v2179_v23 = vmul.f32 %v6353_v16, %v2160_v46  ;;  %v2161_v33 = vmax.f32 %v6430_v24, 0.0 }
 0x93d   : > { %v2178_v38 = vmul.f32 %v6348_v48, %v7459_v19  ;;  %2807 = vadd.xlane.f32.xlu1 %v2806_v20  ;;  %v2162_v8 = vmax.f32 %v6432_v39, 0.0  ;;  %v2801_v53 = vadd.f32 %v2800_v31, %v2799_v52  ;;  %v2185_v29 = vadd.f32 %v2184_v36, %v2183_v3 }
 0x93e   : > { %v2727_v45 = vmax.f32 %v2703_v7, 0.0  ;;  %v2750_v22 = vmul.f32 %v2726_v50, %v6348_v48  ;;  %v7460_v30 = vmax.f32 %v6393_v55, 0.0  ;;  %v2177_v46 = vmul.f32 %v6353_v16, %v2158_v10 }
 0x93f   : > { %v2193_v47 = vsel %vm2182_vm8, %v2178_v38, 0.0  ;;  %v2194_v24 = vsel %vm2182_vm8, %v2179_v23, 0.0  ;;  %v2180_v49 = vmul.f32 %v6348_v48, %v2161_v33  ;;  %v2181_v13 = vmul.f32 %v6353_v16, %v2162_v8 }
 0x940   : > { %v2751_v59 = vmul.f32 %v2727_v45, %v6353_v16  ;;  %v2809_v61 = vsel %vm2758_vm6, %v2750_v22, 0.0  ;;  %v2176_v26 = vmul.f32 %v6348_v48, %v7460_v30  ;;  %2802 = vadd.xlane.f32.xlu0 %v2801_v53  ;;  %v2195_v27 = vadd.f32 %v2194_v24, %v2193_v47 }
 0x941   : > { %2186 = vadd.xlane.f32.xlu1 %v2185_v29  ;;  %v2189_v18 = vsel %vm2182_vm8, %v2177_v46, 0.0  ;;  %v2198_v42 = vsel %vm2182_vm8, %v2180_v49, 0.0  ;;  %v2199_v56 = vsel %vm2182_vm8, %v2181_v13, 0.0  ;;  %v7461_v0 = vlaneseq }
 0x942   : > { %v2810_v39 = vsel %vm2758_vm6, %v2751_v59, 0.0  ;;  %v2188_v55 = vsel %vm2182_vm8, %v2176_v26, 0.0  ;;  %v2200_v40 = vadd.f32 %v2199_v56, %v2198_v42  ;;  %vm2227_vm2 = vcmask 1042434  }
 0x943   : > { %v2811_v17 = vadd.f32 %v2810_v39, %v2809_v61  ;;  %v2190_v10 = vadd.f32 %v2189_v18, %v2188_v55  ;;  %v6629_v37 = vand.u32 127, %v7461_v0  ;;  %vm2229_vm6 = vcmask 1043459  }
 0x944   : > { %vm2885_vm8 = vcmask 1044484  }
 0x945   : > { %2812 = vadd.xlane.f32.xlu0 %v2811_v17  ;;  %2196 = vadd.xlane.f32.xlu1 %v2195_v27  ;;  %v2830_v57 = vadd.s32 4294967288, %v6629_v37  ;;  %v6638_v14 = vsub.s32 %v6629_v37, %v6013_v63 }
 0x947   : > { %v6641_v44 = vsub.s32 %v2830_v57, %v6013_v63  ;;  %v7462_v57 = vld [vmem:[#allocation51_spill] sm:$0xff] }
 0x949   : > { %2191 = vadd.xlane.f32.xlu0 %v2190_v10 }
 0x94d   : > { %2201 = vadd.xlane.f32.xlu0 %v2200_v40 }
 0x9af   : > { %v6616_v35 = vpop.xlane.xlu0 %2756 }
 0x9b0   : > { %v6618_v58 = vpop.xlane.xlu1 %2777  ;;  %v2829_v34 = vrot.slane %v6616_v35, %v6638_v14 }
 0x9b1   : > { %v2849_v12 = vrot.slane %v6618_v58, %v6638_v14 }
 0x9b3   : > { %v6620_v15 = vpop.xlane.xlu0 %2767 }
 0x9b4   : > { %v6622_v41 = vpop.xlane.xlu1 %2787  ;;  %v2840_v4 = vrot.slane %v6620_v15, %v6638_v14 }
 0x9b5   : > { %v2858_v11 = vrot.slane %v6622_v41, %v6638_v14 }
 0x9bc   : > { %v6624_v9 = vpop.xlane.xlu0 %2772 }
 0x9bd   : > { %v6626_v32 = vpop.xlane.xlu1 %2797  ;;  %v2844_v62 = vrot.slane %v6624_v9, %v6641_v44 }
 0x9be   : > { %v2867_v20 = vrot.slane %v6626_v32, %v6638_v14 }
 0x9bf   : > { %v2845_v52 = vsel %vm7368_vm11, %v2844_v62, %v2840_v4 }
 0x9c0   : > { %v6632_v3 = vpop.xlane.xlu0 %2782 }
 0x9c1   : > { %v6634_v60 = vpop.xlane.xlu1 %2762  ;;  %v2853_v43 = vrot.slane %v6632_v3, %v6641_v44 }
 0x9c2   : > { %v2834_v25 = vrot.slane %v6634_v60, %v6641_v44 }
 0x9c3   : > { %v2854_v31 = vsel %vm7368_vm11, %v2853_v43, %v2849_v12 }
 0x9c4   : > { %v2836_v28 = vsel %vm7368_vm11, %v2834_v25, %v2829_v34 }
 0x9c5   : > { %v2882_v1 = vsel %vm2225_vm14, %v2845_v52, %v2836_v28 }
 0x9c6   : > { %v2883_v22 = vsel %vm2227_vm2, %v2854_v31, %v2882_v1  ;;  %v2917_v31 = vsub.s32 5, %v6013_v63  ;;  %v7464_v1 = vld [vmem:[#allocation45_spill] sm:$0xff] }
 0x9c9   : > { %v6645_v21 = vpop.xlane.xlu0 %2792 }
 0x9ca   : > { %v6651_v54 = vpop.xlane.xlu1 %2807  ;;  %v2862_v51 = vrot.slane %v6645_v21, %v6641_v44 }
 0x9cb   : > { %v2876_v23 = vrot.slane %v6651_v54, %v6638_v14 }
 0x9cc   : > { %v2863_v7 = vsel %vm7368_vm11, %v2862_v51, %v2858_v11  ;;  %v7463_v51 = vld [vmem:[#allocation53_spill] sm:$0xff] }
 0x9cd   : > { %v6662_v6 = vpop.xlane.xlu0 %2802  ;;  %v2884_v33 = vsel %vm2229_vm6, %v2863_v7, %v2883_v22 }
 0x9ce   : > { %v2871_v36 = vrot.slane %v6662_v6, %v6641_v44  ;;  %v2187_v50 = vpop.xlane.xlu1 %2186 }
 0x9cf   : > { %v2212_v61 = vrot.slane %v2187_v50, %v6638_v14 }
 0x9d0   : > { %v2872_v38 = vsel %vm7368_vm11, %v2871_v36, %v2867_v20 }
 0x9d1   : > { %v2886_v53 = vsel %vm2885_vm8, %v2872_v38, %v2884_v33 }
 0x9d2   : > { %v6674_v19 = vpop.xlane.xlu0 %2812  ;;  %v6687_v30 = vpop.xlane.xlu1 %2196 }
 0x9d3   : > { %v2880_v45 = vrot.slane %v6674_v19, %v6641_v44  ;;  %v2220_v24 = vrot.slane %v6687_v30, %v6638_v14 }
 0x9d5   : > { %v2881_v8 = vsel %vm7368_vm11, %v2880_v45, %v2876_v23  ;;  %vm2232_vm11 = vcmask 44048  }
 0x9d6   : > { %v2192_v29 = vpop.xlane.xlu0 %2191  ;;  %v2888_v59 = vsel %vm2887_vm10, %v2881_v8, %v2886_v53 }
 0x9d7   : > { %v2216_v26 = vrot.slane %v2192_v29, %v6638_v14  ;;  %v2891_v46 = vsel %vm2890_vm15, %v2888_v59, -inf  ;;  %vm3019_vm15 = vcmask 80912  }
 0x9d8   : > { %2892 = vmax.xlane.f32.xlu1 %v2891_v46 }
 0x9d9   : > { %v2226_v47 = vsel %vm2225_vm14, %v2216_v26, %v2212_v61 }
 0x9da   : > { %v6693_v39 = vpop.xlane.xlu0 %2201  ;;  %v2228_v49 = vsel %vm2227_vm2, %v2220_v24, %v2226_v47 }
 0x9db   : > { %v2224_v17 = vrot.slane %v6693_v39, %v6638_v14 }
 0x9dd   : > { %v2230_v27 = vsel %vm2229_vm6, %v2224_v17, %v2228_v49 }
 0x9de   : > { %v2233_v55 = vsel %vm2232_vm11, %v2230_v27, -inf  ;;  %vm3072_vm11 = vcmask 37888  }
 0x9df   : > { %2234 = vmax.xlane.f32.xlu0 %v2233_v55 }
 0xa65   : > { %v2893_v13 = vpop.xlane.xlu1 %2892 }
 0xa66   : > { %v2898_v56 = vrot.slane %v2893_v13, %v6016_v2  ;;  %v2906_v25 = vrot.slane %v2893_v13, %v7462_v57  ;;  %v2902_v43 = vrot.slane %v2893_v13, %v6022_v5  ;;  %v2910_v12 = vrot.slane %v2893_v13, %v7463_v51 }
 0xa68   : > { %v2926_v34 = vsub.f32 %v6634_v60, %v2898_v56  ;;  %v2925_v4 = vsub.f32 %v6616_v35, %v2898_v56  ;;  %v2929_v11 = vsub.f32 %v6618_v58, %v2906_v25  ;;  %v2927_v36 = vsub.f32 %v6620_v15, %v2902_v43 }
 0xa69   : > { %v2914_v60 = vrot.slane %v2893_v13, %v7464_v1  ;;  %v2931_v7 = vsub.f32 %v6622_v41, %v2910_v12  ;;  %v2928_v35 = vsub.f32 %v6624_v9, %v2902_v43  ;;  %v2918_v58 = vrot.slane %v2893_v13, %v2917_v31 }
 0xa6a   : > { %v2939_v52 = vmul.f32 1.442695, %v2926_v34  ;;  %v2937_v20 = vmul.f32 1.442695, %v2925_v4  ;;  %v2941_v38 = vmul.f32 1.442695, %v2927_v36  ;;  %v2930_v45 = vsub.f32 %v6632_v3, %v2906_v25 }
 0xa6b   : > { %v2933_v23 = vsub.f32 %v6626_v32, %v2914_v60  ;;  %v2949_v15 = vmul.f32 1.442695, %v2931_v7  ;;  %v2943_v22 = vmul.f32 1.442695, %v2928_v35  ;;  %v2935_v9 = vsub.f32 %v6651_v54, %v2918_v58 }
 0xa6c   : > { %v6699_v18 = vpop.xlane.xlu0 %2234  ;;  %v2932_v32 = vsub.f32 %v6645_v21, %v2910_v12  ;;  %v2947_v3 = vmul.f32 1.442695, %v2930_v45  ;;  %v2934_v26 = vsub.f32 %v6662_v6, %v2914_v60  ;;  %v2936_v17 = vsub.f32 %v6674_v19, %v2918_v58 }
 0xa6d   : > { %v2240_v10 = vrot.slane %v6699_v18, %v6016_v2  ;;  %v2244_v42 = vrot.slane %v6699_v18, %v6022_v5  ;;  %v2953_v8 = vmul.f32 1.442695, %v2933_v23  ;;  %v2248_v53 = vrot.slane %v6699_v18, %v7462_v57 }
 0xa6e   : > { %v2957_v61 = vmul.f32 1.442695, %v2935_v9  ;;  %v2951_v46 = vmul.f32 1.442695, %v2932_v32  ;;  %v2252_v49 = vrot.slane %v6699_v18, %v7463_v51  ;;  %v2959_v55 = vmul.f32 1.442695, %v2936_v17 }
 0xa6f   : > { %v2257_v40 = vsub.f32 %v2187_v50, %v2240_v10  ;;  %v2258_v0 = vsub.f32 %v2192_v29, %v2244_v42  ;;  %v2945_v50 = vmul.f32 1.442695, %v2929_v11  ;;  %v2259_v54 = vsub.f32 %v6687_v30, %v2248_v53 }
 0xa70   : > { %v2955_v30 = vmul.f32 1.442695, %v2934_v26  ;;  %v2260_v13 = vsub.f32 %v6693_v39, %v2252_v49  ;;  %v3009_v36 = vadd.s32 6, %v6629_v37 }
 0xa71   : > { %v2261_v62 = vmul.f32 1.442695, %v2257_v40  ;;  %v2263_v28 = vmul.f32 1.442695, %v2258_v0  ;;  %v2265_v24 = vmul.f32 1.442695, %v2259_v54 }
 0xa72   : > { %v2267_v18 = vmul.f32 1.442695, %v2260_v13 }
 0xa73   : > { %5471 = vpow2.f32 %v2261_v62 }
 0xa74   : > { %5473 = vpow2.f32 %v2263_v28 }
 0xa75   : > { %5475 = vpow2.f32 %v2939_v52 }
 0xa76   : > { %5477 = vpow2.f32 %v2937_v20  ;;  %v3014_v20 = vadd.s32 4294967294, %v6629_v37 }
 0xa77   : > { %5479 = vpow2.f32 %v2945_v50  ;;  %v6782_v50 = vsub.s32 %v3009_v36, %v6013_v63 }
 0xa78   : > { %5481 = vpow2.f32 %v2941_v38  ;;  %v6785_v35 = vsub.s32 %v3014_v20, %v6013_v63  ;;  %v2285_v38 = vadd.s32 2, %v6629_v37 }
 0xa79   : > { %5483 = vpow2.f32 %v2949_v15 }
 0xa7a   : > { %5485 = vpow2.f32 %v2943_v22  ;;  %v6795_v32 = vsub.s32 %v2285_v38, %v6013_v63 }
 0xa7b   : > { %5487 = vpow2.f32 %v2953_v8 }
 0xa7c   : > { %5489 = vpow2.f32 %v2947_v3 }
 0xa7d   : > { %v6721_v33 = vpop.eup %5471  ;;  %5491 = vpow2.f32 %v2957_v61 }
 0xa7e   : > { %v6723_v41 = vpop.eup %5473  ;;  %2274 = vperm.xlu0 %5449, %v6721_v33   ;;  %5493 = vpow2.f32 %v2951_v46 }
 0xa7f   : > { %2277 = vperm.xlu1 %5450, %v6723_v41   ;;  %v6731_v29 = vpop.eup %5475  ;;  %5495 = vpow2.f32 %v2265_v24 }
 0xa80   : > { %v6733_v59 = vpop.eup %5477  ;;  %5497 = vpow2.f32 %v2955_v30 }
 0xa81   : > { %v6739_v47 = vpop.eup %5479  ;;  %5499 = vpow2.f32 %v2959_v55 }
 0xa82   : > { %2977 = vperm.xlu0 %5449, %v6731_v29   ;;  %v6741_v21 = vpop.eup %5481  ;;  %5501 = vpow2.f32 %v2267_v18 }
 0xa83   : > { %2974 = vperm.xlu1 %5450, %v6733_v59   ;;  %v6748_v6 = vpop.eup %5483 }
 0xa84   : > { %v6750_v27 = vpop.eup %5485 }
 0xa85   : > { %v6755_v10 = vpop.eup %5487 }
 0xa86   : > { %2986 = vperm.xlu0 %5449, %v6739_v47   ;;  %v6757_v19 = vpop.eup %5489 }
 0xa87   : > { %2980 = vperm.xlu1 %5450, %v6741_v21   ;;  %v6761_v42 = vpop.eup %5491 }
 0xa88   : > { %v6763_v56 = vpop.eup %5493 }
 0xa89   : > { %v6767_v39 = vpop.eup %5495 }
 0xa8a   : > { %2992 = vperm.xlu0 %5449, %v6748_v6   ;;  %v6769_v40 = vpop.eup %5497 }
 0xa8b   : > { %2983 = vperm.xlu1 %5450, %v6750_v27   ;;  %v6773_v0 = vpop.eup %5499 }
 0xa8c   : > { %v6776_v25 = vpop.eup %5501 }
 0xa8e   : > { %2998 = vperm.xlu0 %5449, %v6755_v10  }
 0xa8f   : > { %2989 = vperm.xlu1 %5450, %v6757_v19  }
 0xa92   : > { %3004 = vperm.xlu0 %5449, %v6761_v42  }
 0xa93   : > { %2995 = vperm.xlu1 %5450, %v6763_v56  }
 0xa96   : > { %2280 = vperm.xlu0 %5449, %v6767_v39  }
 0xa97   : > { %3001 = vperm.xlu1 %5450, %v6769_v40  }
 0xa9b   : > { %3007 = vperm.xlu1 %5450, %v6773_v0  }
 0xa9f   : > { %2283 = vperm.xlu1 %5450, %v6776_v25  }
 0xafd   : > { %v2275_v34 = vpop.permute.xlu0 %2274 }
 0xafe   : > { %v2278_v62 = vpop.permute.xlu1 %2277  ;;  %v2289_v13 = vrot.slane %v2275_v34, %v6795_v32 }
 0xb01   : > { %v2978_v43 = vpop.permute.xlu0 %2977 }
 0xb02   : > { %v2975_v4 = vpop.permute.xlu1 %2974  ;;  %v3018_v9 = vrot.slane %v2978_v43, %v6785_v35 }
 0xb03   : > { %v3013_v22 = vrot.slane %v2975_v4, %v6782_v50 }
 0xb05   : > { %v2987_v28 = vpop.permute.xlu0 %2986  ;;  %v3020_v30 = vsel %vm3019_vm15, %v3018_v9, %v3013_v22 }
 0xb06   : > { %v2981_v12 = vpop.permute.xlu1 %2980  ;;  %v3033_v3 = vrot.slane %v2987_v28, %v6782_v50  ;;  %v2293_v28 = vrot.slane %v2278_v62, %v6795_v32 }
 0xb07   : > { %v3024_v8 = vrot.slane %v2981_v12, %v6782_v50 }
 0xb08   : > { %v2302_v62 = vsel %vm2225_vm14, %v2293_v28, %v2289_v13 }
 0xb09   : > { %v2993_v11 = vpop.permute.xlu0 %2992 }
 0xb0a   : > { %v2984_v52 = vpop.permute.xlu1 %2983  ;;  %v3042_v26 = vrot.slane %v2993_v11, %v6782_v50 }
 0xb0b   : > { %v3028_v23 = vrot.slane %v2984_v52, %v6785_v35 }
 0xb0d   : > { %v2999_v60 = vpop.permute.xlu0 %2998  ;;  %v3029_v54 = vsel %vm3019_vm15, %v3028_v23, %v3024_v8 }
 0xb0e   : > { %v2990_v7 = vpop.permute.xlu1 %2989  ;;  %v3051_v17 = vrot.slane %v2999_v60, %v6782_v50  ;;  %v3066_v18 = vsel %vm2225_vm14, %v3029_v54, %v3020_v30 }
 0xb0f   : > { %v3037_v45 = vrot.slane %v2990_v7, %v6785_v35 }
 0xb11   : > { %v3005_v15 = vpop.permute.xlu0 %3004  ;;  %v3038_v24 = vsel %vm3019_vm15, %v3037_v45, %v3033_v3 }
 0xb12   : > { %v2996_v58 = vpop.permute.xlu1 %2995  ;;  %v3067_v12 = vsel %vm2227_vm2, %v3038_v24, %v3066_v18  ;;  %v3060_v11 = vrot.slane %v3005_v15, %v6782_v50 }
 0xb13   : > { %v3046_v53 = vrot.slane %v2996_v58, %v6785_v35 }
 0xb15   : > { %v3047_v49 = vsel %vm3019_vm15, %v3046_v53, %v3042_v26  ;;  %v2281_v55 = vpop.permute.xlu0 %2280 }
 0xb16   : > { %v3002_v61 = vpop.permute.xlu1 %3001  ;;  %v2297_v36 = vrot.slane %v2281_v55, %v6795_v32  ;;  %v3068_v20 = vsel %vm2229_vm6, %v3047_v49, %v3067_v12 }
 0xb17   : > { %v3055_v46 = vrot.slane %v3002_v61, %v6785_v35 }
 0xb18   : > { %v2303_v15 = vsel %vm2227_vm2, %v2297_v36, %v2302_v62 }
 0xb19   : > { %v3056_v43 = vsel %vm3019_vm15, %v3055_v46, %v3051_v17 }
 0xb1a   : > { %v3008_v4 = vpop.permute.xlu1 %3007  ;;  %v3069_v60 = vsel %vm2885_vm8, %v3056_v43, %v3068_v20 }
 0xb1b   : > { %v3064_v52 = vrot.slane %v3008_v4, %v6785_v35 }
 0xb1d   : > { %v3065_v34 = vsel %vm3019_vm15, %v3064_v52, %v3060_v11 }
 0xb1e   : > { %v2284_v7 = vpop.permute.xlu1 %2283  ;;  %v3070_v38 = vsel %vm2887_vm10, %v3065_v34, %v3069_v60 }
 0xb1f   : > { %v2301_v58 = vrot.slane %v2284_v7, %v6795_v32  ;;  %v3073_v23 = vsel %vm3072_vm11, %v3070_v38, 0.0  ;;  %vm7544_vm11 = vcmask 130112  }
 0xb20   : > { %3074 = vadd.xlane.f32.xlu0 %v3073_v23 }
 0xb21   : > { %v2304_v45 = vsel %vm2229_vm6, %v2301_v58, %v2303_v15 }
 0xb22   : > { %v2306_v22 = vsel %vm806_vm4, %v2304_v45, 0.0 }
 0xb23   : > { %2307 = vadd.xlane.f32.xlu1 %v2306_v22 }
 0xbad   : > { %v3075_v8 = vpop.xlane.xlu0 %3074 }
 0xbae   : > { %v3080_v54 = vrot.slane %v3075_v8, %v6016_v2  ;;  %v3084_v26 = vrot.slane %v3075_v8, %v6022_v5  ;;  %v3088_v46 = vrot.slane %v3075_v8, %v7462_v57  ;;  %v3092_v30 = vrot.slane %v3075_v8, %v7463_v51 }
 0xbaf   : > { %v3096_v43 = vrot.slane %v3075_v8, %v7464_v1  ;;  %v3100_v11 = vrot.slane %v3075_v8, %v2917_v31 }
 0xbb0   : > { %v2308_v9 = vpop.xlane.xlu1 %2307 }
 0xbb1   : > { %v2313_v53 = vrot.slane %v2308_v9, %v6016_v2  ;;  %v2317_v3 = vrot.slane %v2308_v9, %v6022_v5  ;;  %v2321_v61 = vrot.slane %v2308_v9, %v7462_v57  ;;  %v2325_v1 = vrot.slane %v2308_v9, %v7463_v51 }
 0xbb3   : > { %5503 = vrcp.f32 %v2313_v53 }
 0xbb4   : > { %5505 = vrcp.f32 %v2317_v3 }
 0xbb5   : > { %5507 = vrcp.f32 %v2321_v61 }
 0xbb6   : > { %5509 = vrcp.f32 %v3080_v54 }
 0xbb7   : > { %5511 = vrcp.f32 %v3084_v26 }
 0xbb8   : > { %5513 = vrcp.f32 %v3088_v46 }
 0xbb9   : > { %5515 = vrcp.f32 %v3092_v30 }
 0xbba   : > { %5517 = vrcp.f32 %v3096_v43 }
 0xbbb   : > { %5519 = vrcp.f32 %v3100_v11 }
 0xbbc   : > { %5521 = vrcp.f32 %v2325_v1 }
 0xbbd   : > { %v5504_v24 = vpop.eup %5503 }
 0xbbe   : > { %v5506_v17 = vpop.eup %5505  ;;  %v2331_v49 = vmul.f32 %v5504_v24, %v6721_v33 }
 0xbbf   : > { %v5508_v55 = vpop.eup %5507  ;;  %v2333_v13 = vmul.f32 %v5506_v17, %v6723_v41 }
 0xbc0   : > { %v5510_v18 = vpop.eup %5509  ;;  %2343 = vperm.xlu0 %5449, %v2331_v49   ;;  %v2335_v4 = vmul.f32 %v5508_v55, %v6767_v39 }
 0xbc1   : > { %2346 = vperm.xlu1 %5450, %v2333_v13   ;;  %v3109_v28 = vmul.f32 %v5510_v18, %v6731_v29  ;;  %v5512_v12 = vpop.eup %5511  ;;  %v3108_v33 = vmul.f32 %v5510_v18, %v6733_v59 }
 0xbc2   : > { %v3112_v41 = vmul.f32 %v5512_v12, %v6750_v27  ;;  %v5514_v52 = vpop.eup %5513  ;;  %v3111_v39 = vmul.f32 %v5512_v12, %v6741_v21 }
 0xbc3   : > { %v3115_v29 = vmul.f32 %v5514_v52, %v6757_v19  ;;  %v5516_v36 = vpop.eup %5515  ;;  %v3114_v31 = vmul.f32 %v5514_v52, %v6739_v47 }
 0xbc4   : > { %2349 = vperm.xlu0 %5449, %v2335_v4   ;;  %v3118_v59 = vmul.f32 %v5516_v36, %v6763_v56  ;;  %v5518_v27 = vpop.eup %5517  ;;  %v3117_v20 = vmul.f32 %v5516_v36, %v6748_v6  ;;  %v3867_v56 = vld [vmem:[%s531_s21] sm:$0x3f] }
 0xbc5   : > { %3141 = vperm.xlu1 %5450, %v3109_v28   ;;  %v3121_v34 = vmul.f32 %v5518_v27, %v6769_v40  ;;  %v5520_v60 = vpop.eup %5519  ;;  %v3120_v21 = vmul.f32 %v5518_v27, %v6755_v10  ;;  %v3868_v40 = vld [vmem:[%s531_s21 + $0x8] sm:$0x3f]  ;;  %v3869_v10 = vld [vmem:[%s531_s21 + $0x10] sm:$0x3f] }
 0xbc6   : > { %v3123_v19 = vmul.f32 %v5520_v60, %v6761_v42  ;;  %v5522_v7 = vpop.eup %5521  ;;  %v3124_v47 = vmul.f32 %v5520_v60, %v6773_v0  ;;  %v3870_v42 = vld [vmem:[%s531_s21 + $0x18] sm:$0x3f] }
 0xbc7   : > { %v2337_v6 = vmul.f32 %v5522_v7, %v6776_v25 }
 0xbc8   : > { %3138 = vperm.xlu0 %5449, %v3108_v33  }
 0xbc9   : > { %3147 = vperm.xlu1 %5450, %v3112_v41  }
 0xbcc   : > { %3144 = vperm.xlu0 %5449, %v3111_v39  }
 0xbcd   : > { %3153 = vperm.xlu1 %5450, %v3115_v29  }
 0xbd0   : > { %3150 = vperm.xlu0 %5449, %v3114_v31  }
 0xbd1   : > { %3159 = vperm.xlu1 %5450, %v3118_v59  }
 0xbd4   : > { %3156 = vperm.xlu0 %5449, %v3117_v20  }
 0xbd5   : > { %3165 = vperm.xlu1 %5450, %v3121_v34  }
 0xbd8   : > { %3162 = vperm.xlu0 %5449, %v3120_v21  }
 0xbd9   : > { %3168 = vperm.xlu1 %5450, %v3123_v19  }
 0xbdc   : > { %3171 = vperm.xlu0 %5449, %v3124_v47  }
 0xbdd   : > { %2352 = vperm.xlu1 %5450, %v2337_v6   ;;  %v7467_v6 = vld [vmem:[#allocation10_spill] sm:$0xff] }
 0xbe0   : > { %3956 = vperm.xlu0 %5449, %v3867_v56   ;;  %v7469_v56 = vld [vmem:[#allocation16_spill] sm:$0xff] }
 0xbe1   : > { %3961 = vperm.xlu1 %5450, %v3868_v40   ;;  %v7470_v40 = vld [vmem:[#allocation12_spill] sm:$0xff] }
 0xbe4   : > { %3966 = vperm.xlu0 %5449, %v3869_v10   ;;  %v7471_v10 = vld [vmem:[#allocation7_spill] sm:$0xff] }
 0xbe5   : > { %3971 = vperm.xlu1 %5450, %v3870_v42   ;;  %v7472_v42 = vld [vmem:[#allocation17_spill] sm:$0xff] }
 0xc3f   : > { %v2344_v38 = vpop.permute.xlu0 %2343 }
 0xc40   : > { %v2347_v62 = vpop.permute.xlu1 %2346  ;;  %v2357_v4 = vrot.slane %v2344_v38, %v6795_v32  ;;  %v7473_v38 = vld [vmem:[#allocation18_spill] sm:$0xff] }
 0xc41   : > { %v2361_v43 = vrot.slane %v2347_v62, %v6795_v32  ;;  %v7474_v62 = vld [vmem:[#allocation19_spill] sm:$0xff] }
 0xc43   : > { %v2350_v58 = vpop.permute.xlu0 %2349  ;;  %v2370_v27 = vsel %vm2225_vm14, %v2361_v43, %v2357_v4  ;;  %v7492_v43 = vld [vmem:[#allocation40_spill] sm:$0xff]  ;;  %v7493_v4 = vld [vmem:[#allocation33_spill] sm:$0xff] }
 0xc44   : > { %v3142_v0 = vpop.permute.xlu1 %3141  ;;  %v2365_v11 = vrot.slane %v2350_v58, %v6795_v32  ;;  %v7475_v58 = vld [vmem:[#allocation20_spill] sm:$0xff] }
 0xc45   : > { %v3180_v30 = vrot.slane %v3142_v0, %v6785_v35  ;;  %v7476_v0 = vld [vmem:[#allocation21_spill] sm:$0xff] }
 0xc46   : > { %v2371_v60 = vsel %vm2227_vm2, %v2365_v11, %v2370_v27  ;;  %v7496_v11 = vld [vmem:[#allocation36_spill] sm:$0xff] }
 0xc47   : > { %v3139_v23 = vpop.permute.xlu0 %3138 }
 0xc48   : > { %v3148_v15 = vpop.permute.xlu1 %3147  ;;  %v3176_v26 = vrot.slane %v3139_v23, %v6782_v50  ;;  %v7477_v23 = vld [vmem:[#allocation22_spill] sm:$0xff] }
 0xc49   : > { %v3189_v54 = vrot.slane %v3148_v15, %v6785_v35  ;;  %v7478_v15 = vld [vmem:[#allocation23_spill] sm:$0xff] }
 0xc4a   : > { %v3181_v33 = vsel %vm3019_vm15, %v3180_v30, %v3176_v26  ;;  %v7487_v30 = vld [vmem:[#allocation11_spill] sm:$0xff] }
 0xc4b   : > { %v3145_v45 = vpop.permute.xlu0 %3144 }
 0xc4c   : > { %v3154_v22 = vpop.permute.xlu1 %3153  ;;  %v3185_v53 = vrot.slane %v3145_v45, %v6782_v50  ;;  %v7479_v45 = vld [vmem:[#allocation24_spill] sm:$0xff] }
 0xc4d   : > { %v3198_v24 = vrot.slane %v3154_v22, %v6785_v35  ;;  %v7480_v22 = vld [vmem:[#allocation25_spill] sm:$0xff] }
 0xc4e   : > { %v3190_v49 = vsel %vm3019_vm15, %v3189_v54, %v3185_v53  ;;  %v7484_v53 = vld [vmem:[#allocation29_spill] sm:$0xff] }
 0xc4f   : > { %v3151_v9 = vpop.permute.xlu0 %3150  ;;  %v3227_v52 = vsel %vm2225_vm14, %v3190_v49, %v3181_v33  ;;  %v7497_v33 = vld [vmem:[#allocation38_spill] sm:$0xff] }
 0xc50   : > { %v3160_v25 = vpop.permute.xlu1 %3159  ;;  %v3194_v61 = vrot.slane %v3151_v9, %v6782_v50  ;;  %v7481_v9 = vld [vmem:[#allocation26_spill] sm:$0xff] }
 0xc51   : > { %v3207_v55 = vrot.slane %v3160_v25, %v6785_v35  ;;  %v7482_v25 = vld [vmem:[#allocation27_spill] sm:$0xff] }
 0xc52   : > { %v3199_v28 = vsel %vm3019_vm15, %v3198_v24, %v3194_v61 }
 0xc53   : > { %v3157_v8 = vpop.permute.xlu0 %3156  ;;  %v3228_v29 = vsel %vm2227_vm2, %v3199_v28, %v3227_v52  ;;  %v7494_v28 = vld [vmem:[#allocation35_spill] sm:$0xff] }
 0xc54   : > { %v3166_v3 = vpop.permute.xlu1 %3165  ;;  %v3203_v46 = vrot.slane %v3157_v8, %v6782_v50  ;;  %v7483_v8 = vld [vmem:[#allocation28_spill] sm:$0xff] }
 0xc55   : > { %v3216_v12 = vrot.slane %v3166_v3, %v6785_v35  ;;  %v7485_v3 = vmov 0.0|0.0  }
 0xc56   : > { %v3208_v41 = vsel %vm3019_vm15, %v3207_v55, %v3203_v46  ;;  %v7489_v55 = vld [vmem:[#allocation13_spill] sm:$0xff] }
 0xc57   : > { %v3163_v17 = vpop.permute.xlu0 %3162  ;;  %v3229_v20 = vsel %vm2229_vm6, %v3208_v41, %v3228_v29  ;;  %v7498_v41 = vld [vmem:[#allocation44_spill] sm:$0xff] }
 0xc58   : > { %v3169_v13 = vpop.permute.xlu1 %3168  ;;  %v3212_v18 = vrot.slane %v3163_v17, %v6782_v50  ;;  %v7486_v17 = vld [vmem:[#allocation9_spill] sm:$0xff] }
 0xc59   : > { %v3221_v36 = vrot.slane %v3169_v13, %v6782_v50  ;;  %v7465_v50 = vld [vmem:[#allocation8_spill] sm:$0xff]  ;;  %v7490_v13 = vld [vmem:[#allocation30_spill] sm:$0xff] }
 0xc5a   : > { %v3217_v1 = vsel %vm3019_vm15, %v3216_v12, %v3212_v18  ;;  %v6919_v18 = vld [vmem:[#allocation4 + $0x10] sm:$0xff]  ;;  %v7495_v12 = vld [vmem:[#allocation43_spill] sm:$0xff] }
 0xc5b   : > { %v3172_v39 = vpop.permute.xlu0 %3171  ;;  %v3230_v21 = vsel %vm2885_vm8, %v3217_v1, %v3229_v20  ;;  %7491 = vst [vmem:[#allocation53_spill] sm:$0xff] %v6919_v18  ;;  %v7499_v1 = vld [vmem:[#allocation31_spill] sm:$0xff] }
 0xc5c   : > { %v2353_v31 = vpop.permute.xlu1 %2352  ;;  %v3225_v59 = vrot.slane %v3172_v39, %v6785_v35  ;;  %v7466_v35 = vmov 0.0  }
 0xc5d   : > { %v2369_v34 = vrot.slane %v2353_v31, %v6795_v32  ;;  %v7468_v32 = vld [vmem:[#allocation15_spill] sm:$0xff] }
 0xc5e   : > { %v3226_v19 = vsel %vm3019_vm15, %v3225_v59, %v3221_v36  ;;  %v7500_v36 = vld [vmem:[#allocation32_spill] sm:$0xff] }
 0xc5f   : > { %v2372_v7 = vsel %vm2229_vm6, %v2369_v34, %v2371_v60  ;;  %v3231_v47 = vsel %vm2887_vm10, %v3226_v19, %v3230_v21 }
 0xc60   : > { %5192 = vmatmul.mubr.msk.f32.vlgmr.msra.gmra.mrb[28].mxu0 %vm820_vm5, %v2372_v7  ;;  %5197 = vmatmul.mubr.msk.f32.vlgmr.msra.gmra.mrb[30].mxu1 %vm1329_vm12, %v3231_v47  ;;  %v7501_v47 = vld [vmem:[#allocation34_spill] sm:$0xff] }
 0xc61   : > { %5300 = vmatpush1.bf16.msra.mxu0 %v7465_v50  ;;  %3389 = vmatprep.mubr.f32.mxu0 %v7466_v35 }
 0xc62   : > { %5302 = vmatprep.subr.bf16.mxu0 %v7467_v6  ;;  %5316 = vmatpush3.bf16.msra.mxu1 %v7468_v32 }
 0xc63   : > { %5318 = vmatprep.subr.bf16.mxu1 %v7469_v56 }
 0xc65   : > { %5304 = vmatpush1.bf16.msra.mxu0 %v7470_v40 }
 0xc66   : > { %5306 = vmatprep.subr.bf16.mxu0 %v7471_v10  ;;  %5320 = vmatpush3.bf16.msra.mxu1 %v7472_v42 }
 0xc67   : > { %5322 = vmatprep.subr.bf16.mxu1 %v7473_v38 }
 0xc6a   : > { %5324 = vmatpush3.bf16.msra.mxu1 %v7474_v62 }
 0xc6b   : > { %5326 = vmatprep.subr.bf16.mxu1 %v7475_v58 }
 0xc6e   : > { %5328 = vmatpush3.bf16.msra.mxu1 %v7476_v0 }
 0xc6f   : > { %5330 = vmatprep.subr.bf16.mxu1 %v7477_v23 }
 0xc72   : > { %5332 = vmatpush3.bf16.msra.mxu1 %v7478_v15 }
 0xc73   : > { %5334 = vmatprep.subr.bf16.mxu1 %v7479_v45 }
 0xc76   : > { %5336 = vmatpush3.bf16.msra.mxu1 %v7480_v22 }
 0xc77   : > { %5338 = vmatprep.subr.bf16.mxu1 %v7481_v9 }
 0xc7a   : > { %5340 = vmatpush3.bf16.msra.mxu1 %v7482_v25 }
 0xc7b   : > { %5342 = vmatprep.subr.bf16.mxu1 %v7483_v8 }
 0xc7e   : > { %5344 = vmatpush3.bf16.msra.mxu1 %v7484_v53 }
 0xc7f   : > { %5361 = vmatprep.subr.bf16.mxu1 %v7485_v3 }
 0xd33   : > { %v2445_v61 = vpop.f32.mrb[28].mxu0  ;;  %v3308_v54 = vpop.f32.mrb[30].mxu1 }
 0xd34   : > { %2449 = vst.msk [vmem:[#allocation4] sm:$0xf] %vm897_vm7, %v2445_v61  ;;  %v5193_v26 = vpop.f32.mrb[29].mxu0  ;;  %v5198_v46 = vpop.f32.mrb[31].mxu1 }
 0xd35   : > { %3312 = vst.msk [vmem:[#allocation4 + $0x4] sm:$0x3f] %vm1068_vm13, %v3308_v54 }
 0xd3c   : > { %v3313_v24 = vld [vmem:[#allocation4] sm:$0xff]  ;;  %v6912_v49 = vld [vmem:[#allocation4 + $0x8] sm:$0xff] }
 0xd3d   : > { %4922 = vmatmul.mubr.msk.f32.vlgmr.msra.gmra.mrb[30].mxu0 %vm622_vm1, %v3313_v24  ;;  %7488 = vst [vmem:[#allocation51_spill] sm:$0xff] %v6912_v49 }
 0xd3e   : > { %5308 = vmatpush1.bf16.msra.mxu0 %v7486_v17  ;;  %3395 = vmatprep.mubr.f32.mxu0 %v7466_v35 }
 0xd3f   : > { %5310 = vmatprep.subr.bf16.mxu0 %v7487_v30 }
 0xd41   : > { %4923 = vmatmul.mubr.msk.f32.gmra.mrb[32].mxu0 %vm622_vm1, %v6912_v49 }
 0xd42   : > { %5312 = vmatpush1.bf16.msra.mxu0 %v7489_v55  ;;  %3401 = vmatprep.mubr.f32.mxu0 %v7466_v35 }
 0xd43   : > { %5346 = vmatprep.subr.bf16.mxu0 %v7490_v13  ;;  %v7502_v13 = vld [vmem:[#allocation37_spill] sm:$0xff] }
 0xd45   : > { %4924 = vmatmul.mubr.msk.f32.gmra.mrb[34].mxu0 %vm622_vm1, %v6919_v18 }
 0xd46   : > { %3472 = vmatprep.mubr.f32.mxu0 %v7466_v35 }
 0xd49   : > { %4925 = vmatmul.mubr.msk.f32.vlgmr.msra.gmra.mrb[30].mxu0 %vm622_vm1, %v7492_v43 }
 0xd4a   : > { %3478 = vmatprep.mubr.f32.mxu0 %v7466_v35  ;;  %5348 = vmatpush1.bf16.msra.mxu0 %v7493_v4 }
 0xd4b   : > { %5350 = vmatprep.subr.bf16.mxu0 %v7494_v28  ;;  %v7503_v28 = vld [vmem:[#allocation6_spill] sm:$0xff] }
 0xd4d   : > { %4926 = vmatmul.mubr.msk.f32.gmra.mrb[32].mxu0 %vm622_vm1, %v7495_v12 }
 0xd4e   : > { %3484 = vmatprep.mubr.f32.mxu0 %v7466_v35  ;;  %5352 = vmatpush1.bf16.msra.mxu0 %v7496_v11 }
 0xd4f   : > { %5354 = vmatprep.subr.bf16.mxu0 %v7497_v33 }
 0xd51   : > { %4927 = vmatmul.mubr.msk.f32.gmra.mrb[34].mxu0 %vm622_vm1, %v7498_v41 }
 0xd52   : > { %3662 = vmatprep.mubr.f32.mxu0 %v7466_v35 }
 0xe1c   : > { %v3474_v52 = vpop.f32.mrb[30].mxu0 }
 0xe1d   : > { %v3491_v39 = vadd.f32 %v3474_v52, %v7499_v1  ;;  %v3476_v29 = vpop.f32.mrb[31].mxu0 }
 0xe1e   : > { %v3492_v31 = vadd.f32 %v3476_v29, %v7500_v36 }
 0xe1f   : > { %v3497_v20 = vmax.f32 %v3491_v39, 0.0 }
 0xe20   : > { %v3498_v59 = vmax.f32 %v3492_v31, 0.0  ;;  %v3480_v27 = vpop.f32.mrb[32].mxu0  ;;  %v6953_v31 = vld [vmem:[%s7270_s12] ss:$0 sm:$0xff] }
 0xe21   : > { %v3493_v34 = vadd.f32 %v3480_v27, %v7499_v1  ;;  %v3482_v60 = vpop.f32.mrb[33].mxu0  ;;  %7504 = vst [vmem:[#allocation45_spill] sm:$0xff] %v6953_v31 }
 0xe22   : > { %v3494_v21 = vadd.f32 %v3482_v60, %v7500_v36  ;;  %3567 = vmatprep.mubr.f32.mxu1 %v3498_v59 }
 0xe23   : > { %3568 = vmatmul.mubr.f32.vlgmr.msra.gmra.mrb[32].mxu1 %v3497_v20  ;;  %v3499_v61 = vmax.f32 %v3493_v34, 0.0 }
 0xe24   : > { %v3500_v19 = vmax.f32 %v3494_v21, 0.0  ;;  %v3486_v7 = vpop.f32.mrb[34].mxu0  ;;  %5363 = vmatpush3.bf16.msra.mxu1 %v7501_v47  ;;  %v7509_v47 = vld [vmem:[#allocation42_spill] sm:$0xff] }
 0xe25   : > { %v3495_v54 = vadd.f32 %v3486_v7, %v7499_v1  ;;  %v3488_v26 = vpop.f32.mrb[35].mxu0  ;;  %5364 = vmatprep.subr.bf16.mxu1 %v7485_v3 }
 0xe26   : > { %v3496_v46 = vadd.f32 %v3488_v26, %v7500_v36  ;;  %3572 = vmatprep.mubr.f32.mxu1 %v3500_v19 }
 0xe27   : > { %3573 = vmatmul.mubr.f32.gmra.mrb[34].mxu1 %v3499_v61  ;;  %v3501_v4 = vmax.f32 %v3495_v54, 0.0 }
 0xe28   : > { %v3502_v24 = vmax.f32 %v3496_v46, 0.0  ;;  %5366 = vmatpush3.bf16.msra.mxu1 %v7502_v13 }
 0xe29   : > { %5368 = vmatprep.subr.bf16.mxu1 %v7503_v28 }
 0xe2a   : > { %3577 = vmatprep.mubr.f32.mxu1 %v3502_v24  ;;  %v7513_v24 = vld [vmem:[#allocation48_spill] sm:$0xff] }
 0xe2b   : > { %3578 = vmatmul.mubr.f32.gmra.mrb[36].mxu1 %v3501_v4  ;;  %v3957_v4 = vpop.permute.xlu0 %3956 }
 0xe2c   : > { %5207 = vmatprep.mubr.msk.f32.mxu1 %vm5557_vm0, %v7466_v35 }
 0xef6   : > { %v5056_v11 = vpop.f32.mrb[32].mxu1 }
 0xef7   : > { %v5057_v33 = vpop.f32.mrb[33].mxu1 }
 0xef8   : > { %v5058_v52 = vadd.f32 %v5057_v33, %v5056_v11 }
 0xefa   : > { %v3583_v3 = vadd.f32 %v5058_v52, %v7492_v43  ;;  %v5059_v39 = vpop.f32.mrb[34].mxu1  ;;  %v7506_v43 = vld [vmem:[#allocation39_spill] sm:$0xff] }
 0xefb   : > { %v5060_v29 = vpop.f32.mrb[35].mxu1 }
 0xefc   : > { %v6956_v59 = vadd.f32 %v6953_v31, %v3583_v3  ;;  %v5061_v27 = vadd.f32 %v5060_v29, %v5059_v39 }
 0xefe   : > { %7505 = vst [vmem:[#allocation8_spill] sm:$0xff] %v6956_v59  ;;  %v3584_v20 = vadd.f32 %v5061_v27, %v7495_v12  ;;  %v5062_v34 = vpop.f32.mrb[36].mxu1  ;;  %4928 = vmatmul.mubr.msk.f32.vlgmr.msra.gmra.mrb[36].mxu0 %vm622_vm1, %v6956_v59  ;;  %5208 = vmatmul.mubr.msk.f32.vlgmr.msra.gmra.mrb[38].mxu1 %vm622_vm1, %v6956_v59  ;;  %v7508_v12 = vld [vmem:[#allocation41_spill] sm:$0xff]  ;;  %v3962_v27 = vpop.permute.xlu1 %3961 }
 0xeff   : > { %5356 = vmatpush1.bf16.msra.mxu0 %v7506_v43  ;;  %v5063_v60 = vpop.f32.mrb[37].mxu1  ;;  %3668 = vmatprep.mubr.f32.mxu0 %v7466_v35 }
 0xf00   : > { %v6966_v21 = vadd.f32 %v6953_v31, %v3584_v20  ;;  %v5064_v19 = vadd.f32 %v5063_v60, %v5062_v34  ;;  %5210 = vmatprep.mubr.msk.f32.mxu1 %vm5557_vm0, %v7466_v35  ;;  %5358 = vmatprep.subr.bf16.mxu0 %v7508_v12  ;;  %v3967_v12 = vpop.permute.xlu0 %3966 }
 0xf01   : > { %5370 = vmatpush1.bf16.msra.mxu1 %v7465_v50 }
 0xf02   : > { %7507 = vst [vmem:[#allocation10_spill] sm:$0xff] %v6966_v21  ;;  %v3585_v7 = vadd.f32 %v5064_v19, %v7498_v41  ;;  %4929 = vmatmul.mubr.msk.f32.gmra.mrb[38].mxu0 %vm622_vm1, %v6966_v21  ;;  %5211 = vmatmul.mubr.msk.f32.gmra.mrb[40].mxu1 %vm622_vm1, %v6966_v21  ;;  %v7512_v41 = vld [vmem:[#allocation47_spill] sm:$0xff] }
 0xf03   : > { %5360 = vmatpush1.bf16.msra.mxu0 %v7509_v47  ;;  %3674 = vmatprep.mubr.f32.mxu0 %v7466_v35  ;;  %v7514_v47 = vld [vmem:[#allocation49_spill] sm:$0xff] }
 0xf04   : > { %v6980_v61 = vadd.f32 %v6953_v31, %v3585_v7  ;;  %5213 = vmatprep.mubr.msk.f32.mxu1 %vm5557_vm0, %v7466_v35  ;;  %5216 = vmatprep.subr.mxu0 %v7466_v35 }
 0xf05   : > { %5372 = vmatprep.subr.bf16.mxu1 %v7467_v6 }
 0xf06   : > { %7510 = vst [vmem:[#allocation15_spill] sm:$0xff] %v6980_v61  ;;  %4930 = vmatmul.mubr.msk.f32.gmra.mrb[40].mxu0 %vm622_vm1, %v6980_v61  ;;  %5214 = vmatmul.mubr.msk.f32.gmra.mrb[42].mxu1 %vm622_vm1, %v6980_v61 }
 0xf07   : > { %3745 = vmatprep.mubr.f32.mxu0 %v7466_v35  ;;  %5374 = vmatpush1.bf16.msra.mxu1 %v7470_v40  ;;  %v7511_v40 = vld [vmem:[#allocation46_spill] sm:$0xff] }
 0xf08   : > { %4539 = vmatprep.mubr.f32.mxu1 %v7466_v35  ;;  %5376 = vmatprep.subr.bf16.mxu1 %v7471_v10 }
 0xf0a   : > { %4931 = vmatmul.mubr.msk.f32.vlgmr.msra.gmra.mrb[42].mxu0 %vm622_vm1, %v6956_v59 }
 0xf0b   : > { %3751 = vmatprep.mubr.f32.mxu0 %v7466_v35 }
 0xf0e   : > { %4932 = vmatmul.mubr.msk.f32.gmra.mrb[44].mxu0 %vm622_vm1, %v6966_v21 }
 0xf0f   : > { %3757 = vmatprep.mubr.f32.mxu0 %v7466_v35 }
 0xf12   : > { %4933 = vmatmul.mubr.msk.f32.gmra.mrb[46].mxu0 %vm622_vm1, %v6980_v61 }
 0xf13   : > { %5218 = vmatprep.mubr.msk.f32.mxu0 %vm5557_vm0, %v7466_v35  ;;  %vm4054_vm0 = vcmask 1047556  }
 0xfd1   : > { %v3664_v50 = vpop.f32.mrb[36].mxu0  ;;  %v3830_v6 = vpop.f32.mrb[38].mxu1 }
 0xfd2   : > { %v3665_v10 = vadd.f32 %v3664_v50, %v7511_v40  ;;  %v3831_v54 = vadd.f32 %v3830_v6, %v7512_v41  ;;  %v3666_v26 = vpop.f32.mrb[37].mxu0  ;;  %v5209_v46 = vpop.f32.mrb[39].mxu1  ;;  %v7015_v50 = vmul.f32 %v3957_v4, %v7514_v47 }
 0xfd3   : > { %v3667_v13 = vadd.f32 %v3666_v26, %v7513_v24  ;;  %v3972_v46 = vpop.permute.xlu1 %3971 }
 0xfd4   : > { %3844 = vst [vmem:[#allocation3] sm:$0xff] %v3665_v10  ;;  %3848 = vst.msk [vmem:[#allocation3 + $0x20] sm:$0xff] %vm622_vm1, %v3831_v54  ;;  %v7018_v10 = vmul.f32 %v3962_v27, %v7514_v47  ;;  %v7515_v54 = vld [vmem:[#allocation50_spill] sm:$0xff] }
 0xfd5   : > { %3845 = vst [vmem:[#allocation3 + $0x8] sm:$0xff] %v3667_v13  ;;  %v3670_v28 = vpop.f32.mrb[38].mxu0  ;;  %v3835_v11 = vpop.f32.mrb[40].mxu1  ;;  %v7021_v26 = vmul.f32 %v3957_v4, %v7515_v54 }
 0xfd6   : > { %v3671_v33 = vadd.f32 %v3670_v28, %v7511_v40  ;;  %v3836_v52 = vadd.f32 %v3835_v11, %v7512_v41  ;;  %v3672_v3 = vpop.f32.mrb[39].mxu0  ;;  %v5212_v39 = vpop.f32.mrb[41].mxu1  ;;  %v7517_v28 = vld [vmem:[#allocation52_spill] sm:$0xff]  ;;  %v7522_v61 = vrot.slane %v7018_v10, 4 }
 0xfd7   : > { %v3673_v29 = vadd.f32 %v3672_v3, %v7513_v24  ;;  %v7516_v24 = vld [vmem:[#allocation54_spill] sm:$0xff]  ;;  %v7032_v3 = vmul.f32 %v3967_v12, %v7515_v54  ;;  %v7518_v39 = vld [vmem:[#allocation55_spill] sm:$0xff]  ;;  %v7523_v18 = vrot.slane %v7021_v26, 4 }
 0xfd8   : > { %3849 = vst [vmem:[#allocation3 + $0x28] sm:$0xff] %v3671_v33  ;;  %3853 = vst.msk [vmem:[#allocation3 + $0x48] sm:$0xff] %vm622_vm1, %v3836_v52  ;;  %v7026_v33 = vmul.f32 %v3962_v27, %v7515_v54  ;;  %v7029_v52 = vmul.f32 %v3967_v12, %v7514_v47  ;;  %v7040_v27 = vmul.f32 %v3972_v46, %v7515_v54  ;;  %v7519_v12 = vld [vmem:[#allocation14_spill] sm:$0xff] }
 0xfd9   : > { %3850 = vst [vmem:[#allocation3 + $0x30] sm:$0xff] %v3673_v29  ;;  %v3676_v20 = vpop.f32.mrb[40].mxu0  ;;  %v3840_v34 = vpop.f32.mrb[42].mxu1  ;;  %v7524_v55 = vrot.slane %v7032_v3, 4 }
 0xfda   : > { %v3841_v43 = vadd.f32 %v3840_v34, %v7512_v41  ;;  %v3678_v60 = vpop.f32.mrb[41].mxu0  ;;  %v5215_v19 = vpop.f32.mrb[43].mxu1 }
 0xfdb   : > { %v3865_v40 = vld [vmem:[#allocation3 + $0x20] sm:$0xf0]  ;;  %v7037_v19 = vmul.f32 %v3972_v46, %v7514_v47 }
 0xfdc   : > { %3858 = vst.msk [vmem:[#allocation3 + $0x70] sm:$0xff] %vm622_vm1, %v3841_v43  ;;  %v5454_v7 = vld [vmem:[#allocation3] ss:$8 sps:$4 sm:$0xff]   ;;  %v4377_v4 = vrot.slane %v3865_v40, 4 }
 0xfdd   : > { %v3747_v6 = vpop.f32.mrb[42].mxu0  ;;  %v3880_v11 = vrot.slane %v5454_v7, %v7517_v28 }
 0xfde   : > { %v3748_v41 = vadd.f32 %v3747_v6, %v7516_v24  ;;  %v3749_v13 = vpop.f32.mrb[43].mxu0 }
 0xfdf   : > { %v3750_v29 = vadd.f32 %v3749_v13, %v7518_v39  ;;  %v3866_v20 = vld [vmem:[#allocation3 + $0x48] sm:$0x3]  ;;  %v3888_v43 = vrot.slane %v3880_v11, %v7517_v28  ;;  %v3881_v60 = vcombine.high %v3880_v11, %v3880_v11 }
 0xfe0   : > { %3846 = vst [vmem:[#allocation3 + $0x10] sm:$0xff] %v3748_v41  ;;  %v4378_v34 = vrot.slane %v3866_v20, 4 }
 0xfe1   : > { %3847 = vst [vmem:[#allocation3 + $0x18] sm:$0xff] %v3750_v29  ;;  %v3753_v7 = vpop.f32.mrb[44].mxu0  ;;  %v3896_v47 = vcombine.high %v3888_v43, %v3888_v43  ;;  %v3895_v11 = vrot.slane %v3881_v60, %v7517_v28 }
 0xfe2   : > { %v3754_v6 = vadd.f32 %v3753_v7, %v7516_v24  ;;  %v3755_v13 = vpop.f32.mrb[45].mxu0  ;;  %v4379_v41 = vsel %vm824_vm3, %v4377_v4, %v4378_v34  ;;  %v3905_v4 = vrot.slane %v3888_v43, %v6022_v5  ;;  %vm7529_vm3 = vcmask 1041408  }
 0xfe3   : > { %v3756_v20 = vadd.f32 %v3755_v13, %v7518_v39  ;;  %5217 = vmatpush3.msk.msra.mxu0 %vm995_vm9, %v4379_v41  ;;  %v3901_v41 = vrot.slane %v3888_v43, %v6016_v2  ;;  %v7059_v46 = vrot.slane %v3896_v47, %v6016_v2  ;;  %v3909_v7 = vrot.slane %v3895_v11, %v6016_v2  ;;  %vm7531_vm4 = vmmov %vm7529_vm3 }
 0xfe4   : > { %3851 = vst [vmem:[#allocation3 + $0x38] sm:$0xff] %v3754_v6  ;;  %5384 = vmatprep.subr.bf16.mxu0 %v7519_v12  ;;  %v3897_v6 = vcombine.high %v3895_v11, %v3895_v11  ;;  %v3913_v34 = vrot.slane %v3895_v11, %v6022_v5  ;;  %v7520_v43 = vrot.slane %v7015_v50, 4  ;;  %v7521_v11 = vrot.slane %v7029_v52, 4  ;;  %vm7538_vm5 = vmmov %vm7529_vm3 }
 0xfe5   : > { %3852 = vst [vmem:[#allocation3 + $0x40] sm:$0xff] %v3756_v20  ;;  %v3759_v13 = vpop.f32.mrb[46].mxu0  ;;  %v3921_v20 = vrot.slane %v3896_v47, %v6022_v5  ;;  %vm7539_vm9 = vmmov %vm7529_vm3 }
 0xfe6   : > { %v3760_v28 = vadd.f32 %v3759_v13, %v7516_v24  ;;  %v3761_v60 = vpop.f32.mrb[47].mxu0  ;;  %v7068_v31 = vrot.slane %v3897_v6, %v6016_v2  ;;  %vm7540_vm12 = vmmov %vm7529_vm3 }
 0xfe7   : > { %v3762_v12 = vadd.f32 %v3761_v60, %v7518_v39  ;;  %v3861_v40 = vld [vmem:[#allocation3 + $0x10] sm:$0xf0]  ;;  %v7071_v60 = vrot.slane %v3897_v6, %v6022_v5  ;;  %v7525_v6 = vrot.slane %v7026_v33, 4  ;;  %vm7541_vm13 = vmmov %vm7529_vm3 }
 0xfe8   : > { %3856 = vst [vmem:[#allocation3 + $0x60] sm:$0xff] %v3760_v28  ;;  %v3862_v54 = vld [vmem:[#allocation3 + $0x18] sm:$0xf0]  ;;  %v3938_v29 = vadd.f32 %v3901_v41, %v3861_v40  ;;  %v3946_v24 = vadd.f32 %v7059_v46, %v3861_v40  ;;  %v3942_v13 = vadd.f32 %v3909_v7, %v3861_v40  ;;  %v3950_v59 = vadd.f32 %v7068_v31, %v3861_v40  ;;  %vm7542_vm8 = vmmov %vm7529_vm3 }
 0xfe9   : > { %3857 = vst [vmem:[#allocation3 + $0x68] sm:$0xff] %v3762_v12  ;;  %v3939_v36 = vadd.f32 %v3905_v4, %v3862_v54  ;;  %v3947_v1 = vadd.f32 %v3921_v20, %v3862_v54  ;;  %v3943_v39 = vadd.f32 %v3913_v34, %v3862_v54  ;;  %vm7543_vm15 = vmmov %vm7529_vm3 }
 0xfea   : > { %v4006_v47 = vadd.f32 %v7520_v43, %v3938_v29  ;;  %v4014_v28 = vadd.f32 %v7521_v11, %v3946_v24  ;;  %v4010_v21 = vadd.f32 %v7522_v61, %v3942_v13  ;;  %v3951_v29 = vadd.f32 %v7071_v60, %v3862_v54 }
 0xfeb   : > { %v4007_v12 = vadd.f32 %v7523_v18, %v3939_v36  ;;  %v4015_v49 = vadd.f32 %v7524_v55, %v3947_v1  ;;  %v4011_v30 = vadd.f32 %v7525_v6, %v3943_v39  ;;  %v3863_v35 = vld [vmem:[#allocation3 + $0x38] sm:$0x3]  ;;  %v7526_v1 = vrot.slane %v7015_v50, 4 }
 0xfec   : > { %v4022_v43 = vmax.f32 %v4006_v47, 0.0  ;;  %v4030_v17 = vmax.f32 %v4014_v28, 0.0  ;;  %v4026_v24 = vmax.f32 %v4010_v21, 0.0  ;;  %v3864_v11 = vld [vmem:[#allocation3 + $0x40] sm:$0x3]  ;;  %v3940_v53 = vadd.f32 %v3901_v41, %v3863_v35 }
 0xfed   : > { %v4023_v61 = vmax.f32 %v4007_v12, 0.0  ;;  %v4031_v13 = vmax.f32 %v4015_v49, 0.0  ;;  %v4027_v40 = vmax.f32 %v4011_v30, 0.0  ;;  %v3941_v8 = vadd.f32 %v3905_v4, %v3864_v11 }
 0xfee   : > { %v4038_v18 = vmul.f32 %v4022_v43, %v6348_v48  ;;  %v4046_v36 = vmul.f32 %v4030_v17, %v6348_v48  ;;  %v4042_v55 = vmul.f32 %v4026_v24, %v6348_v48  ;;  %v4008_v39 = vadd.f32 %v7526_v1, %v3940_v53 }
 0xfef   : > { %v4039_v54 = vmul.f32 %v4023_v61, %v6353_v16  ;;  %v4047_v47 = vmul.f32 %v4031_v13, %v6353_v16  ;;  %v4043_v21 = vmul.f32 %v4027_v40, %v6353_v16  ;;  %v7527_v41 = vrot.slane %v7021_v26, 4 }
 0xff0   : > { %v4055_v30 = vsel %vm4054_vm0, %v4038_v18, 0.0  ;;  %v4075_v4 = vsel %vm4054_vm0, %v4046_v36, 0.0  ;;  %v4065_v17 = vsel %vm4054_vm0, %v4042_v55, 0.0  ;;  %v4024_v28 = vmax.f32 %v4008_v39, 0.0 }
 0xff1   : > { %v4009_v49 = vadd.f32 %v7527_v41, %v3941_v8  ;;  %v4056_v12 = vsel %vm4054_vm0, %v4039_v54, 0.0  ;;  %v4076_v53 = vsel %vm4054_vm0, %v4047_v47, 0.0  ;;  %v4066_v50 = vsel %vm4054_vm0, %v4043_v21, 0.0 }
 0xff2   : > { %v4057_v43 = vadd.f32 %v4056_v12, %v4055_v30  ;;  %v4077_v24 = vadd.f32 %v4076_v53, %v4075_v4  ;;  %v4067_v61 = vadd.f32 %v4066_v50, %v4065_v17  ;;  %v4040_v26 = vmul.f32 %v4024_v28, %v6348_v48 }
 0xff3   : > { %v4025_v6 = vmax.f32 %v4009_v49, 0.0  ;;  %v3944_v13 = vadd.f32 %v3909_v7, %v3863_v35  ;;  %v3945_v40 = vadd.f32 %v3913_v34, %v3864_v11  ;;  %v7528_v18 = vrot.slane %v7037_v19, 4 }
 0xff4   : > { %4058 = vadd.xlane.f32.xlu0 %v4057_v43  ;;  %4078 = vadd.xlane.f32.xlu1 %v4077_v24  ;;  %v4060_v55 = vsel %vm7529_vm3, %v4040_v26, 0.0  ;;  %v7530_v1 = vrot.slane %v7040_v27, 4  ;;  %v3948_v54 = vadd.f32 %v7059_v46, %v3863_v35  ;;  %v3949_v47 = vadd.f32 %v3921_v20, %v3864_v11 }
 0xff5   : > { %v4041_v8 = vmul.f32 %v4025_v6, %v6353_v16  ;;  %v4018_v36 = vadd.f32 %v7528_v18, %v3950_v59  ;;  %v7532_v41 = vrot.slane %v7018_v10, 4  ;;  %v7533_v7 = vrot.slane %v7026_v33, 4 }
 0xff6   : > { %v4019_v39 = vadd.f32 %v7530_v1, %v3951_v29  ;;  %v7534_v17 = vrot.slane %v7029_v52, 4  ;;  %v7535_v12 = vrot.slane %v7032_v3, 4  ;;  %v3952_v50 = vadd.f32 %v7068_v31, %v3863_v35 }
 0xff7   : > { %v4061_v21 = vsel %vm7531_vm4, %v4041_v8, 0.0  ;;  %v4012_v49 = vadd.f32 %v7532_v41, %v3944_v13  ;;  %v4013_v34 = vadd.f32 %v7533_v7, %v3945_v40  ;;  %v4034_v30 = vmax.f32 %v4018_v36, 0.0 }
 0xff8   : > { %v4062_v59 = vadd.f32 %v4061_v21, %v4060_v55  ;;  %v4035_v4 = vmax.f32 %v4019_v39, 0.0  ;;  %v4016_v28 = vadd.f32 %v7534_v17, %v3948_v54  ;;  %v4017_v29 = vadd.f32 %v7535_v12, %v3949_v47  ;;  %4068 = vadd.xlane.f32.xlu0 %v4067_v61 }
 0xff9   : > { %v4028_v53 = vmax.f32 %v4012_v49, 0.0  ;;  %v4029_v46 = vmax.f32 %v4013_v34, 0.0  ;;  %v4050_v20 = vmul.f32 %v4034_v30, %v6348_v48  ;;  %v3953_v43 = vadd.f32 %v7071_v60, %v3864_v11 }
 0xffa   : > { %4063 = vadd.xlane.f32.xlu1 %v4062_v59  ;;  %v4051_v10 = vmul.f32 %v4035_v4, %v6353_v16  ;;  %v4032_v33 = vmax.f32 %v4016_v28, 0.0  ;;  %v4033_v6 = vmax.f32 %v4017_v29, 0.0  ;;  %v7536_v26 = vmov %v7528_v18 }
 0xffb   : > { %v4044_v52 = vmul.f32 %v4028_v53, %v6348_v48  ;;  %v4045_v24 = vmul.f32 %v4029_v46, %v6353_v16  ;;  %v4085_v3 = vsel %vm4054_vm0, %v4050_v20, 0.0  ;;  %v4020_v8 = vadd.f32 %v7536_v26, %v3952_v50 }
 0xffc   : > { %v4086_v13 = vsel %vm4054_vm0, %v4051_v10, 0.0  ;;  %v4048_v35 = vmul.f32 %v4032_v33, %v6348_v48  ;;  %v4049_v31 = vmul.f32 %v4033_v6, %v6353_v16  ;;  %v7537_v61 = vmov %v7530_v1  ;;  %vm7545_vm0 = vmmov %vm7544_vm11 }
 0xffd   : > { %v4021_v40 = vadd.f32 %v7537_v61, %v3953_v43  ;;  %v4070_v60 = vsel %vm7538_vm5, %v4044_v52, 0.0  ;;  %v4071_v11 = vsel %vm7539_vm9, %v4045_v24, 0.0  ;;  %v4087_v18 = vadd.f32 %v4086_v13, %v4085_v3  ;;  %vm7546_vm3 = vmmov %vm7545_vm0 }
 0xffe   : > { %v4036_v36 = vmax.f32 %v4020_v8, 0.0  ;;  %v4072_v55 = vadd.f32 %v4071_v11, %v4070_v60  ;;  %v4080_v19 = vsel %vm7540_vm12, %v4048_v35, 0.0  ;;  %v4081_v39 = vsel %vm7541_vm13, %v4049_v31, 0.0  ;;  %vm7547_vm5 = vmmov %vm7545_vm0 }
 0xfff   : > { %v4037_v1 = vmax.f32 %v4021_v40, 0.0  ;;  %4088 = vadd.xlane.f32.xlu1 %v4087_v18  ;;  %v4082_v27 = vadd.f32 %v4081_v39, %v4080_v19  ;;  %vm4143_vm4 = vcmask 76832   ;;  %vm4234_vm9 = vcmask 97312  }
0x1000   : > { %v4052_v54 = vmul.f32 %v4036_v36, %v6348_v48  ;;  %4073 = vadd.xlane.f32.xlu0 %v4072_v55  ;;  %vm4267_vm12 = vcmask 44032   ;;  %vm4455_vm13 = vcmask 1046534  }
0x1001   : > { %v4053_v47 = vmul.f32 %v4037_v1, %v6353_v16 }
0x1002   : > { %v4090_v21 = vsel %vm7542_vm8, %v4052_v54, 0.0  ;;  %vm4457_vm8 = vcmask 1047559  }
0x1003   : > { %v4091_v41 = vsel %vm7543_vm15, %v4053_v47, 0.0  ;;  %vm4460_vm15 = vcmask 48132  }
0x1004   : > { %4083 = vadd.xlane.f32.xlu0 %v4082_v27  ;;  %v4092_v49 = vadd.f32 %v4091_v41, %v4090_v21 }
0x1008   : > { %4093 = vadd.xlane.f32.xlu0 %v4092_v49 }
0x1081   : > { %v4059_v7 = vpop.xlane.xlu0 %4058  ;;  %v4079_v34 = vpop.xlane.xlu1 %4078 }
0x1082   : > { %v4124_v29 = vrot.slane %v4079_v34, %v6638_v14  ;;  %v4106_v46 = vrot.slane %v4059_v7, %v6638_v14 }
0x1085   : > { %v4069_v30 = vpop.xlane.xlu0 %4068 }
0x1086   : > { %v4115_v16 = vrot.slane %v4069_v30, %v6638_v14 }
0x1087   : > { %v4064_v59 = vpop.xlane.xlu1 %4063 }
0x1088   : > { %v4110_v48 = vrot.slane %v4064_v59, %v6641_v44 }
0x108a   : > { %v4111_v33 = vsel %vm7546_vm3, %v4110_v48, %v4106_v46 }
0x108c   : > { %v4089_v53 = vpop.xlane.xlu1 %4088 }
0x108d   : > { %v4074_v4 = vpop.xlane.xlu0 %4073  ;;  %v4133_v6 = vrot.slane %v4089_v53, %v6638_v14 }
0x108e   : > { %v4119_v17 = vrot.slane %v4074_v4, %v6641_v44 }
0x1090   : > { %v4120_v20 = vsel %vm7544_vm11, %v4119_v17, %v4115_v16  ;;  %vm7548_vm11 = vcmask 48128  }
0x1091   : > { %v4084_v28 = vpop.xlane.xlu0 %4083  ;;  %v4139_v52 = vsel %vm2225_vm14, %v4120_v20, %v4111_v33 }
0x1092   : > { %v4128_v12 = vrot.slane %v4084_v28, %v6641_v44 }
0x1094   : > { %v4129_v10 = vsel %vm7545_vm0, %v4128_v12, %v4124_v29  ;;  %v4229_v29 = vadd.s32 4294967292, %v6629_v37 }
0x1095   : > { %v4094_v50 = vpop.xlane.xlu0 %4093  ;;  %v4140_v3 = vsel %vm2227_vm2, %v4129_v10, %v4139_v52 }
0x1096   : > { %v4137_v43 = vrot.slane %v4094_v50, %v6641_v44 }
0x1098   : > { %v4138_v24 = vsel %vm7547_vm5, %v4137_v43, %v4133_v6 }
0x1099   : > { %v4141_v26 = vsel %vm2229_vm6, %v4138_v24, %v4140_v3 }
0x109a   : > { %v4144_v8 = vsel %vm4143_vm4, %v4141_v26, -inf }
0x109b   : > { %4145 = vmax.xlane.f32.xlu1 %v4144_v8 }
0x1128   : > { %v4146_v13 = vpop.xlane.xlu1 %4145 }
0x1129   : > { %v4151_v35 = vrot.slane %v4146_v13, %v6016_v2  ;;  %v4155_v31 = vrot.slane %v4146_v13, %v6022_v5  ;;  %v4159_v14 = vrot.slane %v4146_v13, %v7462_v57  ;;  %v4163_v36 = vrot.slane %v4146_v13, %v7463_v51 }
0x112b   : > { %v4168_v61 = vsub.f32 %v4059_v7, %v4151_v35  ;;  %v4169_v44 = vsub.f32 %v4064_v59, %v4151_v35  ;;  %v4171_v40 = vsub.f32 %v4074_v4, %v4155_v31  ;;  %v4170_v60 = vsub.f32 %v4069_v30, %v4155_v31 }
0x112c   : > { %v4173_v55 = vsub.f32 %v4084_v28, %v4159_v14  ;;  %v4172_v19 = vsub.f32 %v4079_v34, %v4159_v14  ;;  %v4175_v54 = vsub.f32 %v4094_v50, %v4163_v36  ;;  %v4174_v27 = vsub.f32 %v4089_v53, %v4163_v36 }
0x112d   : > { %v4176_v11 = vmul.f32 1.442695, %v4168_v61  ;;  %v4178_v18 = vmul.f32 1.442695, %v4169_v44  ;;  %v4182_v1 = vmul.f32 1.442695, %v4171_v40  ;;  %v7164_v50 = vsub.s32 %v4229_v29, %v6013_v63 }
0x112e   : > { %v4180_v39 = vmul.f32 1.442695, %v4170_v60  ;;  %v4186_v47 = vmul.f32 1.442695, %v4173_v55  ;;  %v4184_v21 = vmul.f32 1.442695, %v4172_v19 }
0x112f   : > { %5523 = vpow2.f32 %v4176_v11  ;;  %v4190_v41 = vmul.f32 1.442695, %v4175_v54  ;;  %v4188_v49 = vmul.f32 1.442695, %v4174_v27  ;;  %v4224_v53 = vadd.s32 4, %v6629_v37 }
0x1130   : > { %5525 = vpow2.f32 %v4178_v18 }
0x1131   : > { %5527 = vpow2.f32 %v4182_v1  ;;  %v7167_v10 = vsub.s32 %v4224_v53, %v6013_v63 }
0x1132   : > { %5529 = vpow2.f32 %v4180_v39 }
0x1133   : > { %5531 = vpow2.f32 %v4186_v47 }
0x1134   : > { %5533 = vpow2.f32 %v4184_v21 }
0x1135   : > { %5535 = vpow2.f32 %v4190_v41 }
0x1136   : > { %5537 = vpow2.f32 %v4188_v49 }
0x1139   : > { %v5524_v7 = vpop.eup %5523 }
0x113a   : > { %v5526_v30 = vpop.eup %5525  ;;  %4201 = vperm.xlu0 %5449, %v5524_v7  }
0x113b   : > { %4204 = vperm.xlu1 %5450, %v5526_v30   ;;  %v5528_v59 = vpop.eup %5527 }
0x113c   : > { %v5530_v34 = vpop.eup %5529 }
0x113d   : > { %v5532_v4 = vpop.eup %5531 }
0x113e   : > { %4210 = vperm.xlu0 %5449, %v5528_v59   ;;  %v5534_v17 = vpop.eup %5533 }
0x113f   : > { %4207 = vperm.xlu1 %5450, %v5530_v34   ;;  %v5536_v28 = vpop.eup %5535 }
0x1140   : > { %v5538_v48 = vpop.eup %5537 }
0x1142   : > { %4216 = vperm.xlu0 %5449, %v5532_v4  }
0x1143   : > { %4213 = vperm.xlu1 %5450, %v5534_v17  }
0x1146   : > { %4222 = vperm.xlu0 %5449, %v5536_v28  }
0x1147   : > { %4219 = vperm.xlu1 %5450, %v5538_v48  }
0x11b9   : > { %v4202_v16 = vpop.permute.xlu0 %4201 }
0x11ba   : > { %v4205_v12 = vpop.permute.xlu1 %4204  ;;  %v4228_v37 = vrot.slane %v4202_v16, %v7167_v10 }
0x11bb   : > { %v4233_v3 = vrot.slane %v4205_v12, %v7164_v50 }
0x11bd   : > { %v4211_v46 = vpop.permute.xlu0 %4210  ;;  %v4235_v14 = vsel %vm4234_vm9, %v4233_v3, %v4228_v37 }
0x11be   : > { %v4208_v20 = vpop.permute.xlu1 %4207  ;;  %v4243_v6 = vrot.slane %v4211_v46, %v7164_v50 }
0x11bf   : > { %v4239_v33 = vrot.slane %v4208_v20, %v7167_v10 }
0x11c1   : > { %v4217_v43 = vpop.permute.xlu0 %4216  ;;  %v4244_v8 = vsel %vm4234_vm9, %v4243_v6, %v4239_v33 }
0x11c2   : > { %v4214_v52 = vpop.permute.xlu1 %4213  ;;  %v4252_v24 = vrot.slane %v4217_v43, %v7164_v50  ;;  %v4263_v44 = vsel %vm2225_vm14, %v4244_v8, %v4235_v14 }
0x11c3   : > { %v4248_v26 = vrot.slane %v4214_v52, %v7167_v10 }
0x11c5   : > { %v4223_v13 = vpop.permute.xlu0 %4222  ;;  %v4253_v63 = vsel %vm4234_vm9, %v4252_v24, %v4248_v26 }
0x11c6   : > { %v4220_v35 = vpop.permute.xlu1 %4219  ;;  %v4261_v31 = vrot.slane %v4223_v13, %v7164_v50  ;;  %v4264_v60 = vsel %vm2227_vm2, %v4253_v63, %v4263_v44 }
0x11c7   : > { %v4257_v61 = vrot.slane %v4220_v35, %v7167_v10 }
0x11c9   : > { %v4262_v40 = vsel %vm4234_vm9, %v4261_v31, %v4257_v61  ;;  %v7560_v61 = vld [vmem:[#allocation31_spill] sm:$0xff] }
0x11ca   : > { %v4265_v11 = vsel %vm2229_vm6, %v4262_v40, %v4264_v60  ;;  %v7561_v60 = vld [vmem:[#allocation32_spill] sm:$0xff] }
0x11cb   : > { %v4268_v18 = vsel %vm4267_vm12, %v4265_v11, 0.0 }
0x11cc   : > { %4269 = vadd.xlane.f32.xlu1 %v4268_v18 }
0x1259   : > { %v4270_v36 = vpop.xlane.xlu1 %4269 }
0x125a   : > { %v4275_v55 = vrot.slane %v4270_v36, %v6016_v2  ;;  %v4279_v1 = vrot.slane %v4270_v36, %v6022_v5  ;;  %v4283_v39 = vrot.slane %v4270_v36, %v7462_v57  ;;  %v4287_v21 = vrot.slane %v4270_v36, %v7463_v51 }
0x125c   : > { %5539 = vrcp.f32 %v4275_v55 }
0x125d   : > { %5541 = vrcp.f32 %v4279_v1 }
0x125e   : > { %5543 = vrcp.f32 %v4283_v39 }
0x125f   : > { %5545 = vrcp.f32 %v4287_v21 }
0x1266   : > { %v5540_v19 = vpop.eup %5539 }
0x1267   : > { %v4293_v54 = vmul.f32 %v5540_v19, %v5524_v7  ;;  %v4294_v47 = vmul.f32 %v5540_v19, %v5526_v30  ;;  %v5542_v27 = vpop.eup %5541 }
0x1268   : > { %v4296_v41 = vmul.f32 %v5542_v27, %v5530_v34  ;;  %v4297_v49 = vmul.f32 %v5542_v27, %v5528_v59  ;;  %v5544_v2 = vpop.eup %5543 }
0x1269   : > { %4313 = vperm.xlu0 %5449, %v4293_v54   ;;  %v4299_v16 = vmul.f32 %v5544_v2, %v5534_v17  ;;  %v4300_v5 = vmul.f32 %v5544_v2, %v5532_v4  ;;  %v5546_v12 = vpop.eup %5545 }
0x126a   : > { %v4302_v57 = vmul.f32 %v5546_v12, %v5538_v48  ;;  %v4303_v7 = vmul.f32 %v5546_v12, %v5536_v28 }
0x126d   : > { %4316 = vperm.xlu0 %5449, %v4294_v47  }
0x1271   : > { %4319 = vperm.xlu0 %5449, %v4296_v41  }
0x1275   : > { %4322 = vperm.xlu0 %5449, %v4297_v49  }
0x1279   : > { %4325 = vperm.xlu0 %5449, %v4299_v16  }
0x127d   : > { %4328 = vperm.xlu0 %5449, %v4300_v5  }
0x1281   : > { %4331 = vperm.xlu0 %5449, %v4302_v57  }
0x1285   : > { %4334 = vperm.xlu0 %5449, %v4303_v7  }
0x12e8   : > { %v4314_v30 = vpop.permute.xlu0 %4313 }
0x12e9   : > { %v4339_v28 = vrot.slane %v4314_v30, %v7167_v10 }
0x12ec   : > { %v4317_v29 = vpop.permute.xlu0 %4316 }
0x12ed   : > { %v4343_v4 = vrot.slane %v4317_v29, %v7164_v50 }
0x12ef   : > { %v4344_v24 = vsel %vm4234_vm9, %v4343_v4, %v4339_v28 }
0x12f0   : > { %v4320_v53 = vpop.permute.xlu0 %4319 }
0x12f1   : > { %v4348_v33 = vrot.slane %v4320_v53, %v7167_v10  ;;  %v7562_v53 = vld [vmem:[#allocation45_spill] sm:$0xff] }
0x12f4   : > { %v4323_v51 = vpop.permute.xlu0 %4322 }
0x12f5   : > { %v4352_v59 = vrot.slane %v4323_v51, %v7164_v50 }
0x12f7   : > { %v4353_v6 = vsel %vm4234_vm9, %v4352_v59, %v4348_v33 }
0x12f8   : > { %v4326_v34 = vpop.permute.xlu0 %4325  ;;  %v4372_v26 = vsel %vm2225_vm14, %v4353_v6, %v4344_v24  ;;  %v4454_v8 = vsel %vm2887_vm10, %v4353_v6, %v4344_v24 }
0x12f9   : > { %v4357_v48 = vrot.slane %v4326_v34, %v7167_v10 }
0x12fc   : > { %v4329_v46 = vpop.permute.xlu0 %4328 }
0x12fd   : > { %v4361_v20 = vrot.slane %v4329_v46, %v7164_v50 }
0x12ff   : > { %v4362_v43 = vsel %vm4234_vm9, %v4361_v20, %v4357_v48 }
0x1300   : > { %v4332_v17 = vpop.permute.xlu0 %4331  ;;  %v4373_v13 = vsel %vm2227_vm2, %v4362_v43, %v4372_v26  ;;  %v4456_v63 = vsel %vm4455_vm13, %v4362_v43, %v4454_v8 }
0x1301   : > { %v4366_v3 = vrot.slane %v4332_v17, %v7167_v10 }
0x1304   : > { %v4335_v52 = vpop.permute.xlu0 %4334 }
0x1305   : > { %v4370_v37 = vrot.slane %v4335_v52, %v7164_v50  ;;  %v7559_v50 = vld [vmem:[#allocation15_spill] sm:$0xff] }
0x1307   : > { %v4371_v35 = vsel %vm4234_vm9, %v4370_v37, %v4366_v3 }
0x1308   : > { %v4374_v31 = vsel %vm2229_vm6, %v4371_v35, %v4373_v13  ;;  %v4458_v10 = vsel %vm4457_vm8, %v4371_v35, %v4456_v63 }
0x1309   : > { %4461 = vst.msk [vmem:[%s541_s27 - $0x4] sm:$0xf0] %vm4460_vm15, %v4458_v10  ;;  %5219 = vmatmul.mubr.msk.f32.vlgmr.msra.gmra.mrb[48].mxu0 %vm7548_vm11, %v4374_v31 }
0x130a   : > { %5386 = vmatpush3.bf16.msra.mxu0 %v7468_v32  ;;  %v7549_v32 = vld [vmem:[#allocation28_spill] sm:$0xff] }
0x130b   : > { %5388 = vmatprep.subr.bf16.mxu0 %v7469_v56  ;;  %v7550_v56 = vld [vmem:[#allocation29_spill] sm:$0xff] }
0x130e   : > { %5390 = vmatpush3.bf16.msra.mxu0 %v7472_v42 }
0x130f   : > { %5392 = vmatprep.subr.bf16.mxu0 %v7473_v38 }
0x1312   : > { %5394 = vmatpush3.bf16.msra.mxu0 %v7474_v62 }
0x1313   : > { %5396 = vmatprep.subr.bf16.mxu0 %v7475_v58  ;;  %v7551_v58 = vld [vmem:[#allocation9_spill] sm:$0xff] }
0x1316   : > { %5398 = vmatpush3.bf16.msra.mxu0 %v7476_v0  ;;  %v7552_v0 = vmov 0.0  }
0x1317   : > { %5400 = vmatprep.subr.bf16.mxu0 %v7477_v23  ;;  %v7553_v23 = vld [vmem:[#allocation11_spill] sm:$0xff] }
0x131a   : > { %5402 = vmatpush3.bf16.msra.mxu0 %v7478_v15  ;;  %v7554_v15 = vld [vmem:[#allocation51_spill] sm:$0xff] }
0x131b   : > { %5404 = vmatprep.subr.bf16.mxu0 %v7479_v45  ;;  %v7555_v45 = vld [vmem:[#allocation13_spill] sm:$0xff] }
0x131e   : > { %5406 = vmatpush3.bf16.msra.mxu0 %v7480_v22  ;;  %v7556_v22 = vld [vmem:[#allocation53_spill] sm:$0xff] }
0x131f   : > { %5408 = vmatprep.subr.bf16.mxu0 %v7481_v9  ;;  %v7557_v9 = vld [vmem:[#allocation8_spill] sm:$0xff] }
0x1322   : > { %5410 = vmatpush3.bf16.msra.mxu0 %v7482_v25  ;;  %v7558_v25 = vld [vmem:[#allocation10_spill] sm:$0xff] }
0x1323   : > { %5412 = vmatprep.subr.bf16.mxu0 %v7549_v32 }
0x1326   : > { %5414 = vmatpush3.bf16.msra.mxu0 %v7550_v56 }
0x13dc   : > { %v4450_v42 = vpop.f32.mrb[48].mxu0 }
0x13dd   : > { %4462 = vst.msk [vmem:[#allocation4] sm:$0xf] %vm897_vm7, %v4450_v42  ;;  %v5220_v38 = vpop.f32.mrb[49].mxu0 }
0x13e4   : > { %v4463_v62 = vld [vmem:[#allocation4] sm:$0xff] }
0x13e5   : > { %4939 = vmatmul.mubr.msk.f32.vlgmr.msra.gmra.mrb[44].mxu1 %vm622_vm1, %v4463_v62 }
0x13e6   : > { %5378 = vmatpush1.bf16.msra.mxu1 %v7551_v58  ;;  %4545 = vmatprep.mubr.f32.mxu1 %v7552_v0 }
0x13e7   : > { %5380 = vmatprep.subr.bf16.mxu1 %v7553_v23 }
0x13e9   : > { %4940 = vmatmul.mubr.msk.f32.gmra.mrb[46].mxu1 %vm622_vm1, %v7554_v15 }
0x13ea   : > { %5382 = vmatpush1.bf16.msra.mxu1 %v7555_v45  ;;  %4551 = vmatprep.mubr.f32.mxu1 %v7552_v0 }
0x13ed   : > { %4941 = vmatmul.mubr.msk.f32.gmra.mrb[48].mxu1 %vm622_vm1, %v7556_v22 }
0x13ee   : > { %4622 = vmatprep.mubr.f32.mxu1 %v7552_v0 }
0x13f1   : > { %4942 = vmatmul.mubr.msk.f32.vlgmr.msra.gmra.mrb[44].mxu1 %vm622_vm1, %v7557_v9 }
0x13f2   : > { %4628 = vmatprep.mubr.f32.mxu1 %v7552_v0 }
0x13f5   : > { %4943 = vmatmul.mubr.msk.f32.gmra.mrb[46].mxu1 %vm622_vm1, %v7558_v25 }
0x13f6   : > { %4634 = vmatprep.mubr.f32.mxu1 %v7552_v0 }
0x13f9   : > { %4944 = vmatmul.mubr.msk.f32.gmra.mrb[48].mxu1 %vm622_vm1, %v7559_v50 }
0x14c4   : > { %v4624_v14 = vpop.f32.mrb[44].mxu1 }
0x14c5   : > { %v4641_v44 = vadd.f32 %v4624_v14, %v7560_v61  ;;  %v4626_v40 = vpop.f32.mrb[45].mxu1 }
0x14c6   : > { %v4642_v11 = vadd.f32 %v4626_v40, %v7561_v60 }
0x14c7   : > { %v4647_v55 = vmax.f32 %v4641_v44, 0.0 }
0x14c8   : > { %v4648_v18 = vmax.f32 %v4642_v11, 0.0  ;;  %v4630_v36 = vpop.f32.mrb[46].mxu1 }
0x14c9   : > { %v4643_v1 = vadd.f32 %v4630_v36, %v7560_v61  ;;  %v4632_v19 = vpop.f32.mrb[47].mxu1 }
0x14ca   : > { %v4644_v39 = vadd.f32 %v4632_v19, %v7561_v60  ;;  %4717 = vmatprep.mubr.f32.mxu0 %v4648_v18 }
0x14cb   : > { %4718 = vmatmul.mubr.f32.vlgmr.msra.gmra.mrb[50].mxu0 %v4647_v55  ;;  %v4649_v27 = vmax.f32 %v4643_v1, 0.0 }
0x14cc   : > { %v4650_v54 = vmax.f32 %v4644_v39, 0.0  ;;  %v4636_v47 = vpop.f32.mrb[48].mxu1 }
0x14cd   : > { %v4645_v21 = vadd.f32 %v4636_v47, %v7560_v61  ;;  %v4638_v41 = vpop.f32.mrb[49].mxu1 }
0x14ce   : > { %v4646_v49 = vadd.f32 %v4638_v41, %v7561_v60  ;;  %4722 = vmatprep.mubr.f32.mxu0 %v4650_v54 }
0x14cf   : > { %4723 = vmatmul.mubr.f32.gmra.mrb[52].mxu0 %v4649_v27  ;;  %v4651_v16 = vmax.f32 %v4645_v21, 0.0 }
0x14d0   : > { %v4652_v2 = vmax.f32 %v4646_v49, 0.0 }
0x14d2   : > { %4727 = vmatprep.mubr.f32.mxu0 %v4652_v2 }
0x14d3   : > { %4728 = vmatmul.mubr.f32.gmra.mrb[54].mxu0 %v4651_v16 }
0x159e   : > { %v5106_v5 = vpop.f32.mrb[50].mxu0 }
0x159f   : > { %v5107_v12 = vpop.f32.mrb[51].mxu0 }
0x15a0   : > { %v5108_v57 = vadd.f32 %v5107_v12, %v5106_v5 }
0x15a2   : > { %v4733_v7 = vadd.f32 %v5108_v57, %v7557_v9  ;;  %v5109_v30 = vpop.f32.mrb[52].mxu0 }
0x15a3   : > { %v5110_v29 = vpop.f32.mrb[53].mxu0 }
0x15a4   : > { %v4736_v51 = vadd.f32 %v7562_v53, %v4733_v7 }
0x15a6   : > { %4739 = vst.msk [vmem:[#allocation5] sm:$0xff] %vm622_vm1, %v4736_v51  ;;  %v5112_v34 = vpop.f32.mrb[54].mxu0 }
0x15a7   : > { %v5113_v46 = vpop.f32.mrb[55].mxu0 }
0x15ad   : > { %v4742_v59 = vld [vmem:[#allocation5] sm:$0xf] }
0x15ae   : > { %4743 = vst.msk [vmem:[%s6127_s20] sm:$0xf] %vm897_vm7, %v4742_v59 }
0x15af PF: > { %s25_s29 = sadd.s32 1, %s5554_s29  }
0x15b0   : > { %p22_p5 = scmp.ge.s32.totalorder %s25_s29, 4  }
0x15b2   :  { %24 = sbr.rel (!%p22_p5) target bundleno = 1 (0x1), region = 125 }

</bundles_post_ra>
